<compile_context>
chip_gen: v7x
topology: tpu7x:2x2x1
jax: 0.10.0
libtpu: 0.0.40
codegen_flags: <defaults>
</compile_context>

<pallas_src>
import functools

import jax
import jax.numpy as jnp
from jax import lax
from jax.experimental import pallas as pl
from jax.experimental.pallas import tpu as pltpu


# ---------------------------------------------------------------------------
# Kernel 1: fused comp + hole-L1 + valid-L1 + total-variation (partial sums)
# ---------------------------------------------------------------------------
def _pick_row_tile(rows, lanes):
    # largest row tile that divides `rows`, is sublane-aligned and keeps each
    # block <= ~1 MiB (so 5 double-buffered arrays stay under the scoped VMEM
    # default even on v5e / v7x).
    for cand in (512, 256, 128, 64, 32, 16, 8):
        if rows % cand == 0 and cand * lanes * 4 <= (1 << 20):
            return cand
    return rows


def masked_losses_and_comp(img, mask, output, gt):
    """Returns comp (NCHW f32) and the hole / valid / tv scalar losses."""
    B, C, H, W = img.shape
    R = B * C          # one row per (batch, channel) image plane
    L = H * W          # lane-dense flattened spatial dimension

    def flat(x):
        return x.astype(jnp.float32).reshape(R, L)

    img2, mask2, out2, gt2 = flat(img), flat(mask), flat(output), flat(gt)

    tile_r = _pick_row_tile(R, L)
    n_tiles = R // tile_r

    def kernel(img_ref, mask_ref, out_ref, gt_ref, comp_ref, part_ref):
        i = pl.program_id(0)
        x = img_ref[...]
        m = mask_ref[...]
        o = out_ref[...]
        g = gt_ref[...]

        inv = 1.0 - m
        comp = m * x + inv * o
        comp_ref[...] = comp

        hole_s = jnp.sum(jnp.abs(inv * (o - g)))
        valid_s = jnp.sum(jnp.abs(m * (o - g)))

        # Total variation via lane rotations (XLU) + masks: each row of the
        # block is a full (H, W) plane flattened row-major, so neighbours in
        # W are +1 and neighbours in H are +W along the lane axis.
        cols = lax.broadcasted_iota(jnp.int32, comp.shape, 1)
        right = pltpu.roll(comp, L - 1, axis=1)    # right[..., i] = comp[..., i+1]
        down = pltpu.roll(comp, L - W, axis=1)     # down[...,  i] = comp[..., i+W]
        dh = jnp.where((cols % W) != (W - 1), jnp.abs(comp - right), 0.0)
        dv = jnp.where(cols < (H - 1) * W, jnp.abs(comp - down), 0.0)

        # Per-tile partial sums (summed + normalized once, outside).
        part_ref[i, 0] = hole_s
        part_ref[i, 1] = valid_s
        part_ref[i, 2] = jnp.sum(dh)
        part_ref[i, 3] = jnp.sum(dv)

    comp2, partials = pl.pallas_call(
        kernel,
        grid=(n_tiles,),
        in_specs=[pl.BlockSpec((tile_r, L), lambda i: (i, 0))] * 4,
        out_specs=(pl.BlockSpec((tile_r, L), lambda i: (i, 0)),
                   pl.BlockSpec(memory_space=pltpu.MemorySpace.SMEM)),
        out_shape=(jax.ShapeDtypeStruct((R, L), jnp.float32),
                   jax.ShapeDtypeStruct((n_tiles, 4), jnp.float32)),
        compiler_params=pltpu.CompilerParams(
            dimension_semantics=("arbitrary",)),
    )(img2, mask2, out2, gt2)

    sums = jnp.sum(partials, axis=0)
    hole = sums[0] / float(R * L)
    valid = sums[1] / float(R * L)
    tv = sums[2] / float(R * H * (W - 1)) + sums[3] / float(R * (H - 1) * W)
    return comp2.reshape(B, C, H, W), hole, valid, tv


# ---------------------------------------------------------------------------
# Kernel 2: 3x3 "same" convolution + bias + ReLU, NHWC, direct (no im2col)
# ---------------------------------------------------------------------------
def conv3x3_relu_nhwc(x, w9, b):
    """x: (N, H, W, Cin) f32, w9: (9, Cin, Cout) bf16, b: (Cout,) f32.

    One grid step per image ("parallel" -> shards across v7x's 2 TCs).  The 3x3
    conv is 9 accumulating bf16 MXU dots over sublane-shifted views of the
    zero-padded image; bias + ReLU fused in an f32 epilogue (v5e-safe).
    """
    N, H, W, Cin = x.shape
    Cout = w9.shape[-1]
    Hp, Wp = H + 2, W + 2
    Q = (H - 1) * Wp + W        # accumulator rows (output kept at padded-row stride)

    xp = jnp.pad(x.astype(jnp.float32), ((0, 0), (1, 1), (1, 1), (0, 0)))
    xf = xp.reshape(N, Hp * Wp, Cin)
    bias = b.reshape(1, Cout).astype(jnp.float32)

    def kernel(x_ref, w_ref, b_ref, y_ref):
        acc = jnp.zeros((Q, Cout), jnp.float32)
        for kh in range(3):
            for kw in range(3):
                off = kh * Wp + kw
                patch = x_ref[0, off:off + Q, :].astype(jnp.bfloat16)
                acc = acc + jnp.dot(patch, w_ref[kh * 3 + kw],
                                    preferred_element_type=jnp.float32)
        y_ref[0] = jnp.maximum(acc + b_ref[...], 0.0)   # f32 epilogue

    flops = 2 * N * Q * 9 * Cin * Cout
    bytes_accessed = xf.size * 4 + w9.size * 2 + bias.size * 4 + N * Q * Cout * 4

    y = pl.pallas_call(
        kernel,
        grid=(N,),
        in_specs=[pl.BlockSpec((1, Hp * Wp, Cin), lambda n: (n, 0, 0)),
                  pl.BlockSpec((9, Cin, Cout), lambda n: (0, 0, 0)),
                  pl.BlockSpec((1, Cout), lambda n: (0, 0))],
        out_specs=pl.BlockSpec((1, Q, Cout), lambda n: (n, 0, 0)),
        out_shape=jax.ShapeDtypeStruct((N, Q, Cout), jnp.float32),
        compiler_params=pltpu.CompilerParams(
            dimension_semantics=("parallel",)),
        cost_estimate=pl.CostEstimate(flops=flops, transcendentals=0,
                                      bytes_accessed=bytes_accessed),
    )(xf, w9, bias)

    # Un-scramble the padded-stride rows back to (N, H, W, Cout): row q
    # corresponds to spatial (h, w) with q = h*Wp + w, valid for w < W.
    y = jnp.pad(y, ((0, 0), (0, H * Wp - Q), (0, 0)))
    y = y.reshape(N, H, Wp, Cout)[:, :, :W, :]
    return y


def maxpool2_nhwc(x):
    N, H, W, C = x.shape
    # TODO(synk): fold the 2x2 max-pool into the conv kernel epilogue; the
    # stride-2 sublane compaction is left to XLA here for lowering safety.
    return jnp.max(x.reshape(N, H // 2, 2, W // 2, 2, C), axis=(2, 4))


# ---------------------------------------------------------------------------
# Kernel 3: per-level fused perceptual L1 + gram (style) L1
# ---------------------------------------------------------------------------
def level_perceptual_style(feat, B):
    """feat: (3B, h, w, c) f32, images ordered per batch as [comp, output, gt].

    One kernel per feature level: both perceptual L1 partial sums and both
    gram-difference partial sums per batch element, grams on the MXU.
    """
    N3, h, w, c = feat.shape
    HW = h * w
    # channels on sublanes, spatial on lanes: gram = f @ f.T (rhs-transposed dot)
    f = jnp.transpose(feat.reshape(N3, HW, c), (0, 2, 1))
    inv_norm = 1.0 / float(c * HW)

    def kernel(f_ref, part_ref):
        b = pl.program_id(0)
        fc = f_ref[0]     # (c, HW) comp features
        fo = f_ref[1]     # output features
        fg = f_ref[2]     # gt features

        perc = jnp.sum(jnp.abs(fo - fg)) + jnp.sum(jnp.abs(fc - fg))

        dn = (((1,), (1,)), ((), ()))          # f @ f.T
        gc = lax.dot_general(fc, fc, dn, preferred_element_type=jnp.float32)
        go = lax.dot_general(fo, fo, dn, preferred_element_type=jnp.float32)
        gg = lax.dot_general(fg, fg, dn, preferred_element_type=jnp.float32)
        style = (jnp.sum(jnp.abs(go - gg)) + jnp.sum(jnp.abs(gc - gg))) * inv_norm

        part_ref[b, 0] = perc
        part_ref[b, 1] = style

    partials = pl.pallas_call(
        kernel,
        grid=(B,),
        in_specs=[pl.BlockSpec((3, c, HW), lambda b: (b, 0, 0))],
        out_specs=pl.BlockSpec(memory_space=pltpu.MemorySpace.SMEM),
        out_shape=jax.ShapeDtypeStruct((B, 2), jnp.float32),
        compiler_params=pltpu.CompilerParams(
            dimension_semantics=("arbitrary",)),
    )(f)

    perc = jnp.sum(partials[:, 0]) / float(B * HW * c)
    style = jnp.sum(partials[:, 1]) / float(B * c * c)
    return perc, style


# ---------------------------------------------------------------------------
# Deterministic VGG-like extractor (3 stages: conv3x3 + ReLU + maxpool2), NHWC
# ---------------------------------------------------------------------------
class Extractor:
    def __init__(self, key):
        chans = [(3, 8), (8, 16), (16, 32)]
        self.params = []
        for i, (cin, cout) in enumerate(chans):
            kw = jax.random.fold_in(key, i)
            std = 1.0 / jnp.sqrt(cin * 9.0)
            w = jax.random.normal(kw, (cout, cin, 3, 3), jnp.float32) * std
            # (kh, kw, cin, cout) flattened to (9, cin, cout); bf16 for the MXU.
            w9 = jnp.transpose(w, (2, 3, 1, 0)).reshape(9, cin, cout)
            self.params.append((w9.astype(jnp.bfloat16),
                                jnp.zeros((cout,), jnp.float32)))

    def __call__(self, x_nhwc):
        feats = []
        h = x_nhwc
        for (w9, b) in self.params:
            h = maxpool2_nhwc(conv3x3_relu_nhwc(h, w9, b))
            feats.append(h)
        return feats


# ---------------------------------------------------------------------------
# TotalLoss.forward
# ---------------------------------------------------------------------------
def total_loss(img, mask, output, gt, extractor):
    B, C, H, W = img.shape
    mask = jnp.broadcast_to(mask, img.shape)

    comp, hole, valid, tv = masked_losses_and_comp(img, mask, output, gt)
    loss_dict = {'hole': hole, 'valid': valid, 'tv': tv}

    if C == 3:
        def to3(x):
            return x
    elif C == 1:
        def to3(x):
            return jnp.concatenate([x, x, x], axis=-1)
    else:
        raise ValueError('only gray rgb')

    def nhwc(x):
        return to3(jnp.transpose(x.astype(jnp.float32), (0, 2, 3, 1)))

    # one batched extractor pass over [comp, output, gt] (3B images),
    # interleaved per batch element so each grid step of the per-level loss
    # kernel grabs its [comp, output, gt] triple as one contiguous block.
    stacked = jnp.stack([nhwc(comp), nhwc(output), nhwc(gt)], axis=1)
    stacked = stacked.reshape(3 * B, H, W, stacked.shape[-1])
    feats = extractor(stacked)

    perceptual = 0.0
    style = 0.0
    for f in feats:
        p, s = level_perceptual_style(f, B)
        perceptual = perceptual + p
        style = style + s
    loss_dict['perceptual'] = perceptual
    loss_dict['style'] = style
    return loss_dict


if __name__ == "__main__":
    key = jax.random.PRNGKey(0)
    k_img, k_mask, k_out, k_gt, k_ext = jax.random.split(key, 5)

    B, C, H, W = 2, 3, 16, 16
    img = jax.random.uniform(k_img, (B, C, H, W), jnp.float32)
    mask = (jax.random.uniform(k_mask, (B, 1, H, W)) > 0.5).astype(jnp.float32)
    mask = jnp.broadcast_to(mask, (B, C, H, W))
    output = jax.random.uniform(k_out, (B, C, H, W), jnp.float32)
    gt = jax.random.uniform(k_gt, (B, C, H, W), jnp.float32)

    extractor = Extractor(k_ext)
    loss_fn = jax.jit(functools.partial(total_loss, extractor=extractor))
    losses = loss_fn(img, mask, output, gt)
    losses = jax.tree_util.tree_map(jax.block_until_ready, losses)
    print("KERNEL_OK")
</pallas_src>

<mosaic_0001>
module attributes {stable_mosaic.version = 11 : i64} {
  func.func @kernel(%arg0: i32, %arg1: memref<6x256xf32, #tpu.memory_space<vmem>>, %arg2: memref<6x256xf32, #tpu.memory_space<vmem>>, %arg3: memref<6x256xf32, #tpu.memory_space<vmem>>, %arg4: memref<6x256xf32, #tpu.memory_space<vmem>>, %arg5: memref<6x256xf32, #tpu.memory_space<vmem>>, %arg6: memref<1x4xf32, #tpu.memory_space<smem>>) attributes {dimension_semantics = [#tpu.dimension_semantics<arbitrary>], iteration_bounds = array<i64: 1>, scalar_prefetch = 0 : i64, scratch_operands = 0 : i64, tpu.core_type = #tpu.core_type<tc>, window_params = [{transform_indices = @transform_0, window_bounds = array<i64: 6, 256>}, {transform_indices = @transform_1, window_bounds = array<i64: 6, 256>}, {transform_indices = @transform_2, window_bounds = array<i64: 6, 256>}, {transform_indices = @transform_3, window_bounds = array<i64: 6, 256>}, {transform_indices = @transform_4, window_bounds = array<i64: 6, 256>}, {transform_indices = @transform_5, window_bounds = array<i64: 1, 4>}]} {
    %c0 = arith.constant 0 : index
    %c0_0 = arith.constant 0 : index
    %0 = vector.load %arg1[%c0, %c0_0] : memref<6x256xf32, #tpu.memory_space<vmem>>, vector<6x256xf32>
    %c0_1 = arith.constant 0 : index
    %c0_2 = arith.constant 0 : index
    %1 = vector.load %arg2[%c0_1, %c0_2] : memref<6x256xf32, #tpu.memory_space<vmem>>, vector<6x256xf32>
    %c0_3 = arith.constant 0 : index
    %c0_4 = arith.constant 0 : index
    %2 = vector.load %arg3[%c0_3, %c0_4] : memref<6x256xf32, #tpu.memory_space<vmem>>, vector<6x256xf32>
    %c0_5 = arith.constant 0 : index
    %c0_6 = arith.constant 0 : index
    %3 = vector.load %arg4[%c0_5, %c0_6] : memref<6x256xf32, #tpu.memory_space<vmem>>, vector<6x256xf32>
    %cst = arith.constant 1.000000e+00 : f32
    %4 = vector.broadcast %cst : f32 to vector<6x256xf32>
    %5 = arith.subf %4, %1 : vector<6x256xf32>
    %6 = arith.mulf %1, %0 : vector<6x256xf32>
    %7 = arith.mulf %5, %2 : vector<6x256xf32>
    %8 = arith.addf %6, %7 : vector<6x256xf32>
    %c0_7 = arith.constant 0 : index
    %c0_8 = arith.constant 0 : index
    %9 = vector.load %arg5[%c0_7, %c0_8] : memref<6x256xf32, #tpu.memory_space<vmem>>, vector<6x256xf32>
    tpu.vector_store %arg5[%c0_7, %c0_8], %8 {strides = array<i32>} : memref<6x256xf32, #tpu.memory_space<vmem>>, vector<6x256xf32>,
    %10 = arith.subf %2, %3 : vector<6x256xf32>
    %11 = arith.mulf %5, %10 : vector<6x256xf32>
    %12 = math.absf %11 : vector<6x256xf32>
    %13 = vector.shape_cast %12 : vector<6x256xf32> to vector<1x6x256xf32>
    %cst_9 = arith.constant dense<0.000000e+00> : vector<1xf32>
    %14 = vector.multi_reduction <add>, %13, %cst_9 [1, 2] : vector<1x6x256xf32> to vector<1xf32>
    %15 = vector.shape_cast %14 : vector<1xf32> to vector<1x1x1xf32>
    %16 = vector.extract %15[0, 0, 0] : f32 from vector<1x1x1xf32>
    %17 = arith.subf %2, %3 : vector<6x256xf32>
    %18 = arith.mulf %1, %17 : vector<6x256xf32>
    %19 = math.absf %18 : vector<6x256xf32>
    %20 = vector.shape_cast %19 : vector<6x256xf32> to vector<1x6x256xf32>
    %cst_10 = arith.constant dense<0.000000e+00> : vector<1xf32>
    %21 = vector.multi_reduction <add>, %20, %cst_10 [1, 2] : vector<1x6x256xf32> to vector<1xf32>
    %22 = vector.shape_cast %21 : vector<1xf32> to vector<1x1x1xf32>
    %23 = vector.extract %22[0, 0, 0] : f32 from vector<1x1x1xf32>
    %24 = tpu.iota {dimensions = array<i32: 1>} : vector<6x256xi32>
    %c255_i32 = arith.constant 255 : i32
    %25 = tpu.dynamic_rotate %8 by %c255_i32 dim 1 : vector<6x256xf32>, i32 -> vector<6x256xf32>
    %c240_i32 = arith.constant 240 : i32
    %26 = tpu.dynamic_rotate %8 by %c240_i32 dim 1 : vector<6x256xf32>, i32 -> vector<6x256xf32>
    %c16_i32 = arith.constant 16 : i32
    %c0_i32 = arith.constant 0 : i32
    %27 = arith.cmpi eq, %c16_i32, %c0_i32 : i32
    %c1_i32 = arith.constant 1 : i32
    %28 = arith.select %27, %c1_i32, %c16_i32 : i32
    %29 = vector.broadcast %28 : i32 to vector<6x256xi32>
    %30 = arith.remsi %24, %29 : vector<6x256xi32>
    %c0_i32_11 = arith.constant 0 : i32
    %31 = vector.broadcast %c0_i32_11 : i32 to vector<6x256xi32>
    %32 = arith.cmpi ne, %30, %31 : vector<6x256xi32>
    %c0_i32_12 = arith.constant 0 : i32
    %33 = vector.broadcast %c0_i32_12 : i32 to vector<6x256xi32>
    %34 = arith.cmpi slt, %30, %33 : vector<6x256xi32>
    %c0_i32_13 = arith.constant 0 : i32
    %35 = arith.cmpi slt, %28, %c0_i32_13 : i32
    %36 = vector.broadcast %35 : i1 to vector<6x256xi1>
    %37 = vector.broadcast %36 : vector<6x256xi1> to vector<6x256xi1>
    %38 = arith.xori %34, %37 : vector<6x256xi1>
    %39 = arith.andi %38, %32 : vector<6x256xi1>
    %40 = vector.broadcast %28 : i32 to vector<6x256xi32>
    %41 = arith.addi %30, %40 : vector<6x256xi32>
    %42 = arith.select %39, %41, %30 : vector<6x256xi1>, vector<6x256xi32>
    %c15_i32 = arith.constant 15 : i32
    %43 = vector.broadcast %c15_i32 : i32 to vector<6x256xi32>
    %44 = arith.cmpi ne, %42, %43 : vector<6x256xi32>
    %45 = arith.subf %8, %25 : vector<6x256xf32>
    %46 = math.absf %45 : vector<6x256xf32>
    %cst_14 = arith.constant 0.000000e+00 : f32
    %47 = vector.broadcast %cst_14 : f32 to vector<6x256xf32>
    %48 = arith.select %44, %46, %47 : vector<6x256xi1>, vector<6x256xf32>
    %c240_i32_15 = arith.constant 240 : i32
    %49 = vector.broadcast %c240_i32_15 : i32 to vector<6x256xi32>
    %50 = arith.cmpi slt, %24, %49 : vector<6x256xi32>
    %51 = arith.subf %8, %26 : vector<6x256xf32>
    %52 = math.absf %51 : vector<6x256xf32>
    %cst_16 = arith.constant 0.000000e+00 : f32
    %53 = vector.broadcast %cst_16 : f32 to vector<6x256xf32>
    %54 = arith.select %50, %52, %53 : vector<6x256xi1>, vector<6x256xf32>
    %55 = arith.index_cast %arg0 : i32 to index
    %c0_17 = arith.constant 0 : index
    %56 = memref.load %arg6[%55, %c0_17] : memref<1x4xf32, #tpu.memory_space<smem>>
    memref.store %16, %arg6[%55, %c0_17] : memref<1x4xf32, #tpu.memory_space<smem>>
    %57 = arith.index_cast %arg0 : i32 to index
    %c1 = arith.constant 1 : index
    %58 = memref.load %arg6[%57, %c1] : memref<1x4xf32, #tpu.memory_space<smem>>
    memref.store %23, %arg6[%57, %c1] : memref<1x4xf32, #tpu.memory_space<smem>>
    %59 = vector.shape_cast %48 : vector<6x256xf32> to vector<1x6x256xf32>
    %cst_18 = arith.constant dense<0.000000e+00> : vector<1xf32>
    %60 = vector.multi_reduction <add>, %59, %cst_18 [1, 2] : vector<1x6x256xf32> to vector<1xf32>
    %61 = vector.shape_cast %60 : vector<1xf32> to vector<1x1x1xf32>
    %62 = vector.extract %61[0, 0, 0] : f32 from vector<1x1x1xf32>
    %63 = arith.index_cast %arg0 : i32 to index
    %c2 = arith.constant 2 : index
    %64 = memref.load %arg6[%63, %c2] : memref<1x4xf32, #tpu.memory_space<smem>>
    memref.store %62, %arg6[%63, %c2] : memref<1x4xf32, #tpu.memory_space<smem>>
    %65 = vector.shape_cast %54 : vector<6x256xf32> to vector<1x6x256xf32>
    %cst_19 = arith.constant dense<0.000000e+00> : vector<1xf32>
    %66 = vector.multi_reduction <add>, %65, %cst_19 [1, 2] : vector<1x6x256xf32> to vector<1xf32>
    %67 = vector.shape_cast %66 : vector<1xf32> to vector<1x1x1xf32>
    %68 = vector.extract %67[0, 0, 0] : f32 from vector<1x1x1xf32>
    %69 = arith.index_cast %arg0 : i32 to index
    %c3 = arith.constant 3 : index
    %70 = memref.load %arg6[%69, %c3] : memref<1x4xf32, #tpu.memory_space<smem>>
    memref.store %68, %arg6[%69, %c3] : memref<1x4xf32, #tpu.memory_space<smem>>
    return
  }
  func.func @transform_0(%arg0: i32) -> (i32, i32) {
    %c0_i32 = arith.constant 0 : i32
    %c0_i32_0 = arith.constant 0 : i32
    return %arg0, %c0_i32 : i32, i32
  }
  func.func @transform_1(%arg0: i32) -> (i32, i32) {
    %c0_i32 = arith.constant 0 : i32
    %c0_i32_0 = arith.constant 0 : i32
    return %arg0, %c0_i32 : i32, i32
  }
  func.func @transform_2(%arg0: i32) -> (i32, i32) {
    %c0_i32 = arith.constant 0 : i32
    %c0_i32_0 = arith.constant 0 : i32
    return %arg0, %c0_i32 : i32, i32
  }
  func.func @transform_3(%arg0: i32) -> (i32, i32) {
    %c0_i32 = arith.constant 0 : i32
    %c0_i32_0 = arith.constant 0 : i32
    return %arg0, %c0_i32 : i32, i32
  }
  func.func @transform_4(%arg0: i32) -> (i32, i32) {
    %c0_i32 = arith.constant 0 : i32
    %c0_i32_0 = arith.constant 0 : i32
    return %arg0, %c0_i32 : i32, i32
  }
  func.func @transform_5(%arg0: i32) -> (i32, i32) {
    %c0_i32 = arith.constant 0 : i32
    %c0_i32_0 = arith.constant 0 : i32
    %c0_i32_1 = arith.constant 0 : i32
    return %c0_i32, %c0_i32_0 : i32, i32
  }
}

module attributes {stable_mosaic.version = 11 : i64} {
  func.func @kernel(%arg0: i32, %arg1: memref<1x324x3xf32, #tpu.memory_space<vmem>>, %arg2: memref<9x3x8xbf16, #tpu.memory_space<vmem>>, %arg3: memref<1x8xf32, #tpu.memory_space<vmem>>, %arg4: memref<1x286x8xf32, #tpu.memory_space<vmem>>) attributes {dimension_semantics = [#tpu.dimension_semantics<parallel>], iteration_bounds = array<i64: 6>, scalar_prefetch = 0 : i64, scratch_operands = 0 : i64, tpu.core_type = #tpu.core_type<tc>, window_params = [{transform_indices = @transform_0, window_bounds = array<i64: 1, 324, 3>}, {pipeline_mode = #tpu.pipeline_mode<synchronous>, transform_indices = @transform_1, window_bounds = array<i64: 9, 3, 8>}, {pipeline_mode = #tpu.pipeline_mode<synchronous>, transform_indices = @transform_2, window_bounds = array<i64: 1, 8>}, {transform_indices = @transform_3, window_bounds = array<i64: 1, 286, 8>}]} {
    %cst = arith.constant 0.000000e+00 : f32
    %0 = vector.broadcast %cst : f32 to vector<286x8xf32>
    %c0 = arith.constant 0 : index
    %c0_0 = arith.constant 0 : index
    %c0_1 = arith.constant 0 : index
    %1 = vector.load %arg1[%c0, %c0_0, %c0_1] : memref<1x324x3xf32, #tpu.memory_space<vmem>>, vector<1x286x3xf32>
    %2 = vector.shape_cast %1 : vector<1x286x3xf32> to vector<286x3xf32>
    %3 = arith.truncf %2 : vector<286x3xf32> to vector<286x3xbf16>
    %c0_2 = arith.constant 0 : index
    %c0_3 = arith.constant 0 : index
    %c0_4 = arith.constant 0 : index
    %4 = vector.load %arg2[%c0_2, %c0_3, %c0_4] : memref<9x3x8xbf16, #tpu.memory_space<vmem>>, vector<1x3x8xbf16>
    %5 = vector.shape_cast %4 : vector<1x3x8xbf16> to vector<3x8xbf16>
    %cst_5 = arith.constant dense<0.000000e+00> : vector<286x8xf32>
    %6 = tpu.matmul %3, %5, %cst_5 {dimension_numbers = #tpu.dot_dimension_numbers<[1], [0], [0], [1], [0, 0, 1, 1], [], []>} : vector<286x3xbf16>, vector<3x8xbf16>, vector<286x8xf32> -> vector<286x8xf32>
    %7 = arith.addf %0, %6 : vector<286x8xf32>
    %c0_6 = arith.constant 0 : index
    %c1 = arith.constant 1 : index
    %c0_7 = arith.constant 0 : index
    %8 = vector.load %arg1[%c0_6, %c1, %c0_7] : memref<1x324x3xf32, #tpu.memory_space<vmem>>, vector<1x286x3xf32>
    %9 = vector.shape_cast %8 : vector<1x286x3xf32> to vector<286x3xf32>
    %10 = arith.truncf %9 : vector<286x3xf32> to vector<286x3xbf16>
    %c1_8 = arith.constant 1 : index
    %c0_9 = arith.constant 0 : index
    %c0_10 = arith.constant 0 : index
    %11 = vector.load %arg2[%c1_8, %c0_9, %c0_10] : memref<9x3x8xbf16, #tpu.memory_space<vmem>>, vector<1x3x8xbf16>
    %12 = vector.shape_cast %11 : vector<1x3x8xbf16> to vector<3x8xbf16>
    %cst_11 = arith.constant dense<0.000000e+00> : vector<286x8xf32>
    %13 = tpu.matmul %10, %12, %cst_11 {dimension_numbers = #tpu.dot_dimension_numbers<[1], [0], [0], [1], [0, 0, 1, 1], [], []>} : vector<286x3xbf16>, vector<3x8xbf16>, vector<286x8xf32> -> vector<286x8xf32>
    %14 = arith.addf %7, %13 : vector<286x8xf32>
    %c0_12 = arith.constant 0 : index
    %c2 = arith.constant 2 : index
    %c0_13 = arith.constant 0 : index
    %15 = vector.load %arg1[%c0_12, %c2, %c0_13] : memref<1x324x3xf32, #tpu.memory_space<vmem>>, vector<1x286x3xf32>
    %16 = vector.shape_cast %15 : vector<1x286x3xf32> to vector<286x3xf32>
    %17 = arith.truncf %16 : vector<286x3xf32> to vector<286x3xbf16>
    %c2_14 = arith.constant 2 : index
    %c0_15 = arith.constant 0 : index
    %c0_16 = arith.constant 0 : index
    %18 = vector.load %arg2[%c2_14, %c0_15, %c0_16] : memref<9x3x8xbf16, #tpu.memory_space<vmem>>, vector<1x3x8xbf16>
    %19 = vector.shape_cast %18 : vector<1x3x8xbf16> to vector<3x8xbf16>
    %cst_17 = arith.constant dense<0.000000e+00> : vector<286x8xf32>
    %20 = tpu.matmul %17, %19, %cst_17 {dimension_numbers = #tpu.dot_dimension_numbers<[1], [0], [0], [1], [0, 0, 1, 1], [], []>} : vector<286x3xbf16>, vector<3x8xbf16>, vector<286x8xf32> -> vector<286x8xf32>
    %21 = arith.addf %14, %20 : vector<286x8xf32>
    %c0_18 = arith.constant 0 : index
    %c18 = arith.constant 18 : index
    %c0_19 = arith.constant 0 : index
    %22 = vector.load %arg1[%c0_18, %c18, %c0_19] : memref<1x324x3xf32, #tpu.memory_space<vmem>>, vector<1x286x3xf32>
    %23 = vector.shape_cast %22 : vector<1x286x3xf32> to vector<286x3xf32>
    %24 = arith.truncf %23 : vector<286x3xf32> to vector<286x3xbf16>
    %c3 = arith.constant 3 : index
    %c0_20 = arith.constant 0 : index
    %c0_21 = arith.constant 0 : index
    %25 = vector.load %arg2[%c3, %c0_20, %c0_21] : memref<9x3x8xbf16, #tpu.memory_space<vmem>>, vector<1x3x8xbf16>
    %26 = vector.shape_cast %25 : vector<1x3x8xbf16> to vector<3x8xbf16>
    %cst_22 = arith.constant dense<0.000000e+00> : vector<286x8xf32>
    %27 = tpu.matmul %24, %26, %cst_22 {dimension_numbers = #tpu.dot_dimension_numbers<[1], [0], [0], [1], [0, 0, 1, 1], [], []>} : vector<286x3xbf16>, vector<3x8xbf16>, vector<286x8xf32> -> vector<286x8xf32>
    %28 = arith.addf %21, %27 : vector<286x8xf32>
    %c0_23 = arith.constant 0 : index
    %c19 = arith.constant 19 : index
    %c0_24 = arith.constant 0 : index
    %29 = vector.load %arg1[%c0_23, %c19, %c0_24] : memref<1x324x3xf32, #tpu.memory_space<vmem>>, vector<1x286x3xf32>
    %30 = vector.shape_cast %29 : vector<1x286x3xf32> to vector<286x3xf32>
    %31 = arith.truncf %30 : vector<286x3xf32> to vector<286x3xbf16>
    %c4 = arith.constant 4 : index
    %c0_25 = arith.constant 0 : index
    %c0_26 = arith.constant 0 : index
    %32 = vector.load %arg2[%c4, %c0_25, %c0_26] : memref<9x3x8xbf16, #tpu.memory_space<vmem>>, vector<1x3x8xbf16>
    %33 = vector.shape_cast %32 : vector<1x3x8xbf16> to vector<3x8xbf16>
    %cst_27 = arith.constant dense<0.000000e+00> : vector<286x8xf32>
    %34 = tpu.matmul %31, %33, %cst_27 {dimension_numbers = #tpu.dot_dimension_numbers<[1], [0], [0], [1], [0, 0, 1, 1], [], []>} : vector<286x3xbf16>, vector<3x8xbf16>, vector<286x8xf32> -> vector<286x8xf32>
    %35 = arith.addf %28, %34 : vector<286x8xf32>
    %c0_28 = arith.constant 0 : index
    %c20 = arith.constant 20 : index
    %c0_29 = arith.constant 0 : index
    %36 = vector.load %arg1[%c0_28, %c20, %c0_29] : memref<1x324x3xf32, #tpu.memory_space<vmem>>, vector<1x286x3xf32>
    %37 = vector.shape_cast %36 : vector<1x286x3xf32> to vector<286x3xf32>
    %38 = arith.truncf %37 : vector<286x3xf32> to vector<286x3xbf16>
    %c5 = arith.constant 5 : index
    %c0_30 = arith.constant 0 : index
    %c0_31 = arith.constant 0 : index
    %39 = vector.load %arg2[%c5, %c0_30, %c0_31] : memref<9x3x8xbf16, #tpu.memory_space<vmem>>, vector<1x3x8xbf16>
    %40 = vector.shape_cast %39 : vector<1x3x8xbf16> to vector<3x8xbf16>
    %cst_32 = arith.constant dense<0.000000e+00> : vector<286x8xf32>
    %41 = tpu.matmul %38, %40, %cst_32 {dimension_numbers = #tpu.dot_dimension_numbers<[1], [0], [0], [1], [0, 0, 1, 1], [], []>} : vector<286x3xbf16>, vector<3x8xbf16>, vector<286x8xf32> -> vector<286x8xf32>
    %42 = arith.addf %35, %41 : vector<286x8xf32>
    %c0_33 = arith.constant 0 : index
    %c36 = arith.constant 36 : index
    %c0_34 = arith.constant 0 : index
    %43 = vector.load %arg1[%c0_33, %c36, %c0_34] : memref<1x324x3xf32, #tpu.memory_space<vmem>>, vector<1x286x3xf32>
    %44 = vector.shape_cast %43 : vector<1x286x3xf32> to vector<286x3xf32>
    %45 = arith.truncf %44 : vector<286x3xf32> to vector<286x3xbf16>
    %c6 = arith.constant 6 : index
    %c0_35 = arith.constant 0 : index
    %c0_36 = arith.constant 0 : index
    %46 = vector.load %arg2[%c6, %c0_35, %c0_36] : memref<9x3x8xbf16, #tpu.memory_space<vmem>>, vector<1x3x8xbf16>
    %47 = vector.shape_cast %46 : vector<1x3x8xbf16> to vector<3x8xbf16>
    %cst_37 = arith.constant dense<0.000000e+00> : vector<286x8xf32>
    %48 = tpu.matmul %45, %47, %cst_37 {dimension_numbers = #tpu.dot_dimension_numbers<[1], [0], [0], [1], [0, 0, 1, 1], [], []>} : vector<286x3xbf16>, vector<3x8xbf16>, vector<286x8xf32> -> vector<286x8xf32>
    %49 = arith.addf %42, %48 : vector<286x8xf32>
    %c0_38 = arith.constant 0 : index
    %c37 = arith.constant 37 : index
    %c0_39 = arith.constant 0 : index
    %50 = vector.load %arg1[%c0_38, %c37, %c0_39] : memref<1x324x3xf32, #tpu.memory_space<vmem>>, vector<1x286x3xf32>
    %51 = vector.shape_cast %50 : vector<1x286x3xf32> to vector<286x3xf32>
    %52 = arith.truncf %51 : vector<286x3xf32> to vector<286x3xbf16>
    %c7 = arith.constant 7 : index
    %c0_40 = arith.constant 0 : index
    %c0_41 = arith.constant 0 : index
    %53 = vector.load %arg2[%c7, %c0_40, %c0_41] : memref<9x3x8xbf16, #tpu.memory_space<vmem>>, vector<1x3x8xbf16>
    %54 = vector.shape_cast %53 : vector<1x3x8xbf16> to vector<3x8xbf16>
    %cst_42 = arith.constant dense<0.000000e+00> : vector<286x8xf32>
    %55 = tpu.matmul %52, %54, %cst_42 {dimension_numbers = #tpu.dot_dimension_numbers<[1], [0], [0], [1], [0, 0, 1, 1], [], []>} : vector<286x3xbf16>, vector<3x8xbf16>, vector<286x8xf32> -> vector<286x8xf32>
    %56 = arith.addf %49, %55 : vector<286x8xf32>
    %c0_43 = arith.constant 0 : index
    %c38 = arith.constant 38 : index
    %c0_44 = arith.constant 0 : index
    %57 = vector.load %arg1[%c0_43, %c38, %c0_44] : memref<1x324x3xf32, #tpu.memory_space<vmem>>, vector<1x286x3xf32>
    %58 = vector.shape_cast %57 : vector<1x286x3xf32> to vector<286x3xf32>
    %59 = arith.truncf %58 : vector<286x3xf32> to vector<286x3xbf16>
    %c8 = arith.constant 8 : index
    %c0_45 = arith.constant 0 : index
    %c0_46 = arith.constant 0 : index
    %60 = vector.load %arg2[%c8, %c0_45, %c0_46] : memref<9x3x8xbf16, #tpu.memory_space<vmem>>, vector<1x3x8xbf16>
    %61 = vector.shape_cast %60 : vector<1x3x8xbf16> to vector<3x8xbf16>
    %cst_47 = arith.constant dense<0.000000e+00> : vector<286x8xf32>
    %62 = tpu.matmul %59, %61, %cst_47 {dimension_numbers = #tpu.dot_dimension_numbers<[1], [0], [0], [1], [0, 0, 1, 1], [], []>} : vector<286x3xbf16>, vector<3x8xbf16>, vector<286x8xf32> -> vector<286x8xf32>
    %63 = arith.addf %56, %62 : vector<286x8xf32>
    %c0_48 = arith.constant 0 : index
    %c0_49 = arith.constant 0 : index
    %64 = vector.load %arg3[%c0_48, %c0_49] : memref<1x8xf32, #tpu.memory_space<vmem>>, vector<1x8xf32>
    %65 = vector.broadcast %64 : vector<1x8xf32> to vector<286x8xf32>
    %66 = arith.addf %63, %65 : vector<286x8xf32>
    %cst_50 = arith.constant 0.000000e+00 : f32
    %67 = vector.broadcast %cst_50 : f32 to vector<286x8xf32>
    %68 = arith.maximumf %66, %67 : vector<286x8xf32>
    %c0_51 = arith.constant 0 : index
    %c0_52 = arith.constant 0 : index
    %c0_53 = arith.constant 0 : index
    %69 = vector.load %arg4[%c0_51, %c0_52, %c0_53] : memref<1x286x8xf32, #tpu.memory_space<vmem>>, vector<1x286x8xf32>
    %70 = vector.shape_cast %69 : vector<1x286x8xf32> to vector<286x8xf32>
    %71 = vector.shape_cast %68 : vector<286x8xf32> to vector<1x286x8xf32>
    tpu.vector_store %arg4[%c0_51, %c0_52, %c0_53], %71 {strides = array<i32>} : memref<1x286x8xf32, #tpu.memory_space<vmem>>, vector<1x286x8xf32>,
    return
  }
  func.func @transform_0(%arg0: i32) -> (i32, i32, i32) {
    %c0_i32 = arith.constant 0 : i32
    %c0_i32_0 = arith.constant 0 : i32
    %c0_i32_1 = arith.constant 0 : i32
    return %arg0, %c0_i32, %c0_i32_0 : i32, i32, i32
  }
  func.func @transform_1(%arg0: i32) -> (i32, i32, i32) {
    %c0_i32 = arith.constant 0 : i32
    %c0_i32_0 = arith.constant 0 : i32
    %c0_i32_1 = arith.constant 0 : i32
    %c0_i32_2 = arith.constant 0 : i32
    return %c0_i32, %c0_i32_0, %c0_i32_1 : i32, i32, i32
  }
  func.func @transform_2(%arg0: i32) -> (i32, i32) {
    %c0_i32 = arith.constant 0 : i32
    %c0_i32_0 = arith.constant 0 : i32
    %c0_i32_1 = arith.constant 0 : i32
    return %c0_i32, %c0_i32_0 : i32, i32
  }
  func.func @transform_3(%arg0: i32) -> (i32, i32, i32) {
    %c0_i32 = arith.constant 0 : i32
    %c0_i32_0 = arith.constant 0 : i32
    %c0_i32_1 = arith.constant 0 : i32
    return %arg0, %c0_i32, %c0_i32_0 : i32, i32, i32
  }
}

module attributes {stable_mosaic.version = 11 : i64} {
  func.func @kernel(%arg0: i32, %arg1: memref<1x100x8xf32, #tpu.memory_space<vmem>>, %arg2: memref<9x8x16xbf16, #tpu.memory_space<vmem>>, %arg3: memref<1x16xf32, #tpu.memory_space<vmem>>, %arg4: memref<1x78x16xf32, #tpu.memory_space<vmem>>) attributes {dimension_semantics = [#tpu.dimension_semantics<parallel>], iteration_bounds = array<i64: 6>, scalar_prefetch = 0 : i64, scratch_operands = 0 : i64, tpu.core_type = #tpu.core_type<tc>, window_params = [{transform_indices = @transform_0, window_bounds = array<i64: 1, 100, 8>}, {pipeline_mode = #tpu.pipeline_mode<synchronous>, transform_indices = @transform_1, window_bounds = array<i64: 9, 8, 16>}, {pipeline_mode = #tpu.pipeline_mode<synchronous>, transform_indices = @transform_2, window_bounds = array<i64: 1, 16>}, {transform_indices = @transform_3, window_bounds = array<i64: 1, 78, 16>}]} {
    %cst = arith.constant 0.000000e+00 : f32
    %0 = vector.broadcast %cst : f32 to vector<78x16xf32>
    %c0 = arith.constant 0 : index
    %c0_0 = arith.constant 0 : index
    %c0_1 = arith.constant 0 : index
    %1 = vector.load %arg1[%c0, %c0_0, %c0_1] : memref<1x100x8xf32, #tpu.memory_space<vmem>>, vector<1x78x8xf32>
    %2 = vector.shape_cast %1 : vector<1x78x8xf32> to vector<78x8xf32>
    %3 = arith.truncf %2 : vector<78x8xf32> to vector<78x8xbf16>
    %c0_2 = arith.constant 0 : index
    %c0_3 = arith.constant 0 : index
    %c0_4 = arith.constant 0 : index
    %4 = vector.load %arg2[%c0_2, %c0_3, %c0_4] : memref<9x8x16xbf16, #tpu.memory_space<vmem>>, vector<1x8x16xbf16>
    %5 = vector.shape_cast %4 : vector<1x8x16xbf16> to vector<8x16xbf16>
    %cst_5 = arith.constant dense<0.000000e+00> : vector<78x16xf32>
    %6 = tpu.matmul %3, %5, %cst_5 {dimension_numbers = #tpu.dot_dimension_numbers<[1], [0], [0], [1], [0, 0, 1, 1], [], []>} : vector<78x8xbf16>, vector<8x16xbf16>, vector<78x16xf32> -> vector<78x16xf32>
    %7 = arith.addf %0, %6 : vector<78x16xf32>
    %c0_6 = arith.constant 0 : index
    %c1 = arith.constant 1 : index
    %c0_7 = arith.constant 0 : index
    %8 = vector.load %arg1[%c0_6, %c1, %c0_7] : memref<1x100x8xf32, #tpu.memory_space<vmem>>, vector<1x78x8xf32>
    %9 = vector.shape_cast %8 : vector<1x78x8xf32> to vector<78x8xf32>
    %10 = arith.truncf %9 : vector<78x8xf32> to vector<78x8xbf16>
    %c1_8 = arith.constant 1 : index
    %c0_9 = arith.constant 0 : index
    %c0_10 = arith.constant 0 : index
    %11 = vector.load %arg2[%c1_8, %c0_9, %c0_10] : memref<9x8x16xbf16, #tpu.memory_space<vmem>>, vector<1x8x16xbf16>
    %12 = vector.shape_cast %11 : vector<1x8x16xbf16> to vector<8x16xbf16>
    %cst_11 = arith.constant dense<0.000000e+00> : vector<78x16xf32>
    %13 = tpu.matmul %10, %12, %cst_11 {dimension_numbers = #tpu.dot_dimension_numbers<[1], [0], [0], [1], [0, 0, 1, 1], [], []>} : vector<78x8xbf16>, vector<8x16xbf16>, vector<78x16xf32> -> vector<78x16xf32>
    %14 = arith.addf %7, %13 : vector<78x16xf32>
    %c0_12 = arith.constant 0 : index
    %c2 = arith.constant 2 : index
    %c0_13 = arith.constant 0 : index
    %15 = vector.load %arg1[%c0_12, %c2, %c0_13] : memref<1x100x8xf32, #tpu.memory_space<vmem>>, vector<1x78x8xf32>
    %16 = vector.shape_cast %15 : vector<1x78x8xf32> to vector<78x8xf32>
    %17 = arith.truncf %16 : vector<78x8xf32> to vector<78x8xbf16>
    %c2_14 = arith.constant 2 : index
    %c0_15 = arith.constant 0 : index
    %c0_16 = arith.constant 0 : index
    %18 = vector.load %arg2[%c2_14, %c0_15, %c0_16] : memref<9x8x16xbf16, #tpu.memory_space<vmem>>, vector<1x8x16xbf16>
    %19 = vector.shape_cast %18 : vector<1x8x16xbf16> to vector<8x16xbf16>
    %cst_17 = arith.constant dense<0.000000e+00> : vector<78x16xf32>
    %20 = tpu.matmul %17, %19, %cst_17 {dimension_numbers = #tpu.dot_dimension_numbers<[1], [0], [0], [1], [0, 0, 1, 1], [], []>} : vector<78x8xbf16>, vector<8x16xbf16>, vector<78x16xf32> -> vector<78x16xf32>
    %21 = arith.addf %14, %20 : vector<78x16xf32>
    %c0_18 = arith.constant 0 : index
    %c10 = arith.constant 10 : index
    %c0_19 = arith.constant 0 : index
    %22 = vector.load %arg1[%c0_18, %c10, %c0_19] : memref<1x100x8xf32, #tpu.memory_space<vmem>>, vector<1x78x8xf32>
    %23 = vector.shape_cast %22 : vector<1x78x8xf32> to vector<78x8xf32>
    %24 = arith.truncf %23 : vector<78x8xf32> to vector<78x8xbf16>
    %c3 = arith.constant 3 : index
    %c0_20 = arith.constant 0 : index
    %c0_21 = arith.constant 0 : index
    %25 = vector.load %arg2[%c3, %c0_20, %c0_21] : memref<9x8x16xbf16, #tpu.memory_space<vmem>>, vector<1x8x16xbf16>
    %26 = vector.shape_cast %25 : vector<1x8x16xbf16> to vector<8x16xbf16>
    %cst_22 = arith.constant dense<0.000000e+00> : vector<78x16xf32>
    %27 = tpu.matmul %24, %26, %cst_22 {dimension_numbers = #tpu.dot_dimension_numbers<[1], [0], [0], [1], [0, 0, 1, 1], [], []>} : vector<78x8xbf16>, vector<8x16xbf16>, vector<78x16xf32> -> vector<78x16xf32>
    %28 = arith.addf %21, %27 : vector<78x16xf32>
    %c0_23 = arith.constant 0 : index
    %c11 = arith.constant 11 : index
    %c0_24 = arith.constant 0 : index
    %29 = vector.load %arg1[%c0_23, %c11, %c0_24] : memref<1x100x8xf32, #tpu.memory_space<vmem>>, vector<1x78x8xf32>
    %30 = vector.shape_cast %29 : vector<1x78x8xf32> to vector<78x8xf32>
    %31 = arith.truncf %30 : vector<78x8xf32> to vector<78x8xbf16>
    %c4 = arith.constant 4 : index
    %c0_25 = arith.constant 0 : index
    %c0_26 = arith.constant 0 : index
    %32 = vector.load %arg2[%c4, %c0_25, %c0_26] : memref<9x8x16xbf16, #tpu.memory_space<vmem>>, vector<1x8x16xbf16>
    %33 = vector.shape_cast %32 : vector<1x8x16xbf16> to vector<8x16xbf16>
    %cst_27 = arith.constant dense<0.000000e+00> : vector<78x16xf32>
    %34 = tpu.matmul %31, %33, %cst_27 {dimension_numbers = #tpu.dot_dimension_numbers<[1], [0], [0], [1], [0, 0, 1, 1], [], []>} : vector<78x8xbf16>, vector<8x16xbf16>, vector<78x16xf32> -> vector<78x16xf32>
    %35 = arith.addf %28, %34 : vector<78x16xf32>
    %c0_28 = arith.constant 0 : index
    %c12 = arith.constant 12 : index
    %c0_29 = arith.constant 0 : index
    %36 = vector.load %arg1[%c0_28, %c12, %c0_29] : memref<1x100x8xf32, #tpu.memory_space<vmem>>, vector<1x78x8xf32>
    %37 = vector.shape_cast %36 : vector<1x78x8xf32> to vector<78x8xf32>
    %38 = arith.truncf %37 : vector<78x8xf32> to vector<78x8xbf16>
    %c5 = arith.constant 5 : index
    %c0_30 = arith.constant 0 : index
    %c0_31 = arith.constant 0 : index
    %39 = vector.load %arg2[%c5, %c0_30, %c0_31] : memref<9x8x16xbf16, #tpu.memory_space<vmem>>, vector<1x8x16xbf16>
    %40 = vector.shape_cast %39 : vector<1x8x16xbf16> to vector<8x16xbf16>
    %cst_32 = arith.constant dense<0.000000e+00> : vector<78x16xf32>
    %41 = tpu.matmul %38, %40, %cst_32 {dimension_numbers = #tpu.dot_dimension_numbers<[1], [0], [0], [1], [0, 0, 1, 1], [], []>} : vector<78x8xbf16>, vector<8x16xbf16>, vector<78x16xf32> -> vector<78x16xf32>
    %42 = arith.addf %35, %41 : vector<78x16xf32>
    %c0_33 = arith.constant 0 : index
    %c20 = arith.constant 20 : index
    %c0_34 = arith.constant 0 : index
    %43 = vector.load %arg1[%c0_33, %c20, %c0_34] : memref<1x100x8xf32, #tpu.memory_space<vmem>>, vector<1x78x8xf32>
    %44 = vector.shape_cast %43 : vector<1x78x8xf32> to vector<78x8xf32>
    %45 = arith.truncf %44 : vector<78x8xf32> to vector<78x8xbf16>
    %c6 = arith.constant 6 : index
    %c0_35 = arith.constant 0 : index
    %c0_36 = arith.constant 0 : index
    %46 = vector.load %arg2[%c6, %c0_35, %c0_36] : memref<9x8x16xbf16, #tpu.memory_space<vmem>>, vector<1x8x16xbf16>
    %47 = vector.shape_cast %46 : vector<1x8x16xbf16> to vector<8x16xbf16>
    %cst_37 = arith.constant dense<0.000000e+00> : vector<78x16xf32>
    %48 = tpu.matmul %45, %47, %cst_37 {dimension_numbers = #tpu.dot_dimension_numbers<[1], [0], [0], [1], [0, 0, 1, 1], [], []>} : vector<78x8xbf16>, vector<8x16xbf16>, vector<78x16xf32> -> vector<78x16xf32>
    %49 = arith.addf %42, %48 : vector<78x16xf32>
    %c0_38 = arith.constant 0 : index
    %c21 = arith.constant 21 : index
    %c0_39 = arith.constant 0 : index
    %50 = vector.load %arg1[%c0_38, %c21, %c0_39] : memref<1x100x8xf32, #tpu.memory_space<vmem>>, vector<1x78x8xf32>
    %51 = vector.shape_cast %50 : vector<1x78x8xf32> to vector<78x8xf32>
    %52 = arith.truncf %51 : vector<78x8xf32> to vector<78x8xbf16>
    %c7 = arith.constant 7 : index
    %c0_40 = arith.constant 0 : index
    %c0_41 = arith.constant 0 : index
    %53 = vector.load %arg2[%c7, %c0_40, %c0_41] : memref<9x8x16xbf16, #tpu.memory_space<vmem>>, vector<1x8x16xbf16>
    %54 = vector.shape_cast %53 : vector<1x8x16xbf16> to vector<8x16xbf16>
    %cst_42 = arith.constant dense<0.000000e+00> : vector<78x16xf32>
    %55 = tpu.matmul %52, %54, %cst_42 {dimension_numbers = #tpu.dot_dimension_numbers<[1], [0], [0], [1], [0, 0, 1, 1], [], []>} : vector<78x8xbf16>, vector<8x16xbf16>, vector<78x16xf32> -> vector<78x16xf32>
    %56 = arith.addf %49, %55 : vector<78x16xf32>
    %c0_43 = arith.constant 0 : index
    %c22 = arith.constant 22 : index
    %c0_44 = arith.constant 0 : index
    %57 = vector.load %arg1[%c0_43, %c22, %c0_44] : memref<1x100x8xf32, #tpu.memory_space<vmem>>, vector<1x78x8xf32>
    %58 = vector.shape_cast %57 : vector<1x78x8xf32> to vector<78x8xf32>
    %59 = arith.truncf %58 : vector<78x8xf32> to vector<78x8xbf16>
    %c8 = arith.constant 8 : index
    %c0_45 = arith.constant 0 : index
    %c0_46 = arith.constant 0 : index
    %60 = vector.load %arg2[%c8, %c0_45, %c0_46] : memref<9x8x16xbf16, #tpu.memory_space<vmem>>, vector<1x8x16xbf16>
    %61 = vector.shape_cast %60 : vector<1x8x16xbf16> to vector<8x16xbf16>
    %cst_47 = arith.constant dense<0.000000e+00> : vector<78x16xf32>
    %62 = tpu.matmul %59, %61, %cst_47 {dimension_numbers = #tpu.dot_dimension_numbers<[1], [0], [0], [1], [0, 0, 1, 1], [], []>} : vector<78x8xbf16>, vector<8x16xbf16>, vector<78x16xf32> -> vector<78x16xf32>
    %63 = arith.addf %56, %62 : vector<78x16xf32>
    %c0_48 = arith.constant 0 : index
    %c0_49 = arith.constant 0 : index
    %64 = vector.load %arg3[%c0_48, %c0_49] : memref<1x16xf32, #tpu.memory_space<vmem>>, vector<1x16xf32>
    %65 = vector.broadcast %64 : vector<1x16xf32> to vector<78x16xf32>
    %66 = arith.addf %63, %65 : vector<78x16xf32>
    %cst_50 = arith.constant 0.000000e+00 : f32
    %67 = vector.broadcast %cst_50 : f32 to vector<78x16xf32>
    %68 = arith.maximumf %66, %67 : vector<78x16xf32>
    %c0_51 = arith.constant 0 : index
    %c0_52 = arith.constant 0 : index
    %c0_53 = arith.constant 0 : index
    %69 = vector.load %arg4[%c0_51, %c0_52, %c0_53] : memref<1x78x16xf32, #tpu.memory_space<vmem>>, vector<1x78x16xf32>
    %70 = vector.shape_cast %69 : vector<1x78x16xf32> to vector<78x16xf32>
    %71 = vector.shape_cast %68 : vector<78x16xf32> to vector<1x78x16xf32>
    tpu.vector_store %arg4[%c0_51, %c0_52, %c0_53], %71 {strides = array<i32>} : memref<1x78x16xf32, #tpu.memory_space<vmem>>, vector<1x78x16xf32>,
    return
  }
  func.func @transform_0(%arg0: i32) -> (i32, i32, i32) {
    %c0_i32 = arith.constant 0 : i32
    %c0_i32_0 = arith.constant 0 : i32
    %c0_i32_1 = arith.constant 0 : i32
    return %arg0, %c0_i32, %c0_i32_0 : i32, i32, i32
  }
  func.func @transform_1(%arg0: i32) -> (i32, i32, i32) {
    %c0_i32 = arith.constant 0 : i32
    %c0_i32_0 = arith.constant 0 : i32
    %c0_i32_1 = arith.constant 0 : i32
    %c0_i32_2 = arith.constant 0 : i32
    return %c0_i32, %c0_i32_0, %c0_i32_1 : i32, i32, i32
  }
  func.func @transform_2(%arg0: i32) -> (i32, i32) {
    %c0_i32 = arith.constant 0 : i32
    %c0_i32_0 = arith.constant 0 : i32
    %c0_i32_1 = arith.constant 0 : i32
    return %c0_i32, %c0_i32_0 : i32, i32
  }
  func.func @transform_3(%arg0: i32) -> (i32, i32, i32) {
    %c0_i32 = arith.constant 0 : i32
    %c0_i32_0 = arith.constant 0 : i32
    %c0_i32_1 = arith.constant 0 : i32
    return %arg0, %c0_i32, %c0_i32_0 : i32, i32, i32
  }
}

module attributes {stable_mosaic.version = 11 : i64} {
  func.func @kernel(%arg0: i32, %arg1: memref<3x16x16xf32, #tpu.memory_space<vmem>>, %arg2: memref<2x2xf32, #tpu.memory_space<smem>>) attributes {dimension_semantics = [#tpu.dimension_semantics<arbitrary>], iteration_bounds = array<i64: 2>, scalar_prefetch = 0 : i64, scratch_operands = 0 : i64, tpu.core_type = #tpu.core_type<tc>, window_params = [{transform_indices = @transform_0, window_bounds = array<i64: 3, 16, 16>}, {transform_indices = @transform_1, window_bounds = array<i64: 2, 2>}]} {
    %c0 = arith.constant 0 : index
    %c0_0 = arith.constant 0 : index
    %c0_1 = arith.constant 0 : index
    %0 = vector.load %arg1[%c0, %c0_0, %c0_1] : memref<3x16x16xf32, #tpu.memory_space<vmem>>, vector<1x16x16xf32>
    %1 = vector.shape_cast %0 : vector<1x16x16xf32> to vector<16x16xf32>
    %c1 = arith.constant 1 : index
    %c0_2 = arith.constant 0 : index
    %c0_3 = arith.constant 0 : index
    %2 = vector.load %arg1[%c1, %c0_2, %c0_3] : memref<3x16x16xf32, #tpu.memory_space<vmem>>, vector<1x16x16xf32>
    %3 = vector.shape_cast %2 : vector<1x16x16xf32> to vector<16x16xf32>
    %c2 = arith.constant 2 : index
    %c0_4 = arith.constant 0 : index
    %c0_5 = arith.constant 0 : index
    %4 = vector.load %arg1[%c2, %c0_4, %c0_5] : memref<3x16x16xf32, #tpu.memory_space<vmem>>, vector<1x16x16xf32>
    %5 = vector.shape_cast %4 : vector<1x16x16xf32> to vector<16x16xf32>
    %6 = arith.subf %3, %5 : vector<16x16xf32>
    %7 = math.absf %6 : vector<16x16xf32>
    %8 = vector.shape_cast %7 : vector<16x16xf32> to vector<1x16x16xf32>
    %cst = arith.constant dense<0.000000e+00> : vector<1xf32>
    %9 = vector.multi_reduction <add>, %8, %cst [1, 2] : vector<1x16x16xf32> to vector<1xf32>
    %10 = vector.shape_cast %9 : vector<1xf32> to vector<1x1x1xf32>
    %11 = vector.extract %10[0, 0, 0] : f32 from vector<1x1x1xf32>
    %12 = arith.subf %1, %5 : vector<16x16xf32>
    %13 = math.absf %12 : vector<16x16xf32>
    %14 = vector.shape_cast %13 : vector<16x16xf32> to vector<1x16x16xf32>
    %cst_6 = arith.constant dense<0.000000e+00> : vector<1xf32>
    %15 = vector.multi_reduction <add>, %14, %cst_6 [1, 2] : vector<1x16x16xf32> to vector<1xf32>
    %16 = vector.shape_cast %15 : vector<1xf32> to vector<1x1x1xf32>
    %17 = vector.extract %16[0, 0, 0] : f32 from vector<1x1x1xf32>
    %18 = arith.addf %11, %17 : f32
    %cst_7 = arith.constant dense<0.000000e+00> : vector<16x16xf32>
    %19 = tpu.matmul %1, %1, %cst_7 {dimension_numbers = #tpu.dot_dimension_numbers<[1], [1], [0], [0], [0, 0, 1, 0], [], []>} : vector<16x16xf32>, vector<16x16xf32>, vector<16x16xf32> -> vector<16x16xf32>
    %cst_8 = arith.constant dense<0.000000e+00> : vector<16x16xf32>
    %20 = tpu.matmul %3, %3, %cst_8 {dimension_numbers = #tpu.dot_dimension_numbers<[1], [1], [0], [0], [0, 0, 1, 0], [], []>} : vector<16x16xf32>, vector<16x16xf32>, vector<16x16xf32> -> vector<16x16xf32>
    %cst_9 = arith.constant dense<0.000000e+00> : vector<16x16xf32>
    %21 = tpu.matmul %5, %5, %cst_9 {dimension_numbers = #tpu.dot_dimension_numbers<[1], [1], [0], [0], [0, 0, 1, 0], [], []>} : vector<16x16xf32>, vector<16x16xf32>, vector<16x16xf32> -> vector<16x16xf32>
    %22 = arith.subf %20, %21 : vector<16x16xf32>
    %23 = math.absf %22 : vector<16x16xf32>
    %24 = vector.shape_cast %23 : vector<16x16xf32> to vector<1x16x16xf32>
    %cst_10 = arith.constant dense<0.000000e+00> : vector<1xf32>
    %25 = vector.multi_reduction <add>, %24, %cst_10 [1, 2] : vector<1x16x16xf32> to vector<1xf32>
    %26 = vector.shape_cast %25 : vector<1xf32> to vector<1x1x1xf32>
    %27 = vector.extract %26[0, 0, 0] : f32 from vector<1x1x1xf32>
    %28 = arith.subf %19, %21 : vector<16x16xf32>
    %29 = math.absf %28 : vector<16x16xf32>
    %30 = vector.shape_cast %29 : vector<16x16xf32> to vector<1x16x16xf32>
    %cst_11 = arith.constant dense<0.000000e+00> : vector<1xf32>
    %31 = vector.multi_reduction <add>, %30, %cst_11 [1, 2] : vector<1x16x16xf32> to vector<1xf32>
    %32 = vector.shape_cast %31 : vector<1xf32> to vector<1x1x1xf32>
    %33 = vector.extract %32[0, 0, 0] : f32 from vector<1x1x1xf32>
    %34 = arith.addf %27, %33 : f32
    %cst_12 = arith.constant 3.906250e-03 : f32
    %35 = arith.mulf %34, %cst_12 : f32
    %36 = arith.index_cast %arg0 : i32 to index
    %c0_13 = arith.constant 0 : index
    %37 = memref.load %arg2[%36, %c0_13] : memref<2x2xf32, #tpu.memory_space<smem>>
    memref.store %18, %arg2[%36, %c0_13] : memref<2x2xf32, #tpu.memory_space<smem>>
    %38 = arith.index_cast %arg0 : i32 to index
    %c1_14 = arith.constant 1 : index
    %39 = memref.load %arg2[%38, %c1_14] : memref<2x2xf32, #tpu.memory_space<smem>>
    memref.store %35, %arg2[%38, %c1_14] : memref<2x2xf32, #tpu.memory_space<smem>>
    return
  }
  func.func @transform_0(%arg0: i32) -> (i32, i32, i32) {
    %c0_i32 = arith.constant 0 : i32
    %c0_i32_0 = arith.constant 0 : i32
    %c0_i32_1 = arith.constant 0 : i32
    return %arg0, %c0_i32, %c0_i32_0 : i32, i32, i32
  }
  func.func @transform_1(%arg0: i32) -> (i32, i32) {
    %c0_i32 = arith.constant 0 : i32
    %c0_i32_0 = arith.constant 0 : i32
    %c0_i32_1 = arith.constant 0 : i32
    return %c0_i32, %c0_i32_0 : i32, i32
  }
}

module attributes {stable_mosaic.version = 11 : i64} {
  func.func @kernel(%arg0: i32, %arg1: memref<3x8x64xf32, #tpu.memory_space<vmem>>, %arg2: memref<2x2xf32, #tpu.memory_space<smem>>) attributes {dimension_semantics = [#tpu.dimension_semantics<arbitrary>], iteration_bounds = array<i64: 2>, scalar_prefetch = 0 : i64, scratch_operands = 0 : i64, tpu.core_type = #tpu.core_type<tc>, window_params = [{transform_indices = @transform_0, window_bounds = array<i64: 3, 8, 64>}, {transform_indices = @transform_1, window_bounds = array<i64: 2, 2>}]} {
    %c0 = arith.constant 0 : index
    %c0_0 = arith.constant 0 : index
    %c0_1 = arith.constant 0 : index
    %0 = vector.load %arg1[%c0, %c0_0, %c0_1] : memref<3x8x64xf32, #tpu.memory_space<vmem>>, vector<1x8x64xf32>
    %1 = vector.shape_cast %0 : vector<1x8x64xf32> to vector<8x64xf32>
    %c1 = arith.constant 1 : index
    %c0_2 = arith.constant 0 : index
    %c0_3 = arith.constant 0 : index
    %2 = vector.load %arg1[%c1, %c0_2, %c0_3] : memref<3x8x64xf32, #tpu.memory_space<vmem>>, vector<1x8x64xf32>
    %3 = vector.shape_cast %2 : vector<1x8x64xf32> to vector<8x64xf32>
    %c2 = arith.constant 2 : index
    %c0_4 = arith.constant 0 : index
    %c0_5 = arith.constant 0 : index
    %4 = vector.load %arg1[%c2, %c0_4, %c0_5] : memref<3x8x64xf32, #tpu.memory_space<vmem>>, vector<1x8x64xf32>
    %5 = vector.shape_cast %4 : vector<1x8x64xf32> to vector<8x64xf32>
    %6 = arith.subf %3, %5 : vector<8x64xf32>
    %7 = math.absf %6 : vector<8x64xf32>
    %8 = vector.shape_cast %7 : vector<8x64xf32> to vector<1x8x64xf32>
    %cst = arith.constant dense<0.000000e+00> : vector<1xf32>
    %9 = vector.multi_reduction <add>, %8, %cst [1, 2] : vector<1x8x64xf32> to vector<1xf32>
    %10 = vector.shape_cast %9 : vector<1xf32> to vector<1x1x1xf32>
    %11 = vector.extract %10[0, 0, 0] : f32 from vector<1x1x1xf32>
    %12 = arith.subf %1, %5 : vector<8x64xf32>
    %13 = math.absf %12 : vector<8x64xf32>
    %14 = vector.shape_cast %13 : vector<8x64xf32> to vector<1x8x64xf32>
    %cst_6 = arith.constant dense<0.000000e+00> : vector<1xf32>
    %15 = vector.multi_reduction <add>, %14, %cst_6 [1, 2] : vector<1x8x64xf32> to vector<1xf32>
    %16 = vector.shape_cast %15 : vector<1xf32> to vector<1x1x1xf32>
    %17 = vector.extract %16[0, 0, 0] : f32 from vector<1x1x1xf32>
    %18 = arith.addf %11, %17 : f32
    %cst_7 = arith.constant dense<0.000000e+00> : vector<8x8xf32>
    %19 = tpu.matmul %1, %1, %cst_7 {dimension_numbers = #tpu.dot_dimension_numbers<[1], [1], [0], [0], [0, 0, 1, 0], [], []>} : vector<8x64xf32>, vector<8x64xf32>, vector<8x8xf32> -> vector<8x8xf32>
    %cst_8 = arith.constant dense<0.000000e+00> : vector<8x8xf32>
    %20 = tpu.matmul %3, %3, %cst_8 {dimension_numbers = #tpu.dot_dimension_numbers<[1], [1], [0], [0], [0, 0, 1, 0], [], []>} : vector<8x64xf32>, vector<8x64xf32>, vector<8x8xf32> -> vector<8x8xf32>
    %cst_9 = arith.constant dense<0.000000e+00> : vector<8x8xf32>
    %21 = tpu.matmul %5, %5, %cst_9 {dimension_numbers = #tpu.dot_dimension_numbers<[1], [1], [0], [0], [0, 0, 1, 0], [], []>} : vector<8x64xf32>, vector<8x64xf32>, vector<8x8xf32> -> vector<8x8xf32>
    %22 = arith.subf %20, %21 : vector<8x8xf32>
    %23 = math.absf %22 : vector<8x8xf32>
    %24 = vector.shape_cast %23 : vector<8x8xf32> to vector<1x8x8xf32>
    %cst_10 = arith.constant dense<0.000000e+00> : vector<1xf32>
    %25 = vector.multi_reduction <add>, %24, %cst_10 [1, 2] : vector<1x8x8xf32> to vector<1xf32>
    %26 = vector.shape_cast %25 : vector<1xf32> to vector<1x1x1xf32>
    %27 = vector.extract %26[0, 0, 0] : f32 from vector<1x1x1xf32>
    %28 = arith.subf %19, %21 : vector<8x8xf32>
    %29 = math.absf %28 : vector<8x8xf32>
    %30 = vector.shape_cast %29 : vector<8x8xf32> to vector<1x8x8xf32>
    %cst_11 = arith.constant dense<0.000000e+00> : vector<1xf32>
    %31 = vector.multi_reduction <add>, %30, %cst_11 [1, 2] : vector<1x8x8xf32> to vector<1xf32>
    %32 = vector.shape_cast %31 : vector<1xf32> to vector<1x1x1xf32>
    %33 = vector.extract %32[0, 0, 0] : f32 from vector<1x1x1xf32>
    %34 = arith.addf %27, %33 : f32
    %cst_12 = arith.constant 0.001953125 : f32
    %35 = arith.mulf %34, %cst_12 : f32
    %36 = arith.index_cast %arg0 : i32 to index
    %c0_13 = arith.constant 0 : index
    %37 = memref.load %arg2[%36, %c0_13] : memref<2x2xf32, #tpu.memory_space<smem>>
    memref.store %18, %arg2[%36, %c0_13] : memref<2x2xf32, #tpu.memory_space<smem>>
    %38 = arith.index_cast %arg0 : i32 to index
    %c1_14 = arith.constant 1 : index
    %39 = memref.load %arg2[%38, %c1_14] : memref<2x2xf32, #tpu.memory_space<smem>>
    memref.store %35, %arg2[%38, %c1_14] : memref<2x2xf32, #tpu.memory_space<smem>>
    return
  }
  func.func @transform_0(%arg0: i32) -> (i32, i32, i32) {
    %c0_i32 = arith.constant 0 : i32
    %c0_i32_0 = arith.constant 0 : i32
    %c0_i32_1 = arith.constant 0 : i32
    return %arg0, %c0_i32, %c0_i32_0 : i32, i32, i32
  }
  func.func @transform_1(%arg0: i32) -> (i32, i32) {
    %c0_i32 = arith.constant 0 : i32
    %c0_i32_0 = arith.constant 0 : i32
    %c0_i32_1 = arith.constant 0 : i32
    return %c0_i32, %c0_i32_0 : i32, i32
  }
}

module attributes {stable_mosaic.version = 11 : i64} {
  func.func @kernel(%arg0: i32, %arg1: memref<1x36x16xf32, #tpu.memory_space<vmem>>, %arg2: memref<9x16x32xbf16, #tpu.memory_space<vmem>>, %arg3: memref<1x32xf32, #tpu.memory_space<vmem>>, %arg4: memref<1x22x32xf32, #tpu.memory_space<vmem>>) attributes {dimension_semantics = [#tpu.dimension_semantics<parallel>], iteration_bounds = array<i64: 6>, scalar_prefetch = 0 : i64, scratch_operands = 0 : i64, tpu.core_type = #tpu.core_type<tc>, window_params = [{transform_indices = @transform_0, window_bounds = array<i64: 1, 36, 16>}, {pipeline_mode = #tpu.pipeline_mode<synchronous>, transform_indices = @transform_1, window_bounds = array<i64: 9, 16, 32>}, {pipeline_mode = #tpu.pipeline_mode<synchronous>, transform_indices = @transform_2, window_bounds = array<i64: 1, 32>}, {transform_indices = @transform_3, window_bounds = array<i64: 1, 22, 32>}]} {
    %cst = arith.constant 0.000000e+00 : f32
    %0 = vector.broadcast %cst : f32 to vector<22x32xf32>
    %c0 = arith.constant 0 : index
    %c0_0 = arith.constant 0 : index
    %c0_1 = arith.constant 0 : index
    %1 = vector.load %arg1[%c0, %c0_0, %c0_1] : memref<1x36x16xf32, #tpu.memory_space<vmem>>, vector<1x22x16xf32>
    %2 = vector.shape_cast %1 : vector<1x22x16xf32> to vector<22x16xf32>
    %3 = arith.truncf %2 : vector<22x16xf32> to vector<22x16xbf16>
    %c0_2 = arith.constant 0 : index
    %c0_3 = arith.constant 0 : index
    %c0_4 = arith.constant 0 : index
    %4 = vector.load %arg2[%c0_2, %c0_3, %c0_4] : memref<9x16x32xbf16, #tpu.memory_space<vmem>>, vector<1x16x32xbf16>
    %5 = vector.shape_cast %4 : vector<1x16x32xbf16> to vector<16x32xbf16>
    %cst_5 = arith.constant dense<0.000000e+00> : vector<22x32xf32>
    %6 = tpu.matmul %3, %5, %cst_5 {dimension_numbers = #tpu.dot_dimension_numbers<[1], [0], [0], [1], [0, 0, 1, 1], [], []>} : vector<22x16xbf16>, vector<16x32xbf16>, vector<22x32xf32> -> vector<22x32xf32>
    %7 = arith.addf %0, %6 : vector<22x32xf32>
    %c0_6 = arith.constant 0 : index
    %c1 = arith.constant 1 : index
    %c0_7 = arith.constant 0 : index
    %8 = vector.load %arg1[%c0_6, %c1, %c0_7] : memref<1x36x16xf32, #tpu.memory_space<vmem>>, vector<1x22x16xf32>
    %9 = vector.shape_cast %8 : vector<1x22x16xf32> to vector<22x16xf32>
    %10 = arith.truncf %9 : vector<22x16xf32> to vector<22x16xbf16>
    %c1_8 = arith.constant 1 : index
    %c0_9 = arith.constant 0 : index
    %c0_10 = arith.constant 0 : index
    %11 = vector.load %arg2[%c1_8, %c0_9, %c0_10] : memref<9x16x32xbf16, #tpu.memory_space<vmem>>, vector<1x16x32xbf16>
    %12 = vector.shape_cast %11 : vector<1x16x32xbf16> to vector<16x32xbf16>
    %cst_11 = arith.constant dense<0.000000e+00> : vector<22x32xf32>
    %13 = tpu.matmul %10, %12, %cst_11 {dimension_numbers = #tpu.dot_dimension_numbers<[1], [0], [0], [1], [0, 0, 1, 1], [], []>} : vector<22x16xbf16>, vector<16x32xbf16>, vector<22x32xf32> -> vector<22x32xf32>
    %14 = arith.addf %7, %13 : vector<22x32xf32>
    %c0_12 = arith.constant 0 : index
    %c2 = arith.constant 2 : index
    %c0_13 = arith.constant 0 : index
    %15 = vector.load %arg1[%c0_12, %c2, %c0_13] : memref<1x36x16xf32, #tpu.memory_space<vmem>>, vector<1x22x16xf32>
    %16 = vector.shape_cast %15 : vector<1x22x16xf32> to vector<22x16xf32>
    %17 = arith.truncf %16 : vector<22x16xf32> to vector<22x16xbf16>
    %c2_14 = arith.constant 2 : index
    %c0_15 = arith.constant 0 : index
    %c0_16 = arith.constant 0 : index
    %18 = vector.load %arg2[%c2_14, %c0_15, %c0_16] : memref<9x16x32xbf16, #tpu.memory_space<vmem>>, vector<1x16x32xbf16>
    %19 = vector.shape_cast %18 : vector<1x16x32xbf16> to vector<16x32xbf16>
    %cst_17 = arith.constant dense<0.000000e+00> : vector<22x32xf32>
    %20 = tpu.matmul %17, %19, %cst_17 {dimension_numbers = #tpu.dot_dimension_numbers<[1], [0], [0], [1], [0, 0, 1, 1], [], []>} : vector<22x16xbf16>, vector<16x32xbf16>, vector<22x32xf32> -> vector<22x32xf32>
    %21 = arith.addf %14, %20 : vector<22x32xf32>
    %c0_18 = arith.constant 0 : index
    %c6 = arith.constant 6 : index
    %c0_19 = arith.constant 0 : index
    %22 = vector.load %arg1[%c0_18, %c6, %c0_19] : memref<1x36x16xf32, #tpu.memory_space<vmem>>, vector<1x22x16xf32>
    %23 = vector.shape_cast %22 : vector<1x22x16xf32> to vector<22x16xf32>
    %24 = arith.truncf %23 : vector<22x16xf32> to vector<22x16xbf16>
    %c3 = arith.constant 3 : index
    %c0_20 = arith.constant 0 : index
    %c0_21 = arith.constant 0 : index
    %25 = vector.load %arg2[%c3, %c0_20, %c0_21] : memref<9x16x32xbf16, #tpu.memory_space<vmem>>, vector<1x16x32xbf16>
    %26 = vector.shape_cast %25 : vector<1x16x32xbf16> to vector<16x32xbf16>
    %cst_22 = arith.constant dense<0.000000e+00> : vector<22x32xf32>
    %27 = tpu.matmul %24, %26, %cst_22 {dimension_numbers = #tpu.dot_dimension_numbers<[1], [0], [0], [1], [0, 0, 1, 1], [], []>} : vector<22x16xbf16>, vector<16x32xbf16>, vector<22x32xf32> -> vector<22x32xf32>
    %28 = arith.addf %21, %27 : vector<22x32xf32>
    %c0_23 = arith.constant 0 : index
    %c7 = arith.constant 7 : index
    %c0_24 = arith.constant 0 : index
    %29 = vector.load %arg1[%c0_23, %c7, %c0_24] : memref<1x36x16xf32, #tpu.memory_space<vmem>>, vector<1x22x16xf32>
    %30 = vector.shape_cast %29 : vector<1x22x16xf32> to vector<22x16xf32>
    %31 = arith.truncf %30 : vector<22x16xf32> to vector<22x16xbf16>
    %c4 = arith.constant 4 : index
    %c0_25 = arith.constant 0 : index
    %c0_26 = arith.constant 0 : index
    %32 = vector.load %arg2[%c4, %c0_25, %c0_26] : memref<9x16x32xbf16, #tpu.memory_space<vmem>>, vector<1x16x32xbf16>
    %33 = vector.shape_cast %32 : vector<1x16x32xbf16> to vector<16x32xbf16>
    %cst_27 = arith.constant dense<0.000000e+00> : vector<22x32xf32>
    %34 = tpu.matmul %31, %33, %cst_27 {dimension_numbers = #tpu.dot_dimension_numbers<[1], [0], [0], [1], [0, 0, 1, 1], [], []>} : vector<22x16xbf16>, vector<16x32xbf16>, vector<22x32xf32> -> vector<22x32xf32>
    %35 = arith.addf %28, %34 : vector<22x32xf32>
    %c0_28 = arith.constant 0 : index
    %c8 = arith.constant 8 : index
    %c0_29 = arith.constant 0 : index
    %36 = vector.load %arg1[%c0_28, %c8, %c0_29] : memref<1x36x16xf32, #tpu.memory_space<vmem>>, vector<1x22x16xf32>
    %37 = vector.shape_cast %36 : vector<1x22x16xf32> to vector<22x16xf32>
    %38 = arith.truncf %37 : vector<22x16xf32> to vector<22x16xbf16>
    %c5 = arith.constant 5 : index
    %c0_30 = arith.constant 0 : index
    %c0_31 = arith.constant 0 : index
    %39 = vector.load %arg2[%c5, %c0_30, %c0_31] : memref<9x16x32xbf16, #tpu.memory_space<vmem>>, vector<1x16x32xbf16>
    %40 = vector.shape_cast %39 : vector<1x16x32xbf16> to vector<16x32xbf16>
    %cst_32 = arith.constant dense<0.000000e+00> : vector<22x32xf32>
    %41 = tpu.matmul %38, %40, %cst_32 {dimension_numbers = #tpu.dot_dimension_numbers<[1], [0], [0], [1], [0, 0, 1, 1], [], []>} : vector<22x16xbf16>, vector<16x32xbf16>, vector<22x32xf32> -> vector<22x32xf32>
    %42 = arith.addf %35, %41 : vector<22x32xf32>
    %c0_33 = arith.constant 0 : index
    %c12 = arith.constant 12 : index
    %c0_34 = arith.constant 0 : index
    %43 = vector.load %arg1[%c0_33, %c12, %c0_34] : memref<1x36x16xf32, #tpu.memory_space<vmem>>, vector<1x22x16xf32>
    %44 = vector.shape_cast %43 : vector<1x22x16xf32> to vector<22x16xf32>
    %45 = arith.truncf %44 : vector<22x16xf32> to vector<22x16xbf16>
    %c6_35 = arith.constant 6 : index
    %c0_36 = arith.constant 0 : index
    %c0_37 = arith.constant 0 : index
    %46 = vector.load %arg2[%c6_35, %c0_36, %c0_37] : memref<9x16x32xbf16, #tpu.memory_space<vmem>>, vector<1x16x32xbf16>
    %47 = vector.shape_cast %46 : vector<1x16x32xbf16> to vector<16x32xbf16>
    %cst_38 = arith.constant dense<0.000000e+00> : vector<22x32xf32>
    %48 = tpu.matmul %45, %47, %cst_38 {dimension_numbers = #tpu.dot_dimension_numbers<[1], [0], [0], [1], [0, 0, 1, 1], [], []>} : vector<22x16xbf16>, vector<16x32xbf16>, vector<22x32xf32> -> vector<22x32xf32>
    %49 = arith.addf %42, %48 : vector<22x32xf32>
    %c0_39 = arith.constant 0 : index
    %c13 = arith.constant 13 : index
    %c0_40 = arith.constant 0 : index
    %50 = vector.load %arg1[%c0_39, %c13, %c0_40] : memref<1x36x16xf32, #tpu.memory_space<vmem>>, vector<1x22x16xf32>
    %51 = vector.shape_cast %50 : vector<1x22x16xf32> to vector<22x16xf32>
    %52 = arith.truncf %51 : vector<22x16xf32> to vector<22x16xbf16>
    %c7_41 = arith.constant 7 : index
    %c0_42 = arith.constant 0 : index
    %c0_43 = arith.constant 0 : index
    %53 = vector.load %arg2[%c7_41, %c0_42, %c0_43] : memref<9x16x32xbf16, #tpu.memory_space<vmem>>, vector<1x16x32xbf16>
    %54 = vector.shape_cast %53 : vector<1x16x32xbf16> to vector<16x32xbf16>
    %cst_44 = arith.constant dense<0.000000e+00> : vector<22x32xf32>
    %55 = tpu.matmul %52, %54, %cst_44 {dimension_numbers = #tpu.dot_dimension_numbers<[1], [0], [0], [1], [0, 0, 1, 1], [], []>} : vector<22x16xbf16>, vector<16x32xbf16>, vector<22x32xf32> -> vector<22x32xf32>
    %56 = arith.addf %49, %55 : vector<22x32xf32>
    %c0_45 = arith.constant 0 : index
    %c14 = arith.constant 14 : index
    %c0_46 = arith.constant 0 : index
    %57 = vector.load %arg1[%c0_45, %c14, %c0_46] : memref<1x36x16xf32, #tpu.memory_space<vmem>>, vector<1x22x16xf32>
    %58 = vector.shape_cast %57 : vector<1x22x16xf32> to vector<22x16xf32>
    %59 = arith.truncf %58 : vector<22x16xf32> to vector<22x16xbf16>
    %c8_47 = arith.constant 8 : index
    %c0_48 = arith.constant 0 : index
    %c0_49 = arith.constant 0 : index
    %60 = vector.load %arg2[%c8_47, %c0_48, %c0_49] : memref<9x16x32xbf16, #tpu.memory_space<vmem>>, vector<1x16x32xbf16>
    %61 = vector.shape_cast %60 : vector<1x16x32xbf16> to vector<16x32xbf16>
    %cst_50 = arith.constant dense<0.000000e+00> : vector<22x32xf32>
    %62 = tpu.matmul %59, %61, %cst_50 {dimension_numbers = #tpu.dot_dimension_numbers<[1], [0], [0], [1], [0, 0, 1, 1], [], []>} : vector<22x16xbf16>, vector<16x32xbf16>, vector<22x32xf32> -> vector<22x32xf32>
    %63 = arith.addf %56, %62 : vector<22x32xf32>
    %c0_51 = arith.constant 0 : index
    %c0_52 = arith.constant 0 : index
    %64 = vector.load %arg3[%c0_51, %c0_52] : memref<1x32xf32, #tpu.memory_space<vmem>>, vector<1x32xf32>
    %65 = vector.broadcast %64 : vector<1x32xf32> to vector<22x32xf32>
    %66 = arith.addf %63, %65 : vector<22x32xf32>
    %cst_53 = arith.constant 0.000000e+00 : f32
    %67 = vector.broadcast %cst_53 : f32 to vector<22x32xf32>
    %68 = arith.maximumf %66, %67 : vector<22x32xf32>
    %c0_54 = arith.constant 0 : index
    %c0_55 = arith.constant 0 : index
    %c0_56 = arith.constant 0 : index
    %69 = vector.load %arg4[%c0_54, %c0_55, %c0_56] : memref<1x22x32xf32, #tpu.memory_space<vmem>>, vector<1x22x32xf32>
    %70 = vector.shape_cast %69 : vector<1x22x32xf32> to vector<22x32xf32>
    %71 = vector.shape_cast %68 : vector<22x32xf32> to vector<1x22x32xf32>
    tpu.vector_store %arg4[%c0_54, %c0_55, %c0_56], %71 {strides = array<i32>} : memref<1x22x32xf32, #tpu.memory_space<vmem>>, vector<1x22x32xf32>,
    return
  }
  func.func @transform_0(%arg0: i32) -> (i32, i32, i32) {
    %c0_i32 = arith.constant 0 : i32
    %c0_i32_0 = arith.constant 0 : i32
    %c0_i32_1 = arith.constant 0 : i32
    return %arg0, %c0_i32, %c0_i32_0 : i32, i32, i32
  }
  func.func @transform_1(%arg0: i32) -> (i32, i32, i32) {
    %c0_i32 = arith.constant 0 : i32
    %c0_i32_0 = arith.constant 0 : i32
    %c0_i32_1 = arith.constant 0 : i32
    %c0_i32_2 = arith.constant 0 : i32
    return %c0_i32, %c0_i32_0, %c0_i32_1 : i32, i32, i32
  }
  func.func @transform_2(%arg0: i32) -> (i32, i32) {
    %c0_i32 = arith.constant 0 : i32
    %c0_i32_0 = arith.constant 0 : i32
    %c0_i32_1 = arith.constant 0 : i32
    return %c0_i32, %c0_i32_0 : i32, i32
  }
  func.func @transform_3(%arg0: i32) -> (i32, i32, i32) {
    %c0_i32 = arith.constant 0 : i32
    %c0_i32_0 = arith.constant 0 : i32
    %c0_i32_1 = arith.constant 0 : i32
    return %arg0, %c0_i32, %c0_i32_0 : i32, i32, i32
  }
}

module attributes {stable_mosaic.version = 11 : i64} {
  func.func @kernel(%arg0: i32, %arg1: memref<3x32x4xf32, #tpu.memory_space<vmem>>, %arg2: memref<2x2xf32, #tpu.memory_space<smem>>) attributes {dimension_semantics = [#tpu.dimension_semantics<arbitrary>], iteration_bounds = array<i64: 2>, scalar_prefetch = 0 : i64, scratch_operands = 0 : i64, tpu.core_type = #tpu.core_type<tc>, window_params = [{transform_indices = @transform_0, window_bounds = array<i64: 3, 32, 4>}, {transform_indices = @transform_1, window_bounds = array<i64: 2, 2>}]} {
    %c0 = arith.constant 0 : index
    %c0_0 = arith.constant 0 : index
    %c0_1 = arith.constant 0 : index
    %0 = vector.load %arg1[%c0, %c0_0, %c0_1] : memref<3x32x4xf32, #tpu.memory_space<vmem>>, vector<1x32x4xf32>
    %1 = vector.shape_cast %0 : vector<1x32x4xf32> to vector<32x4xf32>
    %c1 = arith.constant 1 : index
    %c0_2 = arith.constant 0 : index
    %c0_3 = arith.constant 0 : index
    %2 = vector.load %arg1[%c1, %c0_2, %c0_3] : memref<3x32x4xf32, #tpu.memory_space<vmem>>, vector<1x32x4xf32>
    %3 = vector.shape_cast %2 : vector<1x32x4xf32> to vector<32x4xf32>
    %c2 = arith.constant 2 : index
    %c0_4 = arith.constant 0 : index
    %c0_5 = arith.constant 0 : index
    %4 = vector.load %arg1[%c2, %c0_4, %c0_5] : memref<3x32x4xf32, #tpu.memory_space<vmem>>, vector<1x32x4xf32>
    %5 = vector.shape_cast %4 : vector<1x32x4xf32> to vector<32x4xf32>
    %6 = arith.subf %3, %5 : vector<32x4xf32>
    %7 = math.absf %6 : vector<32x4xf32>
    %8 = vector.shape_cast %7 : vector<32x4xf32> to vector<1x32x4xf32>
    %cst = arith.constant dense<0.000000e+00> : vector<1xf32>
    %9 = vector.multi_reduction <add>, %8, %cst [1, 2] : vector<1x32x4xf32> to vector<1xf32>
    %10 = vector.shape_cast %9 : vector<1xf32> to vector<1x1x1xf32>
    %11 = vector.extract %10[0, 0, 0] : f32 from vector<1x1x1xf32>
    %12 = arith.subf %1, %5 : vector<32x4xf32>
    %13 = math.absf %12 : vector<32x4xf32>
    %14 = vector.shape_cast %13 : vector<32x4xf32> to vector<1x32x4xf32>
    %cst_6 = arith.constant dense<0.000000e+00> : vector<1xf32>
    %15 = vector.multi_reduction <add>, %14, %cst_6 [1, 2] : vector<1x32x4xf32> to vector<1xf32>
    %16 = vector.shape_cast %15 : vector<1xf32> to vector<1x1x1xf32>
    %17 = vector.extract %16[0, 0, 0] : f32 from vector<1x1x1xf32>
    %18 = arith.addf %11, %17 : f32
    %cst_7 = arith.constant dense<0.000000e+00> : vector<32x32xf32>
    %19 = tpu.matmul %1, %1, %cst_7 {dimension_numbers = #tpu.dot_dimension_numbers<[1], [1], [0], [0], [0, 0, 1, 0], [], []>} : vector<32x4xf32>, vector<32x4xf32>, vector<32x32xf32> -> vector<32x32xf32>
    %cst_8 = arith.constant dense<0.000000e+00> : vector<32x32xf32>
    %20 = tpu.matmul %3, %3, %cst_8 {dimension_numbers = #tpu.dot_dimension_numbers<[1], [1], [0], [0], [0, 0, 1, 0], [], []>} : vector<32x4xf32>, vector<32x4xf32>, vector<32x32xf32> -> vector<32x32xf32>
    %cst_9 = arith.constant dense<0.000000e+00> : vector<32x32xf32>
    %21 = tpu.matmul %5, %5, %cst_9 {dimension_numbers = #tpu.dot_dimension_numbers<[1], [1], [0], [0], [0, 0, 1, 0], [], []>} : vector<32x4xf32>, vector<32x4xf32>, vector<32x32xf32> -> vector<32x32xf32>
    %22 = arith.subf %20, %21 : vector<32x32xf32>
    %23 = math.absf %22 : vector<32x32xf32>
    %24 = vector.shape_cast %23 : vector<32x32xf32> to vector<1x32x32xf32>
    %cst_10 = arith.constant dense<0.000000e+00> : vector<1xf32>
    %25 = vector.multi_reduction <add>, %24, %cst_10 [1, 2] : vector<1x32x32xf32> to vector<1xf32>
    %26 = vector.shape_cast %25 : vector<1xf32> to vector<1x1x1xf32>
    %27 = vector.extract %26[0, 0, 0] : f32 from vector<1x1x1xf32>
    %28 = arith.subf %19, %21 : vector<32x32xf32>
    %29 = math.absf %28 : vector<32x32xf32>
    %30 = vector.shape_cast %29 : vector<32x32xf32> to vector<1x32x32xf32>
    %cst_11 = arith.constant dense<0.000000e+00> : vector<1xf32>
    %31 = vector.multi_reduction <add>, %30, %cst_11 [1, 2] : vector<1x32x32xf32> to vector<1xf32>
    %32 = vector.shape_cast %31 : vector<1xf32> to vector<1x1x1xf32>
    %33 = vector.extract %32[0, 0, 0] : f32 from vector<1x1x1xf32>
    %34 = arith.addf %27, %33 : f32
    %cst_12 = arith.constant 7.812500e-03 : f32
    %35 = arith.mulf %34, %cst_12 : f32
    %36 = arith.index_cast %arg0 : i32 to index
    %c0_13 = arith.constant 0 : index
    %37 = memref.load %arg2[%36, %c0_13] : memref<2x2xf32, #tpu.memory_space<smem>>
    memref.store %18, %arg2[%36, %c0_13] : memref<2x2xf32, #tpu.memory_space<smem>>
    %38 = arith.index_cast %arg0 : i32 to index
    %c1_14 = arith.constant 1 : index
    %39 = memref.load %arg2[%38, %c1_14] : memref<2x2xf32, #tpu.memory_space<smem>>
    memref.store %35, %arg2[%38, %c1_14] : memref<2x2xf32, #tpu.memory_space<smem>>
    return
  }
  func.func @transform_0(%arg0: i32) -> (i32, i32, i32) {
    %c0_i32 = arith.constant 0 : i32
    %c0_i32_0 = arith.constant 0 : i32
    %c0_i32_1 = arith.constant 0 : i32
    return %arg0, %c0_i32, %c0_i32_0 : i32, i32, i32
  }
  func.func @transform_1(%arg0: i32) -> (i32, i32) {
    %c0_i32 = arith.constant 0 : i32
    %c0_i32_0 = arith.constant 0 : i32
    %c0_i32_1 = arith.constant 0 : i32
    return %c0_i32, %c0_i32_0 : i32, i32
  }
}

</mosaic_0001>

<bundles_post_ra>
// kernel: total_loss.7
= control target key start
LH: loop header
LB: loop body
LE: loop exit
PB: predicated region body
PF: predicated region fallthrough
CT: control target
= control target key end

     0   :  { %s287_s0 = inlined_call_operand.vmem [shape: f32[6,256], index: 0, kind: input, shape index: {}]   ;;  %s288_s1 = inlined_call_operand.vmem [shape: f32[6,256], index: 1, kind: input, shape index: {}]   ;;  %s289_s2 = inlined_call_operand.vmem [shape: f32[6,256], index: 2, kind: input, shape index: {}]   ;;  %s290_s3 = inlined_call_operand.vmem [shape: f32[6,256], index: 3, kind: input, shape index: {}]   ;;  %s291_s4 = inlined_call_operand.vmem [shape: f32[6,256], index: 4, kind: output, shape index: {0}]   ;;  %s292_s5 = inlined_call_operand.vmem [shape: f32[1,4], index: 5, kind: output, shape index: {1}]  }
   0x1   :  { %v20_v0 = vld [vmem:[%s287_s0] sm:$0x3f]  ;;  %v21_v5 = vld [vmem:[%s287_s0 + $0x8] sm:$0x3f] }
   0x2   :  { %v22_v1 = vld [vmem:[%s288_s1] sm:$0x3f]  ;;  %v23_v6 = vld [vmem:[%s288_s1 + $0x8] sm:$0x3f] }
   0x3   :  { %v24_v2 = vld [vmem:[%s289_s2] sm:$0x3f]  ;;  %v28_v3 = vsub.f32 1.0, %v22_v1  ;;  %v30_v4 = vmul.f32 %v22_v1, %v20_v0  ;;  %v25_v7 = vld [vmem:[%s289_s2 + $0x8] sm:$0x3f]  ;;  %v29_v9 = vsub.f32 1.0, %v23_v6  ;;  %v31_v10 = vmul.f32 %v23_v6, %v21_v5 }
   0x5   :  { %v32_v8 = vmul.f32 %v28_v3, %v24_v2 }
   0x6   :  { %11 = vsyncpa [#allocation3], 0  ;;  %v33_v12 = vmul.f32 %v29_v9, %v25_v7  ;;  %s213_s30 = smov 112   ;;  %s214_s0 = smov 127   ;;  %v26_v14 = vld [vmem:[%s290_s3] sm:$0x3f]  ;;  %v73_v32 = vlaneseq }
   0x7   :  { %v34_v11 = vadd.f32 %v32_v8, %v30_v4  ;;  %v27_v15 = vld [vmem:[%s290_s3 + $0x8] sm:$0x3f]  ;;  %v38_v16 = vsub.f32 %v24_v2, %v26_v14  ;;  %vm44_vm0 = vcmask 1045504   ;;  %s174_s15 = sshll.u32 %s292_s5, 4  ;;  %s175_s15 = int_to_ptr.vmem [resolvable:$true] %s174_s15 }
   0x8   :  { %v35_v13 = vadd.f32 %v33_v12, %v31_v10  ;;  %v39_v17 = vsub.f32 %v25_v7, %v27_v15  ;;  %v74_v33 = vand.u32 127, %v73_v32  ;;  %s199_s17 = scalar_lea.vmem %s175_s15, 16  ;;  %p204_p1 = scmp.lt.s32.totalorder %s175_s15, %s175_s15 }
   0x9   :  { %83 = vrot.lane.b32.xlu1 %v34_v11, %s213_s30  ;;  %36 = vst [vmem:[%s291_s4] sm:$0x3f] %v34_v11  ;;  %76 = vrot.lane.b32.xlu0 %v34_v11, %s214_s0  ;;  %v40_v18 = vmul.f32 %v38_v16, %v28_v3  ;;  %v57_v22 = vmul.f32 %v38_v16, %v22_v1  ;;  %p200_p0 = scmp.ne.s32.totalorder %s175_s15, %s199_s17  ;;  %p205_p2 = scmp.lt.s32.totalorder %s199_s17, %s199_s17 }
   0xa   :  { %37 = vst [vmem:[%s291_s4 + $0x8] sm:$0x3f] %v35_v13  ;;  %v41_v19 = vmul.f32 %v39_v17, %v29_v9  ;;  %v58_v23 = vmul.f32 %v39_v17, %v23_v6  ;;  %v75_v36 = vadd.s32 128, %v74_v33  ;;  %vm87_vm1 = vcmp.lt.s32.totalorder %v74_v33, 112 }
   0xb   :  { %v42_v20 = vand.u32 2147483647, %v40_v18  ;;  %v59_v26 = vand.u32 2147483647, %v57_v22  ;;  %vm80_vm2 = vcmp.lt.s32.totalorder %v74_v33, 127  ;;  %v94_v37 = vand.u32 15, %v74_v33  ;;  %p206_p3 = por %p205_p2, %p204_p1 }
   0xc   :  { %v43_v21 = vand.u32 2147483647, %v41_v19  ;;  %v60_v27 = vand.u32 2147483647, %v58_v23  ;;  %v101_v40 = vand.u32 15, %v75_v36  ;;  %vm123_vm5 = vcmp.lt.s32.totalorder %v75_v36, 240 }
   0xd   :  { %85 = vrot.lane.b32.xlu1 %v35_v13, %s213_s30  ;;  %78 = vrot.lane.b32.xlu0 %v35_v13, %s214_s0  ;;  %v45_v24 = vsel %vm44_vm0, %v42_v20, 0.0  ;;  %v61_v29 = vsel %vm44_vm0, %v59_v26, 0.0  ;;  %vm114_vm3 = vcmp.ne.s32.totalorder %v94_v37, 15  ;;  %p207_p4 = pnand %p206_p3, %p200_p0 }
   0xe   :  { %v46_v25 = vsel %vm44_vm0, %v43_v21, 0.0  ;;  %v62_v30 = vsel %vm44_vm0, %v60_v27, 0.0  ;;  %vm115_vm4 = vcmp.ne.s32.totalorder %v101_v40, 15 }
   0xf   :  { %v47_v28 = vadd.f32 %v46_v25, %v45_v24  ;;  %v63_v31 = vadd.f32 %v62_v30, %v61_v29 }
  0x2c   :  { %48 = vadd.xlane.f32.xlu0 %v47_v28 }
  0x31   :  { %64 = vadd.xlane.f32.xlu1 %v63_v31 }
  0x7b   :  { %v84_v34 = vpop.permute.xlu1 %83  ;;  %v77_v35 = vpop.permute.xlu0 %76 }
  0x7f   :  { %v86_v38 = vpop.permute.xlu1 %85  ;;  %v79_v39 = vpop.permute.xlu0 %78 }
  0x80   :  { %v88_v41 = vsel %vm87_vm1, %v84_v34, %v86_v38  ;;  %v89_v42 = vsel %vm87_vm1, %v86_v38, %v84_v34  ;;  %v81_v43 = vsel %vm80_vm2, %v77_v35, %v79_v39  ;;  %v82_v44 = vsel %vm80_vm2, %v79_v39, %v77_v35 }
  0x81   :  { %v124_v45 = vsub.f32 %v34_v11, %v88_v41  ;;  %v125_v46 = vsub.f32 %v35_v13, %v89_v42  ;;  %v116_v47 = vsub.f32 %v34_v11, %v81_v43  ;;  %v117_v48 = vsub.f32 %v35_v13, %v82_v44 }
  0x83   :  { %v127_v49 = vand.u32 2147483647, %v125_v46  ;;  %v118_v50 = vand.u32 2147483647, %v116_v47  ;;  %v119_v51 = vand.u32 2147483647, %v117_v48 }
  0x84   :  { %v126_v52 = vand.u32 2147483647, %v124_v45 }
  0x85   :  { %v120_v53 = vsel %vm114_vm3, %v118_v50, 0.0  ;;  %v121_v54 = vsel %vm115_vm4, %v119_v51, 0.0  ;;  %v129_v56 = vsel %vm123_vm5, %v127_v49, 0.0 }
  0x86   :  { %v136_v55 = vsel %vm44_vm0, %v120_v53, 0.0  ;;  %v137_v57 = vsel %vm44_vm0, %v121_v54, 0.0  ;;  %v151_v59 = vsel %vm44_vm0, %v126_v52, 0.0  ;;  %v152_v60 = vsel %vm44_vm0, %v129_v56, 0.0 }
  0x87   :  { %v138_v58 = vadd.f32 %v137_v57, %v136_v55  ;;  %v153_v61 = vadd.f32 %v152_v60, %v151_v59 }
  0x89   :  { %139 = vadd.xlane.f32.xlu0 %v138_v58 }
  0x8d   :  { %154 = vadd.xlane.f32.xlu0 %v153_v61 }
  0xb9   :  { %v49_v62 = vpop.xlane.xlu0 %48 }
  0xba   :  { %v50_v63 = vrot.slane %v49_v62, 4 }
  0xbc   :  { %v51_v0 = vadd.f32 %v50_v63, %v49_v62 }
  0xbe   :  { %v52_v1 = vrot.slane %v51_v0, 2  ;;  %v65_v2 = vpop.xlane.xlu1 %64 }
  0xbf   :  { %v66_v3 = vrot.slane %v65_v2, 4 }
  0xc0   :  { %v53_v4 = vadd.f32 %v52_v1, %v51_v0 }
  0xc1   :  { %v67_v5 = vadd.f32 %v66_v3, %v65_v2 }
  0xc2   :  { %v54_v6 = vrot.slane %v53_v4, 1 }
  0xc3   :  { %v68_v7 = vrot.slane %v67_v5, 2 }
  0xc4   :  { %v55_v8 = vadd.f32 %v54_v6, %v53_v4 }
  0xc5   :  { %v69_v9 = vadd.f32 %v68_v7, %v67_v5 }
  0xc6   :  { %188 = vpush %v55_v8 }
  0xc7   :  { %v70_v10 = vrot.slane %v69_v9, 1 }
  0xc9   :  { %v71_v11 = vadd.f32 %v70_v10, %v69_v9 }
  0xcb   :  { %190 = vpush %v71_v11 }
  0xf7   :  { %s189_s3 = spop %188 }
  0xf8   :  { %132 = sst [smem:[#allocation2]] %s189_s3 }
  0xfc   :  { %s191_s4 = spop %190 }
  0xfd   :  { %135 = sst [smem:[#allocation2 + $0x1]] %s191_s4 }
 0x116   :  { %v140_v12 = vpop.xlane.xlu0 %139 }
 0x117   :  { %v141_v13 = vrot.slane %v140_v12, 4 }
 0x119   :  { %v142_v14 = vadd.f32 %v141_v13, %v140_v12 }
 0x11a   :  { %v155_v15 = vpop.xlane.xlu0 %154 }
 0x11b   :  { %v143_v16 = vrot.slane %v142_v14, 2  ;;  %v156_v17 = vrot.slane %v155_v15, 4 }
 0x11d   :  { %v157_v18 = vadd.f32 %v156_v17, %v155_v15  ;;  %v144_v19 = vadd.f32 %v143_v16, %v142_v14 }
 0x11f   :  { %v158_v20 = vrot.slane %v157_v18, 2  ;;  %v145_v21 = vrot.slane %v144_v19, 1 }
 0x121   :  { %v159_v22 = vadd.f32 %v158_v20, %v157_v18  ;;  %v146_v23 = vadd.f32 %v145_v21, %v144_v19 }
 0x123   :  { %192 = vpush %v146_v23  ;;  %v160_v24 = vrot.slane %v159_v22, 1 }
 0x125   :  { %v161_v25 = vadd.f32 %v160_v24, %v159_v22 }
 0x127   :  { %194 = vpush %v161_v25 }
 0x154   :  { %s193_s12 = spop %192 }
 0x155   :  { %150 = sst [smem:[#allocation2 + $0x2]] %s193_s12 }
 0x158   :  { %s195_s16 = spop %194 }
 0x159   :  { %165 = sst [smem:[#allocation2 + $0x3]] %s195_s16 }
 0x15a   :  { %210 = shalt.err (!%p207_p4)
}
 0x15b   :  { %s215_s18 = smov [#allocation2]  }
 0x15c   :  { %177 = dma.smem_to_vmem %s215_s18, 16, %s175_s15, [#allocation3]  }
 0x15d   :  { %211 = dma.done.wait [#allocation3], 16  }
 0x15e   :  { %212 = vsyncadd [#allocation3], 4294967280 }
 0x15f   :  { %183 = sfence }
 0x160   :  { %184 = vsyncpa [#allocation3], 1 }

// kernel: total_loss.8
= control target key start
LH: loop header
LB: loop body
LE: loop exit
PB: predicated region body
PF: predicated region fallthrough
CT: control target
= control target key end

     0   :  { %s4233_s12 = smov 0   ;;  %s5014_s0 = inlined_call_operand.vmem [shape: f32[6,324,3], index: 0, kind: input, shape index: {}]   ;;  %s5015_s1 = inlined_call_operand.vmem [shape: bf16[9,3,8], index: 1, kind: input, shape index: {}]   ;;  %s5016_s2 = inlined_call_operand.vmem [shape: f32[1,8], index: 2, kind: input, shape index: {}]   ;;  %s5017_s3 = inlined_call_operand.vmem [shape: f32[6,286,8], index: 3, kind: output, shape index: {}]  }
   0x1 LB: > { %s3210_s13 = sadd.s32 4294967295, %s4210_s12   ;;  %p3214_p0 = scmp.ge.s32.totalorder %s4210_s12, 1  ;;  %s4210_s12 = sphi %s4233_s12, %s13_s12  }
   0x2   : > { %p137_p1 = scmp.lt.s32.totalorder %s4210_s12, 7 }
   0x4   : > { %p138_p2 = pnand %p3214_p0, %p137_p1 }
   0x5   : > { %vm338_vm0 = vcmask (!%p138_p2), 1040384   ;;  %vm339_vm1 = vcmask (!%p138_p2), 1041408   ;;  %v3292_v0 = vld [vmem:[%s5015_s1 + $0x8] sm:$0x3] (!%p138_p2)  ;;  %p161_p3 = scmp.lt.s32.totalorder (!%p138_p2), %s3210_s13, 5  ;;  %v4212_v1 = vmov (!%p138_p2), 65535  }
   0x6   : > { %141 = sbr.rel (%p138_p2) target bundleno = 564 (0x234), region = 32  ;;  %v340_v2 = vsel (!%p138_p2), %vm338_vm0, 4294967295, %v4212_v1  ;;  %v3217_v3 = vld [vmem:[%s5015_s1 + $0x2] sm:$0x3] (!%p138_p2)  ;;  %v3311_v4 = vld [vmem:[%s5015_s1 + $0xa] sm:$0x3] (!%p138_p2) }
   0x7   : > { %v4250_v5 = vsel (!%p138_p2), %vm339_vm1, %v340_v2, 0  ;;  %v226_v6 = vld [vmem:[%s5015_s1] sm:$0x3] (!%p138_p2)  ;;  %v3330_v11 = vld [vmem:[%s5015_s1 + $0xc] sm:$0x3] (!%p138_p2)  ;;  %vm283_vm2 = vcmask (!%p138_p2), 23552  }
   0x8   : > { %v4258_v7 = vand.u32 (!%p138_p2), %v3292_v0, %v4250_v5  ;;  %v343_v8 = vand.u32 (!%p138_p2), %v3217_v3, %v4250_v5  ;;  %v1845_v9 = vand.u32 (!%p138_p2), %v3311_v4, %v4250_v5  ;;  %v577_v10 = vand.u32 (!%p138_p2), %v4250_v5, %v226_v6  ;;  %v3254_v12 = vld [vmem:[%s5015_s1 + $0x4] sm:$0x3] (!%p138_p2) }
   0x9   : > { %v4291_v29 = vand.u32 (!%p138_p2), %v3330_v11, %v4250_v5  ;;  %v4296_v32 = vand.u32 (!%p138_p2), %v3254_v12, %v4250_v5  ;;  %vm3117_vm3 = vcmask (!%p138_p2), 64512   ;;  %vm3153_vm4 = vcmask (!%p138_p2), 62464  }
   0xa   : > { %3713 = vmatprep.subr.bf16.mxu0 (!%p138_p2), %v4258_v7  ;;  %3561 = vmatprep.subr.bf16.mxu1 (!%p138_p2), %v343_v8 }
   0xb   : > { %3714 = vmatpush3.bf16.msra.mxu0 (!%p138_p2), %v4258_v7  ;;  %3562 = vmatpush3.bf16.msra.mxu1 (!%p138_p2), %v343_v8 }
   0xc   : > { %3751 = vmatprep.subr.bf16.mxu0 (!%p138_p2), %v1845_v9  ;;  %3599 = vmatprep.subr.bf16.mxu1 (!%p138_p2), %v577_v10 }
   0xd   : > { %s5019_s13 = smov (!%p161_p3, %s3210_s13), 5 }
   0xe   : > { %s4193_s22 = smul.u32 328, %s5019_s13 }
   0xf   : > { %s4194_s9 = smul.u32 288, %s5019_s13 }
  0x10   : > { %s4269_s25 = scalar_lea.vmem %s5014_s0, %s4193_s22 }
  0x11   : > { %v227_v13 = vld [vmem:[%s4269_s25 + $0x1] sm:$0xff]  ;;  %v228_v14 = vld [vmem:[%s4269_s25 + $0x9] sm:$0xff]  ;;  %v1408_v15 = vld [vmem:[%s4269_s25 + $0x13] sm:$0xff]  ;;  %s4895_s16 = scalar_lea.vmem %s5017_s3, %s4194_s9 }
  0x12   : > { %v263_v16 = vpack.c.bf16 %v228_v14, %v227_v13  ;;  %v1409_v17 = vld [vmem:[%s4269_s25 + $0x1b] sm:$0xff]  ;;  %v229_v18 = vld [vmem:[%s4269_s25 + $0x11] sm:$0xff]  ;;  %v1410_v22 = vld [vmem:[%s4269_s25 + $0x23] sm:$0xff] }
  0x13   : > { %v230_v19 = vld [vmem:[%s4269_s25 + $0x19] sm:$0xff]  ;;  %v1444_v20 = vpack.c.bf16 %v1409_v17, %v1408_v15  ;;  %v1411_v23 = vld [vmem:[%s4269_s25 + $0x2b] sm:$0xff]  ;;  %v231_v24 = vld [vmem:[%s4269_s25 + $0x21] sm:$0xff] }
  0x14   : > { %v264_v21 = vpack.c.bf16 %v230_v19, %v229_v18  ;;  %3563 = vmatprep.mubr.msk.bf16.mxu1 %vm283_vm2, %v263_v16  ;;  %v1445_v25 = vpack.c.bf16 %v1411_v23, %v1410_v22  ;;  %v232_v26 = vld [vmem:[%s4269_s25 + $0x29] sm:$0xff]  ;;  %v1412_v27 = vld [vmem:[%s4269_s25 + $0x33] sm:$0xff]  ;;  %v1413_v28 = vld [vmem:[%s4269_s25 + $0x3b] sm:$0xff] }
  0x15   : > { %3715 = vmatprep.mubr.msk.bf16.mxu0 %vm283_vm2, %v1444_v20  ;;  %v265_v30 = vpack.c.bf16 %v232_v26, %v231_v24  ;;  %v1446_v31 = vpack.c.bf16 %v1413_v28, %v1412_v27  ;;  %v233_v33 = vld [vmem:[%s4269_s25 + $0x31] sm:$0xff]  ;;  %v234_v34 = vld [vmem:[%s4269_s25 + $0x39] sm:$0xff]  ;;  %v1414_v35 = vld [vmem:[%s4269_s25 + $0x43] sm:$0xff] }
  0x16   : > { %3564 = vmatmul.mubr.msk.bf16.vlgmr.msra.gmra.mrb[0].mxu1 %vm283_vm2, %v264_v21  ;;  %3716 = vmatmul.mubr.msk.bf16.vlgmr.msra.gmra.mrb[0].mxu0 %vm283_vm2, %v1445_v25  ;;  %v1415_v36 = vld [vmem:[%s4269_s25 + $0x4b] sm:$0xff]  ;;  %v235_v37 = vld [vmem:[%s4269_s25 + $0x41] sm:$0xff]  ;;  %v1416_v39 = vld [vmem:[%s4269_s25 + $0x53] sm:$0xff]  ;;  %v266_v41 = vpack.c.bf16 %v234_v34, %v233_v33 }
  0x17   : > { %3600 = vmatpush3.bf16.msra.mxu1 %v577_v10  ;;  %3752 = vmatpush3.bf16.msra.mxu0 %v1845_v9  ;;  %v236_v38 = vld [vmem:[%s4269_s25 + $0x49] sm:$0xff]  ;;  %v1417_v40 = vld [vmem:[%s4269_s25 + $0x5b] sm:$0xff]  ;;  %v1447_v42 = vpack.c.bf16 %v1415_v36, %v1414_v35  ;;  %v237_v45 = vld [vmem:[%s4269_s25 + $0x51] sm:$0xff] }
  0x18   : > { %3567 = vmatprep.mubr.msk.bf16.mxu1 %vm283_vm2, %v265_v30  ;;  %3719 = vmatprep.mubr.msk.bf16.mxu0 %vm283_vm2, %v1446_v31  ;;  %v267_v43 = vpack.c.bf16 %v236_v38, %v235_v37  ;;  %v1448_v44 = vpack.c.bf16 %v1417_v40, %v1416_v39  ;;  %v238_v46 = vld [vmem:[%s4269_s25 + $0x59] sm:$0xff]  ;;  %v1418_v47 = vld [vmem:[%s4269_s25 + $0x63] sm:$0xff]  ;;  %v1419_v48 = vld [vmem:[%s4269_s25 + $0x6b] sm:$0xff] }
  0x19   : > { %3789 = vmatprep.subr.bf16.mxu0 %v4291_v29  ;;  %3637 = vmatprep.subr.bf16.mxu1 %v4296_v32  ;;  %v239_v49 = vld [vmem:[%s4269_s25 + $0x61] sm:$0xff]  ;;  %v240_v50 = vld [vmem:[%s4269_s25 + $0x69] sm:$0xff]  ;;  %v1420_v51 = vld [vmem:[%s4269_s25 + $0x73] sm:$0xff]  ;;  %v268_v53 = vpack.c.bf16 %v238_v46, %v237_v45  ;;  %v1449_v54 = vpack.c.bf16 %v1419_v48, %v1418_v47 }
  0x1a   : > { %v1421_v52 = vld [vmem:[%s4269_s25 + $0x7b] sm:$0xff]  ;;  %v269_v55 = vpack.c.bf16 %v240_v50, %v239_v49  ;;  %v241_v57 = vld [vmem:[%s4269_s25 + $0x71] sm:$0xff]  ;;  %v1422_v59 = vld [vmem:[%s4269_s25 + $0x83] sm:$0xff] }
  0x1b   : > { %v1450_v56 = vpack.c.bf16 %v1421_v52, %v1420_v51  ;;  %v242_v58 = vld [vmem:[%s4269_s25 + $0x79] sm:$0xff]  ;;  %v1423_v60 = vld [vmem:[%s4269_s25 + $0x8b] sm:$0xff]  ;;  %v243_v61 = vld [vmem:[%s4269_s25 + $0x81] sm:$0xff] }
  0x1c   : > { %v244_v62 = vld [vmem:[%s4269_s25 + $0x89] sm:$0xff]  ;;  %v1424_v63 = vld [vmem:[%s4269_s25 + $0x93] sm:$0xff]  ;;  %v1425_v0 = vld [vmem:[%s4269_s25 + $0x9b] sm:$0xff]  ;;  %v270_v1 = vpack.c.bf16 %v242_v58, %v241_v57  ;;  %v1451_v2 = vpack.c.bf16 %v1423_v60, %v1422_v59 }
  0x1d   : > { %v271_v3 = vpack.c.bf16 %v244_v62, %v243_v61  ;;  %v1452_v4 = vpack.c.bf16 %v1425_v0, %v1424_v63  ;;  %v245_v6 = vld [vmem:[%s4269_s25 + $0x91] sm:$0xff]  ;;  %v246_v8 = vld [vmem:[%s4269_s25 + $0x99] sm:$0xff]  ;;  %v1426_v9 = vld [vmem:[%s4269_s25 + $0xa3] sm:$0xff] }
  0x1e   : > { %3568 = vmatmul.mubr.msk.bf16.gmra.mrb[4].mxu1 %vm283_vm2, %v266_v41  ;;  %3720 = vmatmul.mubr.msk.bf16.gmra.mrb[4].mxu0 %vm283_vm2, %v1447_v42  ;;  %v1427_v10 = vld [vmem:[%s4269_s25 + $0xab] sm:$0xff]  ;;  %v247_v11 = vld [vmem:[%s4269_s25 + $0xa1] sm:$0xff]  ;;  %v1734_v13 = vld [vmem:[%s4269_s25 + $0x14] sm:$0xff]  ;;  %v272_v15 = vpack.c.bf16 %v246_v8, %v245_v6 }
  0x1f   : > { %3571 = vmatprep.mubr.msk.bf16.mxu1 %vm283_vm2, %v267_v43  ;;  %3723 = vmatprep.mubr.msk.bf16.mxu0 %vm283_vm2, %v1448_v44  ;;  %v248_v12 = vld [vmem:[%s4269_s25 + $0xa9] sm:$0xff]  ;;  %v1735_v14 = vld [vmem:[%s4269_s25 + $0x1c] sm:$0xff]  ;;  %v1453_v16 = vpack.c.bf16 %v1427_v10, %v1426_v9  ;;  %v249_v19 = vld [vmem:[%s4269_s25 + $0xb1] sm:$0xff] }
  0x20   : > { %v273_v17 = vpack.c.bf16 %v248_v12, %v247_v11  ;;  %v1770_v18 = vpack.c.bf16 %v1735_v14, %v1734_v13  ;;  %v250_v20 = vld [vmem:[%s4269_s25 + $0xb9] sm:$0xff]  ;;  %v1736_v21 = vld [vmem:[%s4269_s25 + $0x24] sm:$0xff]  ;;  %v1737_v22 = vld [vmem:[%s4269_s25 + $0x2c] sm:$0xff] }
  0x21   : > { %v251_v23 = vld [vmem:[%s4269_s25 + $0xc1] sm:$0xff]  ;;  %v252_v24 = vld [vmem:[%s4269_s25 + $0xc9] sm:$0xff]  ;;  %v1738_v25 = vld [vmem:[%s4269_s25 + $0x34] sm:$0xff]  ;;  %v274_v27 = vpack.c.bf16 %v250_v20, %v249_v19  ;;  %v4362_v30 = vpack.c.bf16 %v1737_v22, %v1736_v21 }
  0x22   : > { %v1739_v26 = vld [vmem:[%s4269_s25 + $0x3c] sm:$0xff]  ;;  %v3349_v28 = vld [vmem:[%s5015_s1 + $0xe] sm:$0x3]  ;;  %v275_v31 = vpack.c.bf16 %v252_v24, %v251_v23  ;;  %v253_v35 = vld [vmem:[%s4269_s25 + $0xd1] sm:$0xff] }
  0x23   : > { %v4364_v33 = vpack.c.bf16 %v1739_v26, %v1738_v25  ;;  %v4367_v34 = vand.u32 %v3349_v28, %v4250_v5  ;;  %v254_v36 = vld [vmem:[%s4269_s25 + $0xd9] sm:$0xff]  ;;  %v1740_v37 = vld [vmem:[%s4269_s25 + $0x44] sm:$0xff]  ;;  %v1741_v38 = vld [vmem:[%s4269_s25 + $0x4c] sm:$0xff] }
  0x24   : > { %v255_v39 = vld [vmem:[%s4269_s25 + $0xe1] sm:$0xff]  ;;  %v256_v40 = vld [vmem:[%s4269_s25 + $0xe9] sm:$0xff]  ;;  %v1742_v41 = vld [vmem:[%s4269_s25 + $0x54] sm:$0xff]  ;;  %v276_v43 = vpack.c.bf16 %v254_v36, %v253_v35  ;;  %v4385_v44 = vpack.c.bf16 %v1741_v38, %v1740_v37 }
  0x25   : > { %v1743_v42 = vld [vmem:[%s4269_s25 + $0x5c] sm:$0xff]  ;;  %v257_v46 = vld [vmem:[%s4269_s25 + $0xf1] sm:$0xff]  ;;  %v1744_v48 = vld [vmem:[%s4269_s25 + $0x64] sm:$0xff] }
  0x26   : > { %3572 = vmatmul.mubr.msk.bf16.gmra.mrb[8].mxu1 %vm283_vm2, %v268_v53  ;;  %3724 = vmatmul.mubr.msk.bf16.gmra.mrb[8].mxu0 %vm283_vm2, %v1449_v54  ;;  %v4387_v45 = vpack.c.bf16 %v1743_v42, %v1742_v41  ;;  %v258_v47 = vld [vmem:[%s4269_s25 + $0xf9] sm:$0xff]  ;;  %v1745_v49 = vld [vmem:[%s4269_s25 + $0x6c] sm:$0xff]  ;;  %v259_v50 = vld [vmem:[%s4269_s25 + $0x101] sm:$0xff] }
  0x27   : > { %3575 = vmatprep.mubr.msk.bf16.mxu1 %vm283_vm2, %v269_v55  ;;  %3727 = vmatprep.mubr.msk.bf16.mxu0 %vm283_vm2, %v1450_v56  ;;  %v260_v51 = vld [vmem:[%s4269_s25 + $0x109] sm:$0xff]  ;;  %v1746_v52 = vld [vmem:[%s4269_s25 + $0x74] sm:$0xff]  ;;  %v1747_v53 = vld [vmem:[%s4269_s25 + $0x7c] sm:$0xff]  ;;  %v278_v54 = vpack.c.bf16 %v258_v47, %v257_v46  ;;  %v4403_v55 = vpack.c.bf16 %v1745_v49, %v1744_v48 }
  0x28   : > { %v279_v56 = vpack.c.bf16 %v260_v51, %v259_v50  ;;  %v4405_v57 = vpack.c.bf16 %v1747_v53, %v1746_v52  ;;  %v261_v58 = vld [vmem:[%s4269_s25 + $0x111] sm:$0xff]  ;;  %v262_v59 = vld [vmem:[%s4269_s25 + $0x119] sm:$0x3f]  ;;  %v1748_v60 = vld [vmem:[%s4269_s25 + $0x84] sm:$0xff] }
  0x29   : > { %v1749_v61 = vld [vmem:[%s4269_s25 + $0x8c] sm:$0xff]  ;;  %v172_v62 = vld [vmem:[%s4269_s25] sm:$0xff]  ;;  %v1750_v0 = vld [vmem:[%s4269_s25 + $0x94] sm:$0xff] }
  0x2a   : > { %v173_v63 = vld [vmem:[%s4269_s25 + $0x8] sm:$0xff]  ;;  %v174_v8 = vld [vmem:[%s4269_s25 + $0x10] sm:$0xff]  ;;  %v175_v9 = vld [vmem:[%s4269_s25 + $0x18] sm:$0xff] }
  0x2b   : > { %v1752_v10 = vld [vmem:[%s4269_s25 + $0xa4] sm:$0xff]  ;;  %v1753_v11 = vld [vmem:[%s4269_s25 + $0xac] sm:$0xff]  ;;  %v1754_v14 = vld [vmem:[%s4269_s25 + $0xb4] sm:$0xff] }
  0x2c   : > { %v176_v12 = vld [vmem:[%s4269_s25 + $0x20] sm:$0xff]  ;;  %v177_v13 = vld [vmem:[%s4269_s25 + $0x28] sm:$0xff]  ;;  %v178_v22 = vld [vmem:[%s4269_s25 + $0x30] sm:$0xff] }
  0x2d   : > { %v210_v19 = vpack.c.bf16 %v177_v13, %v176_v12  ;;  %v179_v23 = vld [vmem:[%s4269_s25 + $0x38] sm:$0xff]  ;;  %v1756_v24 = vld [vmem:[%s4269_s25 + $0xc4] sm:$0xff]  ;;  %v1757_v25 = vld [vmem:[%s4269_s25 + $0xcc] sm:$0xff] }
  0x2e   : > { %3576 = vmatmul.mubr.msk.bf16.gmra.mrb[12].mxu1 %vm283_vm2, %v270_v1  ;;  %3728 = vmatmul.mubr.msk.bf16.gmra.mrb[12].mxu0 %vm283_vm2, %v1451_v2  ;;  %v1751_v1 = vld [vmem:[%s4269_s25 + $0x9c] sm:$0xff]  ;;  %v280_v2 = vpack.c.bf16 %v262_v59, %v261_v58  ;;  %v1758_v28 = vld [vmem:[%s4269_s25 + $0xd4] sm:$0xff]  ;;  %v211_v35 = vpack.c.bf16 %v179_v23, %v178_v22  ;;  %v4465_v36 = vpack.c.bf16 %v1757_v25, %v1756_v24  ;;  %v1761_v41 = vld [vmem:[%s4269_s25 + $0xec] sm:$0xff] }
  0x2f   : > { %3579 = vmatprep.mubr.msk.bf16.mxu1 %vm283_vm2, %v271_v3  ;;  %3731 = vmatprep.mubr.msk.bf16.mxu0 %vm283_vm2, %v1452_v4  ;;  %v4421_v3 = vpack.c.bf16 %v1749_v61, %v1748_v60  ;;  %v208_v4 = vpack.c.bf16 %v173_v63, %v172_v62  ;;  %v4423_v6 = vpack.c.bf16 %v1751_v1, %v1750_v0  ;;  %v180_v26 = vld [vmem:[%s4269_s25 + $0x40] sm:$0xff]  ;;  %v186_v51 = vld [vmem:[%s4269_s25 + $0x70] sm:$0xff]  ;;  %v187_v52 = vld [vmem:[%s4269_s25 + $0x78] sm:$0xff] }
  0x30   : > { %v184_v42 = vld [vmem:[%s4269_s25 + $0x60] sm:$0xff]  ;;  %v189_v58 = vld [vmem:[%s4269_s25 + $0x88] sm:$0xff]  ;;  %v1766_v59 = vld [vmem:[%s4269_s25 + $0x114] sm:$0xff]  ;;  %v215_v61 = vpack.c.bf16 %v187_v52, %v186_v51 }
  0x31   : > { %v1763_v46 = vld [vmem:[%s4269_s25 + $0xfc] sm:$0xff]  ;;  %v1764_v53 = vld [vmem:[%s4269_s25 + $0x104] sm:$0xff]  ;;  %v190_v1 = vld [vmem:[%s4269_s25 + $0x90] sm:$0xff] }
  0x32   : > { %v1767_v60 = vld [vmem:[%s4269_s25 + $0x11c] sm:$0xff]  ;;  %v3368_v22 = vld [vmem:[%s5015_s1 + $0x10] sm:$0x3] }
  0x33   : > { %v4503_v0 = vpack.c.bf16 %v1767_v60, %v1766_v59  ;;  %v4533_v24 = vand.u32 %v3368_v22, %v4250_v5  ;;  %v199_v25 = vld [vmem:[%s4269_s25 + $0xd8] sm:$0xff]  ;;  %v768_v52 = vld [vmem:[%s4269_s25 + $0x62] sm:$0xff]  ;;  %v773_v59 = vld [vmem:[%s4269_s25 + $0x8a] sm:$0xff] }
  0x34   : > { %v2093_v60 = vld [vmem:[%s4269_s25 + $0x12c] sm:$0xff]  ;;  %v780_v22 = vld [vmem:[%s4269_s25 + $0xc2] sm:$0xff] }
  0x36   : > { %3580 = vmatmul.mubr.msk.bf16.gmra.mrb[16].mxu1 %vm283_vm2, %v272_v15  ;;  %3732 = vmatmul.mubr.msk.bf16.gmra.mrb[16].mxu0 %vm283_vm2, %v1453_v16  ;;  %v1755_v15 = vld [vmem:[%s4269_s25 + $0xbc] sm:$0xff]  ;;  %v209_v16 = vpack.c.bf16 %v175_v9, %v174_v8  ;;  %v1769_v8 = vld [vmem:[%s4269_s25 + $0x12c] sm:$0x3f] }
  0x37   : > { %3583 = vmatprep.mubr.msk.bf16.mxu1 %vm283_vm2, %v273_v17  ;;  %3753 = vmatprep.mubr.msk.bf16.mxu0 %vm283_vm2, %v1770_v18  ;;  %v3273_v17 = vld [vmem:[%s5015_s1 + $0x6] sm:$0x3]  ;;  %v4442_v18 = vpack.c.bf16 %v1753_v11, %v1752_v10  ;;  %v4444_v20 = vpack.c.bf16 %v1755_v15, %v1754_v14  ;;  %v193_v10 = vld [vmem:[%s4269_s25 + $0xa8] sm:$0xff]  ;;  %v194_v14 = vld [vmem:[%s4269_s25 + $0xb0] sm:$0xff] }
  0x38   : > { %v4447_v21 = vand.u32 %v3273_v17, %v4250_v5  ;;  %v192_v9 = vld [vmem:[%s4269_s25 + $0xa0] sm:$0xff]  ;;  %v195_v15 = vld [vmem:[%s4269_s25 + $0xb8] sm:$0xff]  ;;  %v197_v17 = vld [vmem:[%s4269_s25 + $0xc8] sm:$0xff] }
  0x39   : > { %v218_v13 = vpack.c.bf16 %v193_v10, %v192_v9  ;;  %v200_v5 = vld [vmem:[%s4269_s25 + $0xe0] sm:$0xff]  ;;  %v777_v9 = vld [vmem:[%s4269_s25 + $0xaa] sm:$0xff] }
  0x3a   : > { %v2386_v10 = vld [vmem:[%s4269_s25 + $0x25] sm:$0xff] }
  0x3e   : > { %3584 = vmatmul.mubr.msk.bf16.gmra.mrb[20].mxu1 %vm283_vm2, %v274_v27  ;;  %3754 = vmatmul.mubr.msk.bf16.vlgmr.msra.gmra.mrb[0].mxu0 %vm283_vm2, %v4362_v30  ;;  %v181_v27 = vld [vmem:[%s4269_s25 + $0x48] sm:$0xff] }
  0x3f   : > { %3587 = vmatprep.mubr.msk.bf16.mxu1 %vm283_vm2, %v275_v31  ;;  %3790 = vmatpush3.bf16.msra.mxu0 %v4291_v29  ;;  %v277_v29 = vpack.c.bf16 %v256_v40, %v255_v39  ;;  %v1759_v31 = vld [vmem:[%s4269_s25 + $0xdc] sm:$0xff]  ;;  %v212_v37 = vpack.c.bf16 %v181_v27, %v180_v26  ;;  %v1760_v40 = vld [vmem:[%s4269_s25 + $0xe4] sm:$0xff] }
  0x40   : > { %3757 = vmatprep.mubr.msk.bf16.mxu0 %vm283_vm2, %v4364_v33  ;;  %3827 = vmatprep.subr.bf16.mxu0 %v4367_v34  ;;  %v4467_v38 = vpack.c.bf16 %v1759_v31, %v1758_v28  ;;  %v183_v39 = vld [vmem:[%s4269_s25 + $0x58] sm:$0xff]  ;;  %v4483_v48 = vpack.c.bf16 %v1761_v41, %v1760_v40  ;;  %v201_v26 = vld [vmem:[%s4269_s25 + $0xe8] sm:$0xff] }
  0x41   : > { %v222_v28 = vpack.c.bf16 %v201_v26, %v200_v5  ;;  %v205_v31 = vld [vmem:[%s4269_s25 + $0x108] sm:$0xff] }
  0x46   : > { %3588 = vmatmul.mubr.msk.bf16.gmra.mrb[24].mxu1 %vm283_vm2, %v276_v43  ;;  %3758 = vmatmul.mubr.msk.bf16.gmra.mrb[4].mxu0 %vm283_vm2, %v4385_v44  ;;  %v185_v43 = vld [vmem:[%s4269_s25 + $0x68] sm:$0xff] }
  0x47   : > { %3591 = vmatprep.mubr.msk.bf16.mxu1 %vm283_vm2, %v277_v29  ;;  %3761 = vmatprep.mubr.msk.bf16.mxu0 %vm283_vm2, %v4387_v45  ;;  %v1762_v29 = vld [vmem:[%s4269_s25 + $0xf4] sm:$0xff]  ;;  %v214_v49 = vpack.c.bf16 %v185_v43, %v184_v42  ;;  %v761_v43 = vld [vmem:[%s4269_s25 + $0x2a] sm:$0xff] }
  0x48   : > { %v4485_v50 = vpack.c.bf16 %v1763_v46, %v1762_v29  ;;  %v759_v42 = vld [vmem:[%s4269_s25 + $0x1a] sm:$0xff] }
  0x4e   : > { %3592 = vmatmul.mubr.msk.bf16.gmra.mrb[28].mxu1 %vm283_vm2, %v278_v54  ;;  %3762 = vmatmul.mubr.msk.bf16.gmra.mrb[8].mxu0 %vm283_vm2, %v4403_v55  ;;  %v1765_v54 = vld [vmem:[%s4269_s25 + $0x10c] sm:$0xff] }
  0x4f   : > { %3595 = vmatprep.mubr.msk.bf16.mxu1 %vm283_vm2, %v279_v56  ;;  %3765 = vmatprep.mubr.msk.bf16.mxu0 %vm283_vm2, %v4405_v57  ;;  %v188_v56 = vld [vmem:[%s4269_s25 + $0x80] sm:$0xff]  ;;  %v4501_v62 = vpack.c.bf16 %v1765_v54, %v1764_v53  ;;  %v769_v53 = vld [vmem:[%s4269_s25 + $0x6a] sm:$0xff] }
  0x50   : > { %v216_v63 = vpack.c.bf16 %v189_v58, %v188_v56  ;;  %v4613_v56 = vpack.c.bf16 %v769_v53, %v768_v52  ;;  %v772_v58 = vld [vmem:[%s4269_s25 + $0x82] sm:$0xff]  ;;  %v4713_v53 = vld [vmem:[%s4269_s25 + $0x112] sm:$0xff] }
  0x56   : > { %3596 = vmatmul.mubr.msk.bf16.gmra.mrb[32].mxu1 %vm283_vm2, %v280_v2  ;;  %3766 = vmatmul.mubr.msk.bf16.gmra.mrb[12].mxu0 %vm283_vm2, %v4421_v3  ;;  %v191_v2 = vld [vmem:[%s4269_s25 + $0x98] sm:$0xff] }
  0x57   : > { %3601 = vmatprep.mubr.msk.bf16.mxu1 %vm283_vm2, %v208_v4  ;;  %3769 = vmatprep.mubr.msk.bf16.mxu0 %vm283_vm2, %v4423_v6  ;;  %v4512_v4 = vld [vmem:[%s4269_s25 + $0x124] sm:$0xff]  ;;  %v217_v11 = vpack.c.bf16 %v191_v2, %v190_v1  ;;  %v775_v1 = vld [vmem:[%s4269_s25 + $0x9a] sm:$0xff] }
  0x58   : > { %v1787_v12 = vpack.c.bf16 %v1769_v8, %v4512_v4  ;;  %v2094_v2 = vld [vmem:[%s4269_s25 + $0x134] sm:$0xff]  ;;  %v2095_v8 = vld [vmem:[%s4269_s25 + $0x13c] sm:$0x3f] }
  0x5e   : > { %3602 = vmatmul.mubr.msk.bf16.vlgmr.msra.gmra.mrb[0].mxu1 %vm283_vm2, %v209_v16  ;;  %3770 = vmatmul.mubr.msk.bf16.gmra.mrb[16].mxu0 %vm283_vm2, %v4442_v18  ;;  %v196_v16 = vld [vmem:[%s4269_s25 + $0xc0] sm:$0xff] }
  0x5f   : > { %3605 = vmatprep.mubr.msk.bf16.mxu1 %vm283_vm2, %v210_v19  ;;  %3773 = vmatprep.mubr.msk.bf16.mxu0 %vm283_vm2, %v4444_v20  ;;  %v219_v19 = vpack.c.bf16 %v195_v15, %v194_v14  ;;  %v220_v23 = vpack.c.bf16 %v197_v17, %v196_v16  ;;  %v778_v15 = vld [vmem:[%s4269_s25 + $0xb2] sm:$0xff]  ;;  %v779_v16 = vld [vmem:[%s4269_s25 + $0xba] sm:$0xff] }
  0x60   : > { %3638 = vmatpush3.bf16.msra.mxu1 %v4296_v32  ;;  %v182_v32 = vld [vmem:[%s4269_s25 + $0x50] sm:$0xff]  ;;  %v4666_v5 = vpack.c.bf16 %v779_v16, %v778_v15 }
  0x61   : > { %3675 = vmatprep.subr.bf16.mxu1 %v4447_v21  ;;  %v213_v47 = vpack.c.bf16 %v183_v39, %v182_v32  ;;  %v207_v32 = vld [vmem:[%s4269_s25 + $0x118] sm:$0x3f]  ;;  %v757_v39 = vld [vmem:[%s4269_s25 + $0xa] sm:$0xff] }
  0x62   : > { %v2388_v17 = vld [vmem:[%s4269_s25 + $0x35] sm:$0xff]  ;;  %v2411_v15 = vld [vmem:[%s4269_s25 + $0xed] sm:$0xff] }
  0x66   : > { %3606 = vmatmul.mubr.msk.bf16.gmra.mrb[4].mxu1 %vm283_vm2, %v211_v35  ;;  %3774 = vmatmul.mubr.msk.bf16.gmra.mrb[20].mxu0 %vm283_vm2, %v4465_v36 }
  0x67   : > { %3609 = vmatprep.mubr.msk.bf16.mxu1 %vm283_vm2, %v212_v37  ;;  %3777 = vmatprep.mubr.msk.bf16.mxu0 %vm283_vm2, %v4467_v38 }
  0x6e   : > { %3610 = vmatmul.mubr.msk.bf16.gmra.mrb[8].mxu1 %vm283_vm2, %v213_v47  ;;  %3778 = vmatmul.mubr.msk.bf16.gmra.mrb[24].mxu0 %vm283_vm2, %v4483_v48  ;;  %v764_v47 = vld [vmem:[%s4269_s25 + $0x42] sm:$0xff] }
  0x6f   : > { %3613 = vmatprep.mubr.msk.bf16.mxu1 %vm283_vm2, %v214_v49  ;;  %3781 = vmatprep.mubr.msk.bf16.mxu0 %vm283_vm2, %v4485_v50  ;;  %v765_v49 = vld [vmem:[%s4269_s25 + $0x4a] sm:$0xff] }
  0x76   : > { %3614 = vmatmul.mubr.msk.bf16.gmra.mrb[12].mxu1 %vm283_vm2, %v215_v61  ;;  %3782 = vmatmul.mubr.msk.bf16.gmra.mrb[28].mxu0 %vm283_vm2, %v4501_v62 }
  0x77   : > { %3617 = vmatprep.mubr.msk.bf16.mxu1 %vm283_vm2, %v216_v63  ;;  %3785 = vmatprep.mubr.msk.bf16.mxu0 %vm283_vm2, %v4503_v0  ;;  %v2112_v63 = vpack.c.bf16 %v2093_v60, %v4512_v4  ;;  %v776_v4 = vld [vmem:[%s4269_s25 + $0xa2] sm:$0xff]  ;;  %v2403_v60 = vld [vmem:[%s4269_s25 + $0xad] sm:$0xff] }
  0x7e   : > { %3618 = vmatmul.mubr.msk.bf16.gmra.mrb[16].mxu1 %vm283_vm2, %v217_v11  ;;  %3786 = vmatmul.mubr.msk.bf16.gmra.mrb[32].mxu0 %vm283_vm2, %v1787_v12  ;;  %v2113_v12 = vpack.c.bf16 %v2095_v8, %v2094_v2  ;;  %v2404_v2 = vld [vmem:[%s4269_s25 + $0xb5] sm:$0xff]  ;;  %v2405_v8 = vld [vmem:[%s4269_s25 + $0xbd] sm:$0xff] }
  0x7f   : > { %3621 = vmatprep.mubr.msk.bf16.mxu1 %vm283_vm2, %v218_v13  ;;  %3791 = vmatprep.mubr.msk.bf16.mxu0 %vm283_vm2, %v4362_v30  ;;  %v198_v30 = vld [vmem:[%s4269_s25 + $0xd0] sm:$0xff]  ;;  %v4650_v13 = vpack.c.bf16 %v777_v9, %v776_v4  ;;  %v2406_v4 = vld [vmem:[%s4269_s25 + $0xc5] sm:$0xff] }
  0x80   : > { %v221_v27 = vpack.c.bf16 %v199_v25, %v198_v30  ;;  %v2390_v30 = vld [vmem:[%s4269_s25 + $0x45] sm:$0xff]  ;;  %v2391_v25 = vld [vmem:[%s4269_s25 + $0x4d] sm:$0xff] }
  0x81   : > { %v2407_v9 = vld [vmem:[%s4269_s25 + $0xcd] sm:$0xff] }
  0x86   : > { %3622 = vmatmul.mubr.msk.bf16.gmra.mrb[20].mxu1 %vm283_vm2, %v219_v19  ;;  %3792 = vmatmul.mubr.msk.bf16.vlgmr.msra.gmra.mrb[0].mxu0 %vm283_vm2, %v4364_v33  ;;  %v202_v33 = vld [vmem:[%s4269_s25 + $0xf0] sm:$0xff]  ;;  %v2389_v19 = vld [vmem:[%s4269_s25 + $0x3d] sm:$0xff] }
  0x87   : > { %3625 = vmatprep.mubr.msk.bf16.mxu1 %vm283_vm2, %v220_v23  ;;  %3828 = vmatpush3.bf16.msra.mxu0 %v4367_v34  ;;  %v203_v34 = vld [vmem:[%s4269_s25 + $0xf8] sm:$0xff]  ;;  %v781_v23 = vld [vmem:[%s4269_s25 + $0xca] sm:$0xff]  ;;  %v2423_v26 = vpack.c.bf16 %v2389_v19, %v2388_v17 }
  0x88   : > { %3795 = vmatprep.mubr.msk.bf16.mxu0 %vm283_vm2, %v4385_v44  ;;  %3865 = vmatprep.subr.bf16.mxu0 %v4533_v24  ;;  %v204_v44 = vld [vmem:[%s4269_s25 + $0x100] sm:$0xff]  ;;  %v223_v35 = vpack.c.bf16 %v203_v34, %v202_v33  ;;  %v782_v33 = vld [vmem:[%s4269_s25 + $0xd2] sm:$0xff] }
  0x89   : > { %v224_v37 = vpack.c.bf16 %v205_v31, %v204_v44  ;;  %v783_v34 = vld [vmem:[%s4269_s25 + $0xda] sm:$0xff]  ;;  %v2415_v19 = vld [vmem:[%s4269_s25 + $0x10d] sm:$0xff] }
  0x8a   : > { %v2392_v44 = vld [vmem:[%s4269_s25 + $0x55] sm:$0xff]  ;;  %v2393_v31 = vld [vmem:[%s4269_s25 + $0x5d] sm:$0xff] }
  0x8e   : > { %3626 = vmatmul.mubr.msk.bf16.gmra.mrb[24].mxu1 %vm283_vm2, %v221_v27  ;;  %3796 = vmatmul.mubr.msk.bf16.gmra.mrb[4].mxu0 %vm283_vm2, %v4387_v45  ;;  %v206_v45 = vld [vmem:[%s4269_s25 + $0x110] sm:$0xff]  ;;  %v4668_v27 = vpack.c.bf16 %v781_v23, %v780_v22 }
  0x8f   : > { %3629 = vmatprep.mubr.msk.bf16.mxu1 %vm283_vm2, %v222_v28  ;;  %3799 = vmatprep.mubr.msk.bf16.mxu0 %vm283_vm2, %v4403_v55  ;;  %v756_v55 = vld [vmem:[%s4269_s25 + $0x2] sm:$0xff]  ;;  %v225_v40 = vpack.c.bf16 %v207_v32, %v206_v45  ;;  %v2424_v28 = vpack.c.bf16 %v2391_v25, %v2390_v30  ;;  %v2395_v32 = vld [vmem:[%s4269_s25 + $0x6d] sm:$0xff] }
  0x90   : > { %v792_v41 = vpack.c.bf16 %v757_v39, %v756_v55  ;;  %v2394_v45 = vld [vmem:[%s4269_s25 + $0x65] sm:$0xff]  ;;  %v4685_v55 = vpack.c.bf16 %v783_v34, %v782_v33  ;;  %v2425_v39 = vpack.c.bf16 %v2393_v31, %v2392_v44  ;;  %v2419_v25 = vld [vmem:[%s4269_s25 + $0x12d] sm:$0xff] }
  0x91   : > { %v2418_v30 = vld [vmem:[%s4269_s25 + $0x125] sm:$0xff]  ;;  %v2713_v34 = vld [vmem:[%s4269_s25 + $0x2e] sm:$0xff] }
  0x92   : > { %v2712_v33 = vld [vmem:[%s4269_s25 + $0x26] sm:$0xff] }
  0x93   : > { %v2748_v31 = vpack.c.bf16 %v2713_v34, %v2712_v33  ;;  %v1440_v33 = vld [vmem:[%s4269_s25 + $0x113] sm:$0xff]  ;;  %v1441_v34 = vld [vmem:[%s4269_s25 + $0x11b] sm:$0xff] }
  0x96   : > { %3630 = vmatmul.mubr.msk.bf16.gmra.mrb[28].mxu1 %vm283_vm2, %v223_v35  ;;  %3800 = vmatmul.mubr.msk.bf16.gmra.mrb[8].mxu0 %vm283_vm2, %v4405_v57  ;;  %v758_v57 = vld [vmem:[%s4269_s25 + $0x12] sm:$0xff]  ;;  %v784_v35 = vld [vmem:[%s4269_s25 + $0xe2] sm:$0xff] }
  0x97   : > { %3633 = vmatprep.mubr.msk.bf16.mxu1 %vm283_vm2, %v224_v37  ;;  %3803 = vmatprep.mubr.msk.bf16.mxu0 %vm283_vm2, %v4421_v3  ;;  %v760_v3 = vld [vmem:[%s4269_s25 + $0x22] sm:$0xff]  ;;  %v4577_v29 = vpack.c.bf16 %v759_v42, %v758_v57  ;;  %v785_v37 = vld [vmem:[%s4269_s25 + $0xea] sm:$0xff]  ;;  %v787_v57 = vld [vmem:[%s4269_s25 + $0xfa] sm:$0xff] }
  0x98   : > { %v4579_v46 = vpack.c.bf16 %v761_v43, %v760_v3  ;;  %v2396_v42 = vld [vmem:[%s4269_s25 + $0x75] sm:$0xff]  ;;  %v2397_v3 = vld [vmem:[%s4269_s25 + $0x7d] sm:$0xff] }
  0x99   : > { %v788_v43 = vld [vmem:[%s4269_s25 + $0x102] sm:$0xff] }
  0x9e   : > { %3634 = vmatmul.mubr.msk.bf16.gmra.mrb[32].mxu1 %vm283_vm2, %v225_v40  ;;  %3804 = vmatmul.mubr.msk.bf16.gmra.mrb[12].mxu0 %vm283_vm2, %v4423_v6  ;;  %v762_v6 = vld [vmem:[%s4269_s25 + $0x32] sm:$0xff]  ;;  %v4687_v40 = vpack.c.bf16 %v785_v37, %v784_v35  ;;  %v2716_v35 = vld [vmem:[%s4269_s25 + $0x46] sm:$0xff] }
  0x9f   : > { %3639 = vmatprep.mubr.msk.bf16.mxu1 %vm283_vm2, %v792_v41  ;;  %3807 = vmatprep.mubr.msk.bf16.mxu0 %vm283_vm2, %v4442_v18  ;;  %v763_v18 = vld [vmem:[%s4269_s25 + $0x3a] sm:$0xff]  ;;  %v2426_v41 = vpack.c.bf16 %v2395_v32, %v2394_v45  ;;  %v2717_v37 = vld [vmem:[%s4269_s25 + $0x4e] sm:$0xff] }
  0xa0   : > { %v4595_v51 = vpack.c.bf16 %v763_v18, %v762_v6  ;;  %v789_v6 = vld [vmem:[%s4269_s25 + $0x10a] sm:$0xff]  ;;  %v2750_v32 = vpack.c.bf16 %v2717_v37, %v2716_v35  ;;  %v1460_v35 = vpack.c.bf16 %v1441_v34, %v1440_v33 }
  0xa1   : > { %v2398_v18 = vld [vmem:[%s4269_s25 + $0x85] sm:$0xff] }
  0xa6   : > { %3640 = vmatmul.mubr.msk.bf16.vlgmr.msra.gmra.mrb[0].mxu1 %vm283_vm2, %v4577_v29  ;;  %3808 = vmatmul.mubr.msk.bf16.gmra.mrb[16].mxu0 %vm283_vm2, %v4444_v20  ;;  %v4597_v20 = vpack.c.bf16 %v765_v49, %v764_v47  ;;  %v2399_v47 = vld [vmem:[%s4269_s25 + $0x8d] sm:$0xff] }
  0xa7   : > { %3643 = vmatprep.mubr.msk.bf16.mxu1 %vm283_vm2, %v4579_v46  ;;  %3811 = vmatprep.mubr.msk.bf16.mxu0 %vm283_vm2, %v4465_v36  ;;  %v767_v36 = vld [vmem:[%s4269_s25 + $0x5a] sm:$0xff]  ;;  %v2428_v52 = vpack.c.bf16 %v2399_v47, %v2398_v18  ;;  %v1116_v47 = vld [vmem:[%s4269_s25 + $0x122] sm:$0xff] }
  0xa8   : > { %3676 = vmatpush3.bf16.msra.mxu1 %v4447_v21  ;;  %v766_v21 = vld [vmem:[%s4269_s25 + $0x52] sm:$0xff] }
  0xa9   : > { %3903 = vmatprep.subr.bf16.mxu1 %v4258_v7  ;;  %v4611_v54 = vpack.c.bf16 %v767_v36, %v766_v21  ;;  %v2427_v21 = vpack.c.bf16 %v2397_v3, %v2396_v42  ;;  %v4705_v36 = vpack.c.bf16 %v789_v6, %v788_v43  ;;  %v1115_v42 = vld [vmem:[%s4269_s25 + $0x11a] sm:$0xff]  ;;  %v2724_v3 = vld [vmem:[%s4269_s25 + $0x86] sm:$0xff]  ;;  %v2725_v43 = vld [vmem:[%s4269_s25 + $0x8e] sm:$0xff] }
  0xaa   : > { %v1134_v6 = vpack.c.bf16 %v1115_v42, %v4713_v53  ;;  %v2754_v18 = vpack.c.bf16 %v2725_v43, %v2724_v3  ;;  %v2747_v42 = vld [vmem:[%s4269_s25 + $0x13e] sm:$0x3f] }
  0xae   : > { %3644 = vmatmul.mubr.msk.bf16.gmra.mrb[4].mxu1 %vm283_vm2, %v4595_v51  ;;  %3812 = vmatmul.mubr.msk.bf16.gmra.mrb[20].mxu0 %vm283_vm2, %v4467_v38  ;;  %v770_v38 = vld [vmem:[%s4269_s25 + $0x72] sm:$0xff] }
  0xaf   : > { %3647 = vmatprep.mubr.msk.bf16.mxu1 %vm283_vm2, %v4597_v20  ;;  %3815 = vmatprep.mubr.msk.bf16.mxu0 %vm283_vm2, %v4483_v48  ;;  %v771_v48 = vld [vmem:[%s4269_s25 + $0x7a] sm:$0xff] }
  0xb0   : > { %v4628_v61 = vpack.c.bf16 %v771_v48, %v770_v38  ;;  %v791_v38 = vld [vmem:[%s4269_s25 + $0x11a] sm:$0x3f] }
  0xb1   : > { %v2400_v48 = vld [vmem:[%s4269_s25 + $0x95] sm:$0xff] }
  0xb6   : > { %3648 = vmatmul.mubr.msk.bf16.gmra.mrb[8].mxu1 %vm283_vm2, %v4611_v54  ;;  %3816 = vmatmul.mubr.msk.bf16.gmra.mrb[24].mxu0 %vm283_vm2, %v4485_v50  ;;  %v4630_v50 = vpack.c.bf16 %v773_v59, %v772_v58  ;;  %v2401_v58 = vld [vmem:[%s4269_s25 + $0x9d] sm:$0xff]  ;;  %v2402_v59 = vld [vmem:[%s4269_s25 + $0xa5] sm:$0xff] }
  0xb7   : > { %3651 = vmatprep.mubr.msk.bf16.mxu1 %vm283_vm2, %v4613_v56  ;;  %3819 = vmatprep.mubr.msk.bf16.mxu0 %vm283_vm2, %v4501_v62  ;;  %v774_v62 = vld [vmem:[%s4269_s25 + $0x92] sm:$0xff] }
  0xb8   : > { %v4648_v11 = vpack.c.bf16 %v775_v1, %v774_v62  ;;  %v2429_v62 = vpack.c.bf16 %v2401_v58, %v2400_v48  ;;  %v2430_v1 = vpack.c.bf16 %v2403_v60, %v2402_v59  ;;  %v2728_v48 = vld [vmem:[%s4269_s25 + $0xa6] sm:$0xff] }
  0xbe   : > { %3652 = vmatmul.mubr.msk.bf16.gmra.mrb[12].mxu1 %vm283_vm2, %v4628_v61  ;;  %3820 = vmatmul.mubr.msk.bf16.gmra.mrb[28].mxu0 %vm283_vm2, %v4503_v0  ;;  %v2387_v0 = vld [vmem:[%s4269_s25 + $0x2d] sm:$0xff] }
  0xbf   : > { %3655 = vmatprep.mubr.msk.bf16.mxu1 %vm283_vm2, %v4630_v50  ;;  %3823 = vmatprep.mubr.msk.bf16.mxu0 %vm283_vm2, %v2112_v63  ;;  %v2422_v14 = vpack.c.bf16 %v2387_v0, %v2386_v10  ;;  %v809_v63 = vpack.c.bf16 %v791_v38, %v4713_v53  ;;  %v2431_v10 = vpack.c.bf16 %v2405_v8, %v2404_v2  ;;  %v1428_v38 = vld [vmem:[%s4269_s25 + $0xb3] sm:$0xff]  ;;  %v1429_v53 = vld [vmem:[%s4269_s25 + $0xbb] sm:$0xff] }
  0xc0   : > { %v2432_v0 = vpack.c.bf16 %v2407_v9, %v2406_v4  ;;  %v1454_v60 = vpack.c.bf16 %v1429_v53, %v1428_v38  ;;  %v2730_v2 = vld [vmem:[%s4269_s25 + $0xb6] sm:$0xff]  ;;  %v2731_v8 = vld [vmem:[%s4269_s25 + $0xbe] sm:$0xff] }
  0xc1   : > { %v1432_v4 = vld [vmem:[%s4269_s25 + $0xd3] sm:$0xff]  ;;  %v1433_v9 = vld [vmem:[%s4269_s25 + $0xdb] sm:$0xff] }
  0xc6   : > { %3656 = vmatmul.mubr.msk.bf16.gmra.mrb[16].mxu1 %vm283_vm2, %v4648_v11  ;;  %3824 = vmatmul.mubr.msk.bf16.gmra.mrb[32].mxu0 %vm283_vm2, %v2113_v12  ;;  %v2409_v12 = vld [vmem:[%s4269_s25 + $0xdd] sm:$0xff] }
  0xc7   : > { %3659 = vmatprep.mubr.msk.bf16.mxu1 %vm283_vm2, %v4650_v13  ;;  %3829 = vmatprep.mubr.msk.bf16.mxu0 %vm283_vm2, %v2422_v14  ;;  %v2410_v14 = vld [vmem:[%s4269_s25 + $0xe5] sm:$0xff] }
  0xc8   : > { %v2434_v17 = vpack.c.bf16 %v2411_v15, %v2410_v14  ;;  %v1456_v14 = vpack.c.bf16 %v1433_v9, %v1432_v4  ;;  %v4889_v9 = vld [vmem:[%s5016_s2] ss:$0 sm:$0xff] }
  0xce   : > { %3660 = vmatmul.mubr.msk.bf16.gmra.mrb[20].mxu1 %vm283_vm2, %v4666_v5  ;;  %3830 = vmatmul.mubr.msk.bf16.vlgmr.msra.gmra.mrb[0].mxu0 %vm283_vm2, %v2423_v26 }
  0xcf   : > { %3663 = vmatprep.mubr.msk.bf16.mxu1 %vm283_vm2, %v4668_v27  ;;  %3866 = vmatpush3.bf16.msra.mxu0 %v4533_v24  ;;  %v786_v24 = vld [vmem:[%s4269_s25 + $0xf2] sm:$0xff] }
  0xd0   : > { %3833 = vmatprep.mubr.msk.bf16.mxu0 %vm283_vm2, %v2424_v28  ;;  %v4703_v49 = vpack.c.bf16 %v787_v57, %v786_v24  ;;  %v2438_v28 = vpack.c.bf16 %v2419_v25, %v2418_v30 }
  0xd6   : > { %3664 = vmatmul.mubr.msk.bf16.gmra.mrb[24].mxu1 %vm283_vm2, %v4685_v55  ;;  %3834 = vmatmul.mubr.msk.bf16.gmra.mrb[4].mxu0 %vm283_vm2, %v2425_v39  ;;  %v2720_v39 = vld [vmem:[%s4269_s25 + $0x66] sm:$0xff] }
  0xd7   : > { %3667 = vmatprep.mubr.msk.bf16.mxu1 %vm283_vm2, %v4687_v40  ;;  %3837 = vmatprep.mubr.msk.bf16.mxu0 %vm283_vm2, %v2426_v41  ;;  %v2721_v41 = vld [vmem:[%s4269_s25 + $0x6e] sm:$0xff] }
  0xd8   : > { %v2752_v57 = vpack.c.bf16 %v2721_v41, %v2720_v39  ;;  %v2744_v39 = vld [vmem:[%s4269_s25 + $0x126] sm:$0xff]  ;;  %v2745_v41 = vld [vmem:[%s4269_s25 + $0x12e] sm:$0xff] }
  0xde   : > { %3668 = vmatmul.mubr.msk.bf16.gmra.mrb[28].mxu1 %vm283_vm2, %v4703_v49  ;;  %3838 = vmatmul.mubr.msk.bf16.gmra.mrb[8].mxu0 %vm283_vm2, %v2427_v21  ;;  %v2726_v21 = vld [vmem:[%s4269_s25 + $0x96] sm:$0xff] }
  0xdf   : > { %3671 = vmatprep.mubr.msk.bf16.mxu1 %vm283_vm2, %v4705_v36  ;;  %3841 = vmatprep.mubr.msk.bf16.mxu0 %vm283_vm2, %v2428_v52  ;;  %v2727_v52 = vld [vmem:[%s4269_s25 + $0x9e] sm:$0xff] }
  0xe0   : > { %v2755_v59 = vpack.c.bf16 %v2727_v52, %v2726_v21 }
  0xe6   : > { %3672 = vmatmul.mubr.msk.bf16.gmra.mrb[32].mxu1 %vm283_vm2, %v809_v63  ;;  %3842 = vmatmul.mubr.msk.bf16.gmra.mrb[12].mxu0 %vm283_vm2, %v2429_v62  ;;  %v1430_v62 = vld [vmem:[%s4269_s25 + $0xc3] sm:$0xff] }
  0xe7   : > { %3677 = vmatprep.mubr.msk.bf16.mxu1 %vm283_vm2, %v4577_v29  ;;  %3845 = vmatprep.mubr.msk.bf16.mxu0 %vm283_vm2, %v2430_v1  ;;  %v2408_v29 = vld [vmem:[%s4269_s25 + $0xd5] sm:$0xff]  ;;  %v1431_v1 = vld [vmem:[%s4269_s25 + $0xcb] sm:$0xff] }
  0xe8   : > { %v2433_v16 = vpack.c.bf16 %v2409_v12, %v2408_v29  ;;  %v1455_v29 = vpack.c.bf16 %v1431_v1, %v1430_v62  ;;  %v2757_v12 = vpack.c.bf16 %v2731_v8, %v2730_v2 }
  0xee   : > { %3678 = vmatmul.mubr.msk.bf16.vlgmr.msra.gmra.mrb[0].mxu1 %vm283_vm2, %v4579_v46  ;;  %3846 = vmatmul.mubr.msk.bf16.gmra.mrb[16].mxu0 %vm283_vm2, %v2431_v10  ;;  %v2413_v46 = vld [vmem:[%s4269_s25 + $0xfd] sm:$0xff]  ;;  %v2732_v10 = vld [vmem:[%s4269_s25 + $0xc6] sm:$0xff] }
  0xef   : > { %3681 = vmatprep.mubr.msk.bf16.mxu1 %vm283_vm2, %v4595_v51  ;;  %3849 = vmatprep.mubr.msk.bf16.mxu0 %vm283_vm2, %v2432_v0  ;;  %v2414_v51 = vld [vmem:[%s4269_s25 + $0x105] sm:$0xff]  ;;  %v2733_v0 = vld [vmem:[%s4269_s25 + $0xce] sm:$0xff] }
  0xf0   : > { %3904 = vmatpush3.bf16.msra.mxu1 %v4258_v7  ;;  %v2412_v7 = vld [vmem:[%s4269_s25 + $0xf5] sm:$0xff]  ;;  %v2436_v23 = vpack.c.bf16 %v2415_v19, %v2414_v51  ;;  %v2758_v15 = vpack.c.bf16 %v2733_v0, %v2732_v10 }
  0xf1   : > { %v2435_v22 = vpack.c.bf16 %v2413_v46, %v2412_v7  ;;  %v2734_v7 = vld [vmem:[%s4269_s25 + $0xd6] sm:$0xff]  ;;  %v2735_v46 = vld [vmem:[%s4269_s25 + $0xde] sm:$0xff] }
  0xf2   : > { %v1436_v51 = vld [vmem:[%s4269_s25 + $0xf3] sm:$0xff]  ;;  %v1437_v19 = vld [vmem:[%s4269_s25 + $0xfb] sm:$0xff] }
  0xf3   : > { %v1458_v30 = vpack.c.bf16 %v1437_v19, %v1436_v51 }
  0xf6   : > { %3682 = vmatmul.mubr.msk.bf16.gmra.mrb[4].mxu1 %vm283_vm2, %v4597_v20  ;;  %3850 = vmatmul.mubr.msk.bf16.gmra.mrb[20].mxu0 %vm283_vm2, %v2433_v16  ;;  %v2416_v20 = vld [vmem:[%s4269_s25 + $0x115] sm:$0xff]  ;;  %v1434_v16 = vld [vmem:[%s4269_s25 + $0xe3] sm:$0xff] }
  0xf7   : > { %3685 = vmatprep.mubr.msk.bf16.mxu1 %vm283_vm2, %v4611_v54  ;;  %3853 = vmatprep.mubr.msk.bf16.mxu0 %vm283_vm2, %v2434_v17  ;;  %v2417_v54 = vld [vmem:[%s4269_s25 + $0x11d] sm:$0xff]  ;;  %v1435_v17 = vld [vmem:[%s4269_s25 + $0xeb] sm:$0xff] }
  0xf8   : > { %v2437_v26 = vpack.c.bf16 %v2417_v54, %v2416_v20  ;;  %v1457_v20 = vpack.c.bf16 %v1435_v17, %v1434_v16  ;;  %v2759_v54 = vpack.c.bf16 %v2735_v46, %v2734_v7 }
  0xfe   : > { %3686 = vmatmul.mubr.msk.bf16.gmra.mrb[8].mxu1 %vm283_vm2, %v4613_v56  ;;  %3854 = vmatmul.mubr.msk.bf16.gmra.mrb[24].mxu0 %vm283_vm2, %v2435_v22  ;;  %v2420_v56 = vld [vmem:[%s4269_s25 + $0x135] sm:$0xff]  ;;  %v2736_v22 = vld [vmem:[%s4269_s25 + $0xe6] sm:$0xff] }
  0xff   : > { %3689 = vmatprep.mubr.msk.bf16.mxu1 %vm283_vm2, %v4628_v61  ;;  %3857 = vmatprep.mubr.msk.bf16.mxu0 %vm283_vm2, %v2436_v23  ;;  %v2421_v61 = vld [vmem:[%s4269_s25 + $0x13d] sm:$0x3f]  ;;  %v2737_v23 = vld [vmem:[%s4269_s25 + $0xee] sm:$0xff] }
 0x100   : > { %v2439_v44 = vpack.c.bf16 %v2421_v61, %v2420_v56  ;;  %v2760_v25 = vpack.c.bf16 %v2737_v23, %v2736_v22  ;;  %v2738_v56 = vld [vmem:[%s4269_s25 + $0xf6] sm:$0xff]  ;;  %v2739_v61 = vld [vmem:[%s4269_s25 + $0xfe] sm:$0xff] }
 0x106   : > { %3690 = vmatmul.mubr.msk.bf16.gmra.mrb[12].mxu1 %vm283_vm2, %v4630_v50  ;;  %3858 = vmatmul.mubr.msk.bf16.gmra.mrb[28].mxu0 %vm283_vm2, %v2437_v26  ;;  %v2714_v50 = vld [vmem:[%s4269_s25 + $0x36] sm:$0xff]  ;;  %v1438_v26 = vld [vmem:[%s4269_s25 + $0x103] sm:$0xff] }
 0x107   : > { %3693 = vmatprep.mubr.msk.bf16.mxu1 %vm283_vm2, %v4648_v11  ;;  %3861 = vmatprep.mubr.msk.bf16.mxu0 %vm283_vm2, %v2438_v28  ;;  %v2715_v11 = vld [vmem:[%s4269_s25 + $0x3e] sm:$0xff]  ;;  %v1439_v28 = vld [vmem:[%s4269_s25 + $0x10b] sm:$0xff] }
 0x108   : > { %v2749_v45 = vpack.c.bf16 %v2715_v11, %v2714_v50  ;;  %v1459_v50 = vpack.c.bf16 %v1439_v28, %v1438_v26  ;;  %v2761_v11 = vpack.c.bf16 %v2739_v61, %v2738_v56 }
 0x10e   : > { %3694 = vmatmul.mubr.msk.bf16.gmra.mrb[16].mxu1 %vm283_vm2, %v4650_v13  ;;  %3862 = vmatmul.mubr.msk.bf16.gmra.mrb[32].mxu0 %vm283_vm2, %v2439_v44  ;;  %v2718_v13 = vld [vmem:[%s4269_s25 + $0x56] sm:$0xff]  ;;  %v2740_v44 = vld [vmem:[%s4269_s25 + $0x106] sm:$0xff] }
 0x10f   : > { %3697 = vmatprep.mubr.msk.bf16.mxu1 %vm283_vm2, %v4666_v5  ;;  %3867 = vmatprep.mubr.msk.bf16.mxu0 %vm283_vm2, %v2748_v31  ;;  %v2719_v5 = vld [vmem:[%s4269_s25 + $0x5e] sm:$0xff]  ;;  %v2741_v31 = vld [vmem:[%s4269_s25 + $0x10e] sm:$0xff] }
 0x110   : > { %v2751_v24 = vpack.c.bf16 %v2719_v5, %v2718_v13  ;;  %v2762_v37 = vpack.c.bf16 %v2741_v31, %v2740_v44  ;;  %v2742_v13 = vld [vmem:[%s4269_s25 + $0x116] sm:$0xff]  ;;  %v2743_v5 = vld [vmem:[%s4269_s25 + $0x11e] sm:$0xff] }
 0x116   : > { %3698 = vmatmul.mubr.msk.bf16.gmra.mrb[20].mxu1 %vm283_vm2, %v4668_v27  ;;  %3868 = vmatmul.mubr.msk.bf16.vlgmr.msra.gmra.mrb[0].mxu0 %vm283_vm2, %v2749_v45  ;;  %v2722_v27 = vld [vmem:[%s4269_s25 + $0x76] sm:$0xff]  ;;  %v1442_v45 = vld [vmem:[%s4269_s25 + $0x123] sm:$0xff] }
 0x117   : > { %3701 = vmatprep.mubr.msk.bf16.mxu1 %vm283_vm2, %v4685_v55  ;;  %3871 = vmatprep.mubr.msk.bf16.mxu0 %vm283_vm2, %v2750_v32  ;;  %v2723_v55 = vld [vmem:[%s4269_s25 + $0x7e] sm:$0xff]  ;;  %v1443_v32 = vld [vmem:[%s4269_s25 + $0x12b] sm:$0x3f] }
 0x11e   : > { %3702 = vmatmul.mubr.msk.bf16.gmra.mrb[24].mxu1 %vm283_vm2, %v4687_v40  ;;  %3872 = vmatmul.mubr.msk.bf16.gmra.mrb[4].mxu0 %vm283_vm2, %v2751_v24  ;;  %v2753_v40 = vpack.c.bf16 %v2723_v55, %v2722_v27  ;;  %v1461_v24 = vpack.c.bf16 %v1443_v32, %v1442_v45  ;;  %v2764_v27 = vpack.c.bf16 %v2745_v41, %v2744_v39  ;;  %v2746_v55 = vld [vmem:[%s4269_s25 + $0x136] sm:$0xff] }
 0x11f   : > { %3705 = vmatprep.mubr.msk.bf16.mxu1 %vm283_vm2, %v4703_v49  ;;  %3875 = vmatprep.mubr.msk.bf16.mxu0 %vm283_vm2, %v2752_v57  ;;  %v1117_v49 = vld [vmem:[%s4269_s25 + $0x12a] sm:$0x3f]  ;;  %v2763_v57 = vpack.c.bf16 %v2743_v5, %v2742_v13  ;;  %v2765_v3 = vpack.c.bf16 %v2747_v42, %v2746_v55 }
 0x120   : > { %v1135_v58 = vpack.c.bf16 %v1117_v49, %v1116_v47 }
 0x126   : > { %3706 = vmatmul.mubr.msk.bf16.gmra.mrb[28].mxu1 %vm283_vm2, %v4705_v36  ;;  %3876 = vmatmul.mubr.msk.bf16.gmra.mrb[8].mxu0 %vm283_vm2, %v2753_v40  ;;  %v2729_v36 = vld [vmem:[%s4269_s25 + $0xae] sm:$0xff] }
 0x127   : > { %3709 = vmatprep.mubr.msk.bf16.mxu1 %vm283_vm2, %v1134_v6  ;;  %3879 = vmatprep.mubr.msk.bf16.mxu0 %vm283_vm2, %v2754_v18  ;;  %v2756_v63 = vpack.c.bf16 %v2729_v36, %v2728_v48 }
 0x12e   : > { %3710 = vmatmul.mubr.msk.bf16.gmra.mrb[32].mxu1 %vm283_vm2, %v1135_v58  ;;  %3880 = vmatmul.mubr.msk.bf16.gmra.mrb[12].mxu0 %vm283_vm2, %v2755_v59 }
 0x12f   : > { %3735 = vmatprep.mubr.msk.bf16.mxu1 %vm283_vm2, %v1454_v60  ;;  %3883 = vmatprep.mubr.msk.bf16.mxu0 %vm283_vm2, %v2756_v63 }
 0x136   : > { %3736 = vmatmul.mubr.msk.bf16.vlgmr.msra.gmra.mrb[20].mxu1 %vm283_vm2, %v1455_v29  ;;  %3884 = vmatmul.mubr.msk.bf16.gmra.mrb[16].mxu0 %vm283_vm2, %v2757_v12 }
 0x137   : > { %3739 = vmatprep.mubr.msk.bf16.mxu1 %vm283_vm2, %v1456_v14  ;;  %3887 = vmatprep.mubr.msk.bf16.mxu0 %vm283_vm2, %v2758_v15 }
 0x13e   : > { %3740 = vmatmul.mubr.msk.bf16.gmra.mrb[24].mxu1 %vm283_vm2, %v1457_v20  ;;  %3888 = vmatmul.mubr.msk.bf16.gmra.mrb[20].mxu0 %vm283_vm2, %v2759_v54 }
 0x13f   : > { %3743 = vmatprep.mubr.msk.bf16.mxu1 %vm283_vm2, %v1458_v30  ;;  %3891 = vmatprep.mubr.msk.bf16.mxu0 %vm283_vm2, %v2760_v25 }
 0x146   : > { %3744 = vmatmul.mubr.msk.bf16.gmra.mrb[28].mxu1 %vm283_vm2, %v1459_v50  ;;  %3892 = vmatmul.mubr.msk.bf16.gmra.mrb[24].mxu0 %vm283_vm2, %v2761_v11 }
 0x147   : > { %3747 = vmatprep.mubr.msk.bf16.mxu1 %vm283_vm2, %v1460_v35  ;;  %3895 = vmatprep.mubr.msk.bf16.mxu0 %vm283_vm2, %v2762_v37 }
 0x14e   : > { %3748 = vmatmul.mubr.msk.bf16.gmra.mrb[32].mxu1 %vm283_vm2, %v1461_v24  ;;  %3896 = vmatmul.mubr.msk.bf16.gmra.mrb[28].mxu0 %vm283_vm2, %v2763_v57 }
 0x14f   : > { %3899 = vmatprep.mubr.msk.bf16.mxu0 %vm283_vm2, %v2764_v27 }
 0x156   : > { %3900 = vmatmul.mubr.msk.bf16.gmra.mrb[32].mxu0 %vm283_vm2, %v2765_v3 }
 0x1c1   : > { %v3679_v43 = vpop.f32.mrb[0].mxu1 }
 0x1c2   : > { %v1229_v40 = vpop.f32.mrb[1].mxu1 }
 0x1c3   : > { %v3680_v6 = vpop.f32.mrb[2].mxu1 }
 0x1c4   : > { %v1232_v18 = vpop.f32.mrb[3].mxu1 }
 0x1c9   : > { %v3683_v47 = vpop.f32.mrb[4].mxu1 }
 0x1ca   : > { %v1245_v49 = vpop.f32.mrb[5].mxu1 }
 0x1cb   : > { %v3684_v21 = vpop.f32.mrb[6].mxu1 }
 0x1cc   : > { %v1248_v52 = vpop.f32.mrb[7].mxu1 }
 0x1d1   : > { %v3687_v38 = vpop.f32.mrb[8].mxu1 }
 0x1d2   : > { %v1261_v53 = vpop.f32.mrb[9].mxu1 }
 0x1d3   : > { %v3688_v48 = vpop.f32.mrb[10].mxu1 }
 0x1d4   : > { %v1264_v36 = vpop.f32.mrb[11].mxu1 }
 0x1d9   : > { %v4869_v58 = vpop.f32.mrb[12].mxu1 }
 0x1da   : > { %v4871_v59 = vpop.f32.mrb[13].mxu1 }
 0x1db   : > { %v4873_v60 = vpop.f32.mrb[14].mxu1 }
 0x1dc   : > { %v4875_v63 = vpop.f32.mrb[15].mxu1 }
 0x1e1   : > { %v4877_v62 = vpop.f32.mrb[16].mxu1 }
 0x1e2   : > { %v4879_v1 = vpop.f32.mrb[17].mxu1 }
 0x1e3   : > { %v4881_v2 = vpop.f32.mrb[18].mxu1 }
 0x1e4   : > { %v4883_v8 = vpop.f32.mrb[19].mxu1 }
 0x1e9   : > { %v3869_v4 = vpop.f32.mrb[0].mxu0 }
 0x1ea   : > { %v3905_v10 = vadd.f32 %v3869_v4, %v3679_v43  ;;  %v2859_v0 = vpop.f32.mrb[1].mxu0 }
 0x1eb   : > { %v3906_v29 = vadd.f32 %v2859_v0, %v1229_v40  ;;  %v3870_v12 = vpop.f32.mrb[2].mxu0 }
 0x1ec   : > { %v3047_v14 = vadd.f32 %v3905_v10, %v4889_v9  ;;  %v3907_v15 = vadd.f32 %v3870_v12, %v3680_v6  ;;  %v2862_v16 = vpop.f32.mrb[3].mxu0 }
 0x1ed   : > { %v3045_v17 = vadd.f32 %v3906_v29, %v4889_v9  ;;  %v3908_v7 = vadd.f32 %v2862_v16, %v1232_v18 }
 0x1ee   : > { %v3083_v46 = vmax.f32 %v3047_v14, 0.0  ;;  %v3048_v51 = vadd.f32 %v3907_v15, %v4889_v9 }
 0x1ef   : > { %v3081_v19 = vmax.f32 %v3045_v17, 0.0  ;;  %v3046_v22 = vadd.f32 %v3908_v7, %v4889_v9 }
 0x1f0   : > { %3120 = vst.msk [vmem:[%s4895_s16 + $0x10] sm:$0xff] %vm3117_vm3, %v3083_v46  ;;  %v3084_v23 = vmax.f32 %v3048_v51, 0.0 }
 0x1f1   : > { %3118 = vst.msk [vmem:[%s4895_s16] sm:$0xff] %vm3117_vm3, %v3081_v19  ;;  %v3082_v20 = vmax.f32 %v3046_v22, 0.0  ;;  %v3873_v54 = vpop.f32.mrb[4].mxu0 }
 0x1f2   : > { %3121 = vst.msk [vmem:[%s4895_s16 + $0x18] sm:$0xff] %vm3117_vm3, %v3084_v23  ;;  %v3909_v30 = vadd.f32 %v3873_v54, %v3683_v47  ;;  %v2875_v25 = vpop.f32.mrb[5].mxu0 }
 0x1f3   : > { %3119 = vst.msk [vmem:[%s4895_s16 + $0x8] sm:$0xff] %vm3117_vm3, %v3082_v20  ;;  %v3910_v26 = vadd.f32 %v2875_v25, %v1245_v49  ;;  %v3874_v28 = vpop.f32.mrb[6].mxu0 }
 0x1f4   : > { %v3051_v56 = vadd.f32 %v3909_v30, %v4889_v9  ;;  %v3911_v61 = vadd.f32 %v3874_v28, %v3684_v21  ;;  %v2878_v33 = vpop.f32.mrb[7].mxu0 }
 0x1f5   : > { %v3049_v34 = vadd.f32 %v3910_v26, %v4889_v9  ;;  %v3912_v44 = vadd.f32 %v2878_v33, %v1248_v52 }
 0x1f6   : > { %v3087_v31 = vmax.f32 %v3051_v56, 0.0  ;;  %v3052_v50 = vadd.f32 %v3911_v61, %v4889_v9 }
 0x1f7   : > { %v3085_v11 = vmax.f32 %v3049_v34, 0.0  ;;  %v3050_v35 = vadd.f32 %v3912_v44, %v4889_v9 }
 0x1f8   : > { %3124 = vst.msk [vmem:[%s4895_s16 + $0x30] sm:$0xff] %vm3117_vm3, %v3087_v31  ;;  %v3088_v37 = vmax.f32 %v3052_v50, 0.0 }
 0x1f9   : > { %3122 = vst.msk [vmem:[%s4895_s16 + $0x20] sm:$0xff] %vm3117_vm3, %v3085_v11  ;;  %v3086_v45 = vmax.f32 %v3050_v35, 0.0  ;;  %v3877_v32 = vpop.f32.mrb[8].mxu0 }
 0x1fa   : > { %3125 = vst.msk [vmem:[%s4895_s16 + $0x38] sm:$0xff] %vm3117_vm3, %v3088_v37  ;;  %v3913_v13 = vadd.f32 %v3877_v32, %v3687_v38  ;;  %v2891_v5 = vpop.f32.mrb[9].mxu0 }
 0x1fb   : > { %3123 = vst.msk [vmem:[%s4895_s16 + $0x28] sm:$0xff] %vm3117_vm3, %v3086_v45  ;;  %v3914_v39 = vadd.f32 %v2891_v5, %v1261_v53  ;;  %v3878_v41 = vpop.f32.mrb[10].mxu0 }
 0x1fc   : > { %v3055_v24 = vadd.f32 %v3913_v13, %v4889_v9  ;;  %v3915_v57 = vadd.f32 %v3878_v41, %v3688_v48  ;;  %v2894_v27 = vpop.f32.mrb[11].mxu0 }
 0x1fd   : > { %v3053_v55 = vadd.f32 %v3914_v39, %v4889_v9  ;;  %v3916_v42 = vadd.f32 %v2894_v27, %v1264_v36 }
 0x1fe   : > { %v3091_v3 = vmax.f32 %v3055_v24, 0.0  ;;  %v3056_v43 = vadd.f32 %v3915_v57, %v4889_v9 }
 0x1ff   : > { %v3089_v40 = vmax.f32 %v3053_v55, 0.0  ;;  %v3054_v6 = vadd.f32 %v3916_v42, %v4889_v9 }
 0x200   : > { %3128 = vst.msk [vmem:[%s4895_s16 + $0x50] sm:$0xff] %vm3117_vm3, %v3091_v3  ;;  %v3092_v18 = vmax.f32 %v3056_v43, 0.0 }
 0x201   : > { %3126 = vst.msk [vmem:[%s4895_s16 + $0x40] sm:$0xff] %vm3117_vm3, %v3089_v40  ;;  %v3090_v47 = vmax.f32 %v3054_v6, 0.0  ;;  %v3881_v49 = vpop.f32.mrb[12].mxu0 }
 0x202   : > { %3129 = vst.msk [vmem:[%s4895_s16 + $0x58] sm:$0xff] %vm3117_vm3, %v3092_v18  ;;  %v3917_v21 = vadd.f32 %v3881_v49, %v4869_v58  ;;  %v2907_v52 = vpop.f32.mrb[13].mxu0 }
 0x203   : > { %3127 = vst.msk [vmem:[%s4895_s16 + $0x48] sm:$0xff] %vm3117_vm3, %v3090_v47  ;;  %v3918_v38 = vadd.f32 %v2907_v52, %v4871_v59  ;;  %v3882_v53 = vpop.f32.mrb[14].mxu0 }
 0x204   : > { %v3059_v48 = vadd.f32 %v3917_v21, %v4889_v9  ;;  %v3919_v36 = vadd.f32 %v3882_v53, %v4873_v60  ;;  %v2910_v4 = vpop.f32.mrb[15].mxu0 }
 0x205   : > { %v3057_v10 = vadd.f32 %v3918_v38, %v4889_v9  ;;  %v3920_v0 = vadd.f32 %v2910_v4, %v4875_v63 }
 0x206   : > { %v3095_v29 = vmax.f32 %v3059_v48, 0.0  ;;  %v3060_v58 = vadd.f32 %v3919_v36, %v4889_v9 }
 0x207   : > { %v3093_v12 = vmax.f32 %v3057_v10, 0.0  ;;  %v3058_v14 = vadd.f32 %v3920_v0, %v4889_v9 }
 0x208   : > { %3132 = vst.msk [vmem:[%s4895_s16 + $0x70] sm:$0xff] %vm3117_vm3, %v3095_v29  ;;  %v3096_v59 = vmax.f32 %v3060_v58, 0.0 }
 0x209   : > { %v3737_v15 = vpop.f32.mrb[20].mxu1  ;;  %3130 = vst.msk [vmem:[%s4895_s16 + $0x60] sm:$0xff] %vm3117_vm3, %v3093_v12  ;;  %v3094_v16 = vmax.f32 %v3058_v14, 0.0  ;;  %v3885_v60 = vpop.f32.mrb[16].mxu0 }
 0x20a   : > { %v1635_v17 = vpop.f32.mrb[21].mxu1  ;;  %3133 = vst.msk [vmem:[%s4895_s16 + $0x78] sm:$0xff] %vm3117_vm3, %v3096_v59  ;;  %v3921_v63 = vadd.f32 %v3885_v60, %v4877_v62  ;;  %v2923_v7 = vpop.f32.mrb[17].mxu0 }
 0x20b   : > { %v3738_v46 = vpop.f32.mrb[22].mxu1  ;;  %3131 = vst.msk [vmem:[%s4895_s16 + $0x68] sm:$0xff] %vm3117_vm3, %v3094_v16  ;;  %v3922_v51 = vadd.f32 %v2923_v7, %v4879_v1  ;;  %v3886_v19 = vpop.f32.mrb[18].mxu0 }
 0x20c   : > { %v1638_v22 = vpop.f32.mrb[23].mxu1  ;;  %v3063_v23 = vadd.f32 %v3921_v63, %v4889_v9  ;;  %v3923_v20 = vadd.f32 %v3886_v19, %v4881_v2  ;;  %v2926_v54 = vpop.f32.mrb[19].mxu0 }
 0x20d   : > { %v3061_v30 = vadd.f32 %v3922_v51, %v4889_v9  ;;  %v3924_v62 = vadd.f32 %v2926_v54, %v4883_v8 }
 0x20e   : > { %v3099_v25 = vmax.f32 %v3063_v23, 0.0  ;;  %v3064_v26 = vadd.f32 %v3923_v20, %v4889_v9 }
 0x20f   : > { %v3097_v28 = vmax.f32 %v3061_v30, 0.0  ;;  %v3062_v56 = vadd.f32 %v3924_v62, %v4889_v9 }
 0x210   : > { %3136 = vst.msk [vmem:[%s4895_s16 + $0x90] sm:$0xff] %vm3117_vm3, %v3099_v25  ;;  %v3100_v1 = vmax.f32 %v3064_v26, 0.0 }
 0x211   : > { %v3741_v61 = vpop.f32.mrb[24].mxu1  ;;  %3134 = vst.msk [vmem:[%s4895_s16 + $0x80] sm:$0xff] %vm3117_vm3, %v3097_v28  ;;  %v3098_v33 = vmax.f32 %v3062_v56, 0.0  ;;  %v3889_v2 = vpop.f32.mrb[20].mxu0 }
 0x212   : > { %v1651_v34 = vpop.f32.mrb[25].mxu1  ;;  %3137 = vst.msk [vmem:[%s4895_s16 + $0x98] sm:$0xff] %vm3117_vm3, %v3100_v1  ;;  %v3925_v44 = vadd.f32 %v3889_v2, %v3737_v15  ;;  %v2939_v8 = vpop.f32.mrb[21].mxu0 }
 0x213   : > { %v3742_v31 = vpop.f32.mrb[26].mxu1  ;;  %3135 = vst.msk [vmem:[%s4895_s16 + $0x88] sm:$0xff] %vm3117_vm3, %v3098_v33  ;;  %v3926_v50 = vadd.f32 %v2939_v8, %v1635_v17  ;;  %v3890_v11 = vpop.f32.mrb[22].mxu0 }
 0x214   : > { %v1654_v35 = vpop.f32.mrb[27].mxu1  ;;  %v3067_v37 = vadd.f32 %v3925_v44, %v4889_v9  ;;  %v3927_v45 = vadd.f32 %v3890_v11, %v3738_v46  ;;  %v2942_v32 = vpop.f32.mrb[23].mxu0 }
 0x215   : > { %v3065_v13 = vadd.f32 %v3926_v50, %v4889_v9  ;;  %v3928_v5 = vadd.f32 %v2942_v32, %v1638_v22 }
 0x216   : > { %v3103_v39 = vmax.f32 %v3067_v37, 0.0  ;;  %v3068_v41 = vadd.f32 %v3927_v45, %v4889_v9 }
 0x217   : > { %v3101_v24 = vmax.f32 %v3065_v13, 0.0  ;;  %v3066_v57 = vadd.f32 %v3928_v5, %v4889_v9 }
 0x218   : > { %3140 = vst.msk [vmem:[%s4895_s16 + $0xb0] sm:$0xff] %vm3117_vm3, %v3103_v39  ;;  %v3104_v27 = vmax.f32 %v3068_v41, 0.0 }
 0x219   : > { %v3745_v55 = vpop.f32.mrb[28].mxu1  ;;  %3138 = vst.msk [vmem:[%s4895_s16 + $0xa0] sm:$0xff] %vm3117_vm3, %v3101_v24  ;;  %v3102_v42 = vmax.f32 %v3066_v57, 0.0  ;;  %v3893_v3 = vpop.f32.mrb[24].mxu0 }
 0x21a   : > { %v1667_v43 = vpop.f32.mrb[29].mxu1  ;;  %3141 = vst.msk [vmem:[%s4895_s16 + $0xb8] sm:$0xff] %vm3117_vm3, %v3104_v27  ;;  %v3929_v40 = vadd.f32 %v3893_v3, %v3741_v61  ;;  %v2955_v6 = vpop.f32.mrb[25].mxu0 }
 0x21b   : > { %v3746_v18 = vpop.f32.mrb[30].mxu1  ;;  %3139 = vst.msk [vmem:[%s4895_s16 + $0xa8] sm:$0xff] %vm3117_vm3, %v3102_v42  ;;  %v3930_v47 = vadd.f32 %v2955_v6, %v1651_v34  ;;  %v3894_v49 = vpop.f32.mrb[26].mxu0 }
 0x21c   : > { %v1670_v21 = vpop.f32.mrb[31].mxu1  ;;  %v3071_v52 = vadd.f32 %v3929_v40, %v4889_v9  ;;  %v3931_v38 = vadd.f32 %v3894_v49, %v3742_v31  ;;  %v2958_v53 = vpop.f32.mrb[27].mxu0 }
 0x21d   : > { %v3069_v48 = vadd.f32 %v3930_v47, %v4889_v9  ;;  %v3932_v36 = vadd.f32 %v2958_v53, %v1654_v35 }
 0x21e   : > { %v3107_v4 = vmax.f32 %v3071_v52, 0.0  ;;  %v3072_v10 = vadd.f32 %v3931_v38, %v4889_v9 }
 0x21f   : > { %v3105_v0 = vmax.f32 %v3069_v48, 0.0  ;;  %v3070_v29 = vadd.f32 %v3932_v36, %v4889_v9 }
 0x220   : > { %3144 = vst.msk [vmem:[%s4895_s16 + $0xd0] sm:$0xff] %vm3117_vm3, %v3107_v4  ;;  %v3108_v58 = vmax.f32 %v3072_v10, 0.0 }
 0x221   : > { %v3749_v12 = vpop.f32.mrb[32].mxu1  ;;  %3142 = vst.msk [vmem:[%s4895_s16 + $0xc0] sm:$0xff] %vm3117_vm3, %v3105_v0  ;;  %v3106_v14 = vmax.f32 %v3070_v29, 0.0  ;;  %v3897_v59 = vpop.f32.mrb[28].mxu0 }
 0x222   : > { %v1683_v15 = vpop.f32.mrb[33].mxu1  ;;  %3145 = vst.msk [vmem:[%s4895_s16 + $0xd8] sm:$0xff] %vm3117_vm3, %v3108_v58  ;;  %v3933_v16 = vadd.f32 %v3897_v59, %v3745_v55  ;;  %v2971_v60 = vpop.f32.mrb[29].mxu0 }
 0x223   : > { %v3750_v17 = vpop.f32.mrb[34].mxu1  ;;  %3143 = vst.msk [vmem:[%s4895_s16 + $0xc8] sm:$0xff] %vm3117_vm3, %v3106_v14  ;;  %v3934_v63 = vadd.f32 %v2971_v60, %v1667_v43  ;;  %v3898_v7 = vpop.f32.mrb[30].mxu0 }
 0x224   : > { %v1686_v46 = vpop.f32.mrb[35].mxu1  ;;  %v3075_v51 = vadd.f32 %v3933_v16, %v4889_v9  ;;  %v3935_v19 = vadd.f32 %v3898_v7, %v3746_v18  ;;  %v2974_v22 = vpop.f32.mrb[31].mxu0 }
 0x225   : > { %v3073_v23 = vadd.f32 %v3934_v63, %v4889_v9  ;;  %v3936_v20 = vadd.f32 %v2974_v22, %v1670_v21 }
 0x226   : > { %v3111_v54 = vmax.f32 %v3075_v51, 0.0  ;;  %v3076_v30 = vadd.f32 %v3935_v19, %v4889_v9 }
 0x227   : > { %v3109_v62 = vmax.f32 %v3073_v23, 0.0  ;;  %v3074_v25 = vadd.f32 %v3936_v20, %v4889_v9 }
 0x228   : > { %3148 = vst.msk [vmem:[%s4895_s16 + $0xf0] sm:$0xff] %vm3117_vm3, %v3111_v54  ;;  %v3112_v26 = vmax.f32 %v3076_v30, 0.0 }
 0x229   : > { %3146 = vst.msk [vmem:[%s4895_s16 + $0xe0] sm:$0xff] %vm3117_vm3, %v3109_v62  ;;  %v3110_v28 = vmax.f32 %v3074_v25, 0.0  ;;  %v3901_v56 = vpop.f32.mrb[32].mxu0 }
 0x22a   : > { %3149 = vst.msk [vmem:[%s4895_s16 + $0xf8] sm:$0xff] %vm3117_vm3, %v3112_v26  ;;  %v3937_v1 = vadd.f32 %v3901_v56, %v3749_v12  ;;  %v2987_v61 = vpop.f32.mrb[33].mxu0 }
 0x22b   : > { %3147 = vst.msk [vmem:[%s4895_s16 + $0xe8] sm:$0xff] %vm3117_vm3, %v3110_v28  ;;  %v3938_v33 = vadd.f32 %v2987_v61, %v1683_v15  ;;  %v3902_v2 = vpop.f32.mrb[34].mxu0 }
 0x22c   : > { %v3079_v34 = vadd.f32 %v3937_v1, %v4889_v9  ;;  %v3939_v44 = vadd.f32 %v3902_v2, %v3750_v17  ;;  %v2990_v8 = vpop.f32.mrb[35].mxu0 }
 0x22d   : > { %v3077_v31 = vadd.f32 %v3938_v33, %v4889_v9  ;;  %v3940_v50 = vadd.f32 %v2990_v8, %v1686_v46 }
 0x22e   : > { %v3115_v11 = vmax.f32 %v3079_v34, 0.0  ;;  %v3080_v35 = vadd.f32 %v3939_v44, %v4889_v9 }
 0x22f   : > { %v3113_v37 = vmax.f32 %v3077_v31, 0.0  ;;  %v3078_v45 = vadd.f32 %v3940_v50, %v4889_v9 }
 0x230   : > { %3152 = vst.msk [vmem:[%s4895_s16 + $0x110] sm:$0xff] %vm3117_vm3, %v3115_v11  ;;  %v3116_v32 = vmax.f32 %v3080_v35, 0.0 }
 0x231   : > { %3150 = vst.msk [vmem:[%s4895_s16 + $0x100] sm:$0xff] %vm3117_vm3, %v3113_v37  ;;  %v3114_v13 = vmax.f32 %v3078_v45, 0.0 }
 0x232   : > { %3154 = vst.msk [vmem:[%s4895_s16 + $0x118] sm:$0x3f] %vm3153_vm4, %v3116_v32 }
 0x233   : > { %3151 = vst.msk [vmem:[%s4895_s16 + $0x108] sm:$0xff] %vm3117_vm3, %v3114_v13 }
 0x234 PF: > { %s13_s12 = sadd.s32 1, %s4210_s12  }
 0x235   : > { %p10_p4 = scmp.ge.s32.totalorder %s13_s12, 8  }
 0x237   :  { %12 = sbr.rel (!%p10_p4) target bundleno = 1 (0x1), region = 70 }

// kernel: total_loss.9
= control target key start
LH: loop header
LB: loop body
LE: loop exit
PB: predicated region body
PF: predicated region fallthrough
CT: control target
= control target key end

     0   :  { %s1668_s12 = smov 0   ;;  %s1994_s0 = inlined_call_operand.vmem [shape: f32[6,100,8], index: 0, kind: input, shape index: {}]   ;;  %s1995_s1 = inlined_call_operand.vmem [shape: bf16[9,8,16], index: 1, kind: input, shape index: {}]   ;;  %s1996_s2 = inlined_call_operand.vmem [shape: f32[1,16], index: 2, kind: input, shape index: {}]   ;;  %s1997_s3 = inlined_call_operand.vmem [shape: f32[6,78,16], index: 3, kind: output, shape index: {}]  }
   0x1 LB: > { %s1309_s13 = sadd.s32 4294967295, %s1644_s12   ;;  %p1313_p0 = scmp.ge.s32.totalorder %s1644_s12, 1  ;;  %s1644_s12 = sphi %s1668_s12, %s13_s12  }
   0x2   : > { %p137_p1 = scmp.lt.s32.totalorder %s1644_s12, 7 }
   0x4   : > { %p138_p2 = pnand %p1313_p0, %p137_p1 }
   0x5   : > { %v1316_v0 = vld [vmem:[%s1995_s1 + $0x4] sm:$0xf] (!%p138_p2)  ;;  %vm221_vm0 = vcmask (!%p138_p2), 1043456   ;;  %p161_p3 = scmp.lt.s32.totalorder (!%p138_p2), %s1309_s13, 5  ;;  %v1646_v1 = vmov (!%p138_p2), 0.0   ;;  %vm1647_vm1 = vmmov (!%p138_p2), 0  }
   0x6   : > { %141 = sbr.rel (%p138_p2) target bundleno = 417 (0x1a1), region = 32  ;;  %1426 = vmatprep.subr.bf16.mxu0 (!%p138_p2), %v1646_v1  ;;  %1624 = vmatprep.subr.bf16.mxu1 (!%p138_p2), %v1646_v1  ;;  %v223_v2 = vsel (!%p138_p2), %vm221_vm0, %v1316_v0, 0  ;;  %v1327_v3 = vld [vmem:[%s1995_s1 + $0x8] sm:$0xf] (!%p138_p2)  ;;  %v187_v4 = vld [vmem:[%s1995_s1] sm:$0xf] (!%p138_p2) }
   0x7   : > { %1427 = vmatpush3.bf16.msra.mxu0 (!%p138_p2), %v223_v2  ;;  %1625 = vmatpush3.bf16.msra.mxu1 (!%p138_p2), %v223_v2  ;;  %vm205_vm2 = vcmask (!%p138_p2), 64512   ;;  %v422_v10 = vsel (!%p138_p2), %vm221_vm0, %v1327_v3, 0  ;;  %v314_v12 = vsel (!%p138_p2), %vm221_vm0, %v187_v4, 0  ;;  %v1333_v24 = vld [vmem:[%s1995_s1 + $0xc] sm:$0xf] (!%p138_p2)  ;;  %vm1242_vm3 = vcmask (!%p138_p2), 130048  }
   0x8   : > { %1428 = vmatprep.mubr.msk.bf16.mxu0 (!%p138_p2), %vm1647_vm1, %v1646_v1  ;;  %1440 = vmatprep.mubr.msk.bf16.mxu1 (!%p138_p2), %vm1647_vm1, %v1646_v1  ;;  %v540_v26 = vsel (!%p138_p2), %vm221_vm0, %v1333_v24, 0  ;;  %v1339_v31 = vld [vmem:[%s1995_s1 + $0x10] sm:$0xf] (!%p138_p2)  ;;  %v1345_v56 = vld [vmem:[%s1995_s1 + $0x14] sm:$0xf] (!%p138_p2)  ;;  %vm1252_vm4 = vcmask (!%p138_p2), 128000  }
   0x9   : > { %1470 = vmatprep.subr.bf16.mxu0 (!%p138_p2), %v1646_v1  ;;  %1448 = vmatprep.subr.bf16.mxu1 (!%p138_p2), %v1646_v1  ;;  %v658_v34 = vsel (!%p138_p2), %vm221_vm0, %v1339_v31, 0  ;;  %v776_v58 = vsel (!%p138_p2), %vm221_vm0, %v1345_v56, 0  ;;  %v1351_v61 = vld [vmem:[%s1995_s1 + $0x18] sm:$0xf] (!%p138_p2) }
   0xa   : > { %v894_v0 = vsel (!%p138_p2), %vm221_vm0, %v1351_v61, 0 }
   0xd   : > { %s1999_s13 = smov (!%p161_p3, %s1309_s13), 5 }
   0xe   : > { %s1626_s16 = smul.u32 104, %s1999_s13 }
   0xf   : > { %s1627_s9 = smul.u32 80, %s1999_s13 }
  0x10   : > { %s1697_s21 = scalar_lea.vmem %s1994_s0, %s1626_s16 }
  0x11   : > { %v188_v5 = vld [vmem:[%s1697_s21 + $0x1] sm:$0xff]  ;;  %v189_v6 = vld [vmem:[%s1697_s21 + $0x9] sm:$0xff]  ;;  %v194_v7 = vld [vmem:[%s1697_s21 + $0x31] sm:$0xff]  ;;  %s1957_s13 = scalar_lea.vmem %s1997_s3, %s1627_s9 }
  0x12   : > { %v198_v8 = vpack.c.bf16 %v189_v6, %v188_v5  ;;  %v195_v9 = vld [vmem:[%s1697_s21 + $0x39] sm:$0xff]  ;;  %v190_v13 = vld [vmem:[%s1697_s21 + $0x11] sm:$0xff]  ;;  %v196_v15 = vld [vmem:[%s1697_s21 + $0x41] sm:$0xff] }
  0x13   : > { %v201_v11 = vpack.c.bf16 %v195_v9, %v194_v7  ;;  %v191_v14 = vld [vmem:[%s1697_s21 + $0x19] sm:$0xff]  ;;  %v197_v16 = vld [vmem:[%s1697_s21 + $0x49] sm:$0x3f]  ;;  %v192_v19 = vld [vmem:[%s1697_s21 + $0x21] sm:$0xff] }
  0x14   : > { %1429 = vmatmul.mubr.msk.bf16.vlgmr.msra.gmra.mrb[0].mxu0 %vm205_vm2, %v198_v8  ;;  %v199_v17 = vpack.c.bf16 %v191_v14, %v190_v13  ;;  %v202_v18 = vpack.c.bf16 %v197_v16, %v196_v15  ;;  %v193_v20 = vld [vmem:[%s1697_s21 + $0x29] sm:$0xff]  ;;  %v172_v21 = vld [vmem:[%s1697_s21] sm:$0xff]  ;;  %v175_v30 = vld [vmem:[%s1697_s21 + $0x18] sm:$0xff] }
  0x15   : > { %1441 = vmatmul.mubr.msk.bf16.vlgmr.msra.gmra.mrb[0].mxu1 %vm205_vm2, %v201_v11  ;;  %1471 = vmatpush3.bf16.msra.mxu0 %v422_v10  ;;  %v173_v22 = vld [vmem:[%s1697_s21 + $0x8] sm:$0xff]  ;;  %v200_v23 = vpack.c.bf16 %v193_v20, %v192_v19  ;;  %v174_v29 = vld [vmem:[%s1697_s21 + $0x10] sm:$0xff]  ;;  %v392_v36 = vld [vmem:[%s1697_s21 + $0x1a] sm:$0xff] }
  0x16   : > { %1449 = vmatpush3.bf16.msra.mxu1 %v314_v12  ;;  %1432 = vmatprep.mubr.msk.bf16.mxu0 %vm1647_vm1, %v1646_v1  ;;  %v182_v25 = vpack.c.bf16 %v173_v22, %v172_v21  ;;  %v389_v27 = vld [vmem:[%s1697_s21 + $0x2] sm:$0xff]  ;;  %v390_v28 = vld [vmem:[%s1697_s21 + $0xa] sm:$0xff]  ;;  %v183_v33 = vpack.c.bf16 %v175_v30, %v174_v29  ;;  %v391_v35 = vld [vmem:[%s1697_s21 + $0x12] sm:$0xff] }
  0x17   : > { %1444 = vmatprep.mubr.msk.bf16.mxu1 %vm1647_vm1, %v1646_v1  ;;  %1492 = vmatprep.subr.bf16.mxu1 %v1646_v1  ;;  %v399_v32 = vpack.c.bf16 %v390_v28, %v389_v27  ;;  %v176_v37 = vld [vmem:[%s1697_s21 + $0x20] sm:$0xff]  ;;  %v177_v38 = vld [vmem:[%s1697_s21 + $0x28] sm:$0xff]  ;;  %v400_v39 = vpack.c.bf16 %v392_v36, %v391_v35  ;;  %v178_v43 = vld [vmem:[%s1697_s21 + $0x30] sm:$0xff]  ;;  %v517_v57 = vpack.c.bf16 %v391_v35, %v390_v28 }
  0x18   : > { %1514 = vmatprep.subr.bf16.mxu0 %v1646_v1  ;;  %v184_v40 = vpack.c.bf16 %v177_v38, %v176_v37  ;;  %v393_v41 = vld [vmem:[%s1697_s21 + $0x22] sm:$0xff]  ;;  %v394_v42 = vld [vmem:[%s1697_s21 + $0x2a] sm:$0xff]  ;;  %v179_v44 = vld [vmem:[%s1697_s21 + $0x38] sm:$0xff] }
  0x19   : > { %v401_v45 = vpack.c.bf16 %v394_v42, %v393_v41  ;;  %v185_v46 = vpack.c.bf16 %v179_v44, %v178_v43  ;;  %v395_v47 = vld [vmem:[%s1697_s21 + $0x32] sm:$0xff]  ;;  %v396_v48 = vld [vmem:[%s1697_s21 + $0x3a] sm:$0xff]  ;;  %v181_v50 = vld [vmem:[%s1697_s21 + $0x48] sm:$0x3f]  ;;  %v518_v63 = vpack.c.bf16 %v393_v41, %v392_v36 }
  0x1a   : > { %v180_v49 = vld [vmem:[%s1697_s21 + $0x40] sm:$0xff]  ;;  %v402_v51 = vpack.c.bf16 %v396_v48, %v395_v47  ;;  %v398_v54 = vld [vmem:[%s1697_s21 + $0x4a] sm:$0x3f]  ;;  %v626_v60 = vld [vmem:[%s1697_s21 + $0x13] sm:$0xff]  ;;  %v519_v5 = vpack.c.bf16 %v395_v47, %v394_v42 }
  0x1b   : > { %v186_v52 = vpack.c.bf16 %v181_v50, %v180_v49  ;;  %v397_v53 = vld [vmem:[%s1697_s21 + $0x42] sm:$0xff]  ;;  %v625_v59 = vld [vmem:[%s1697_s21 + $0xb] sm:$0xff]  ;;  %v630_v7 = vld [vmem:[%s1697_s21 + $0x33] sm:$0xff] }
  0x1c   : > { %1433 = vmatmul.mubr.msk.bf16.gmra.mrb[4].mxu0 %vm205_vm2, %v199_v17  ;;  %v403_v55 = vpack.c.bf16 %v398_v54, %v397_v53  ;;  %v635_v62 = vpack.c.bf16 %v626_v60, %v625_v59  ;;  %v627_v2 = vld [vmem:[%s1697_s21 + $0x1b] sm:$0xff]  ;;  %v628_v3 = vld [vmem:[%s1697_s21 + $0x23] sm:$0xff]  ;;  %v629_v6 = vld [vmem:[%s1697_s21 + $0x2b] sm:$0xff]  ;;  %v520_v9 = vpack.c.bf16 %v397_v53, %v396_v48 }
  0x1d   : > { %1445 = vmatmul.mubr.msk.bf16.gmra.mrb[4].mxu1 %vm205_vm2, %v202_v18  ;;  %1436 = vmatprep.mubr.msk.bf16.mxu0 %vm1647_vm1, %v1646_v1  ;;  %v636_v4 = vpack.c.bf16 %v628_v3, %v627_v2  ;;  %v637_v8 = vpack.c.bf16 %v630_v7, %v629_v6  ;;  %v631_v10 = vld [vmem:[%s1697_s21 + $0x3b] sm:$0xff]  ;;  %v632_v11 = vld [vmem:[%s1697_s21 + $0x43] sm:$0xff]  ;;  %v516_v13 = vld [vmem:[%s1697_s21 + $0x52] sm:$0x3f] }
  0x1e   : > { %1450 = vmatprep.mubr.msk.bf16.mxu1 %vm1647_vm1, %v1646_v1  ;;  %v515_v12 = vld [vmem:[%s1697_s21 + $0x4a] sm:$0xff]  ;;  %v638_v14 = vpack.c.bf16 %v632_v11, %v631_v10  ;;  %v634_v17 = vld [vmem:[%s1697_s21 + $0x53] sm:$0x3f]  ;;  %v1357_v21 = vld [vmem:[%s1995_s1 + $0x1c] sm:$0xf] }
  0x1f   : > { %v521_v15 = vpack.c.bf16 %v516_v13, %v515_v12  ;;  %v633_v16 = vld [vmem:[%s1697_s21 + $0x4b] sm:$0xff]  ;;  %v744_v19 = vld [vmem:[%s1697_s21 + $0x14] sm:$0xff]  ;;  %v745_v24 = vld [vmem:[%s1697_s21 + $0x1c] sm:$0xff] }
  0x20   : > { %v743_v18 = vld [vmem:[%s1697_s21 + $0xc] sm:$0xff]  ;;  %v639_v20 = vpack.c.bf16 %v634_v17, %v633_v16  ;;  %v871_v27 = vpack.c.bf16 %v745_v24, %v744_v19  ;;  %v748_v31 = vld [vmem:[%s1697_s21 + $0x34] sm:$0xff]  ;;  %v750_v35 = vld [vmem:[%s1697_s21 + $0x44] sm:$0xff] }
  0x21   : > { %v753_v22 = vpack.c.bf16 %v744_v19, %v743_v18  ;;  %v747_v30 = vld [vmem:[%s1697_s21 + $0x2c] sm:$0xff]  ;;  %v869_v42 = vld [vmem:[%s1697_s21 + $0x54] sm:$0xff]  ;;  %v870_v43 = vld [vmem:[%s1697_s21 + $0x5c] sm:$0x3f] }
  0x22   : > { %v751_v38 = vld [vmem:[%s1697_s21 + $0x4c] sm:$0xff]  ;;  %v979_v44 = vld [vmem:[%s1697_s21 + $0x15] sm:$0xff]  ;;  %v1098_v49 = vld [vmem:[%s1697_s21 + $0x1e] sm:$0xff] }
  0x23   : > { %v1097_v48 = vld [vmem:[%s1697_s21 + $0x16] sm:$0xff]  ;;  %v981_v50 = vld [vmem:[%s1697_s21 + $0x25] sm:$0xff]  ;;  %v1106_v10 = vld [vmem:[%s1697_s21 + $0x5e] sm:$0x3f] }
  0x24   : > { %1437 = vmatmul.mubr.msk.bf16.gmra.mrb[8].mxu0 %vm205_vm2, %v200_v23  ;;  %v1012_v23 = vsel %vm221_vm0, %v1357_v21, 0  ;;  %v1099_v54 = vld [vmem:[%s1697_s21 + $0x26] sm:$0xff]  ;;  %v983_v56 = vld [vmem:[%s1697_s21 + $0x35] sm:$0xff]  ;;  %v1102_v61 = vld [vmem:[%s1697_s21 + $0x3e] sm:$0xff] }
  0x25   : > { %1451 = vmatmul.mubr.msk.bf16.vlgmr.msra.gmra.mrb[8].mxu1 %vm205_vm2, %v182_v25  ;;  %1472 = vmatprep.mubr.msk.bf16.mxu0 %vm1647_vm1, %v1646_v1  ;;  %v746_v25 = vld [vmem:[%s1697_s21 + $0x24] sm:$0xff]  ;;  %v1101_v60 = vld [vmem:[%s1697_s21 + $0x36] sm:$0xff] }
  0x26   : > { %1493 = vmatpush3.bf16.msra.mxu1 %v540_v26  ;;  %1454 = vmatprep.mubr.msk.bf16.mxu1 %vm1647_vm1, %v1646_v1  ;;  %v1363_v26 = vld [vmem:[%s1995_s1 + $0x20] sm:$0xf]  ;;  %v754_v28 = vpack.c.bf16 %v746_v25, %v745_v24  ;;  %v1103_v3 = vld [vmem:[%s1697_s21 + $0x46] sm:$0xff] }
  0x27   : > { %1536 = vmatprep.subr.bf16.mxu1 %v1646_v1  ;;  %v1130_v29 = vsel %vm221_vm0, %v1363_v26, 0  ;;  %v988_v6 = vld [vmem:[%s1697_s21 + $0x5d] sm:$0x3f] }
  0x2c   : > { %1473 = vmatmul.mubr.msk.bf16.vlgmr.msra.gmra.mrb[12].mxu0 %vm205_vm2, %v399_v32  ;;  %v872_v32 = vpack.c.bf16 %v747_v30, %v746_v25 }
  0x2d   : > { %1455 = vmatmul.mubr.msk.bf16.gmra.mrb[12].mxu1 %vm205_vm2, %v183_v33  ;;  %1515 = vmatpush3.bf16.msra.mxu0 %v658_v34  ;;  %v755_v33 = vpack.c.bf16 %v748_v31, %v747_v30  ;;  %v749_v34 = vld [vmem:[%s1697_s21 + $0x3c] sm:$0xff] }
  0x2e   : > { %1458 = vmatprep.mubr.msk.bf16.mxu1 %vm1647_vm1, %v1646_v1  ;;  %1476 = vmatprep.mubr.msk.bf16.mxu0 %vm1647_vm1, %v1646_v1  ;;  %v873_v36 = vpack.c.bf16 %v749_v34, %v748_v31  ;;  %v756_v37 = vpack.c.bf16 %v750_v35, %v749_v34 }
  0x2f   : > { %1558 = vmatprep.subr.bf16.mxu0 %v1646_v1 }
  0x34   : > { %1477 = vmatmul.mubr.msk.bf16.gmra.mrb[16].mxu0 %vm205_vm2, %v400_v39  ;;  %v752_v39 = vld [vmem:[%s1697_s21 + $0x54] sm:$0x3f] }
  0x35   : > { %1459 = vmatmul.mubr.msk.bf16.gmra.mrb[16].mxu1 %vm205_vm2, %v184_v40  ;;  %1480 = vmatprep.mubr.msk.bf16.mxu0 %vm1647_vm1, %v1646_v1  ;;  %v874_v40 = vpack.c.bf16 %v751_v38, %v750_v35  ;;  %v757_v41 = vpack.c.bf16 %v752_v39, %v751_v38 }
  0x36   : > { %1462 = vmatprep.mubr.msk.bf16.mxu1 %vm1647_vm1, %v1646_v1 }
  0x3c   : > { %1481 = vmatmul.mubr.msk.bf16.gmra.mrb[20].mxu0 %vm205_vm2, %v401_v45  ;;  %v980_v45 = vld [vmem:[%s1697_s21 + $0x1d] sm:$0xff] }
  0x3d   : > { %1463 = vmatmul.mubr.msk.bf16.gmra.mrb[20].mxu1 %vm205_vm2, %v185_v46  ;;  %1484 = vmatprep.mubr.msk.bf16.mxu0 %vm1647_vm1, %v1646_v1  ;;  %v875_v46 = vpack.c.bf16 %v870_v43, %v869_v42  ;;  %v989_v47 = vpack.c.bf16 %v980_v45, %v979_v44 }
  0x3e   : > { %1466 = vmatprep.mubr.msk.bf16.mxu1 %vm1647_vm1, %v1646_v1 }
  0x44   : > { %1485 = vmatmul.mubr.msk.bf16.gmra.mrb[24].mxu0 %vm205_vm2, %v402_v51  ;;  %v982_v51 = vld [vmem:[%s1697_s21 + $0x2d] sm:$0xff] }
  0x45   : > { %1467 = vmatmul.mubr.msk.bf16.gmra.mrb[24].mxu1 %vm205_vm2, %v186_v52  ;;  %1488 = vmatprep.mubr.msk.bf16.mxu0 %vm1647_vm1, %v1646_v1  ;;  %v1107_v52 = vpack.c.bf16 %v1098_v49, %v1097_v48  ;;  %v990_v53 = vpack.c.bf16 %v982_v51, %v981_v50 }
  0x46   : > { %1494 = vmatprep.mubr.msk.bf16.mxu1 %vm1647_vm1, %v1646_v1 }
  0x4c   : > { %1489 = vmatmul.mubr.msk.bf16.gmra.mrb[28].mxu0 %vm205_vm2, %v403_v55  ;;  %v1100_v55 = vld [vmem:[%s1697_s21 + $0x2e] sm:$0xff] }
  0x4d   : > { %1495 = vmatmul.mubr.msk.bf16.vlgmr.msra.gmra.mrb[28].mxu1 %vm205_vm2, %v517_v57  ;;  %1516 = vmatprep.mubr.msk.bf16.mxu0 %vm1647_vm1, %v1646_v1  ;;  %v984_v57 = vld [vmem:[%s1697_s21 + $0x3d] sm:$0xff] }
  0x4e   : > { %1537 = vmatpush3.bf16.msra.mxu1 %v776_v58  ;;  %1498 = vmatprep.mubr.msk.bf16.mxu1 %vm1647_vm1, %v1646_v1  ;;  %v1108_v58 = vpack.c.bf16 %v1100_v55, %v1099_v54  ;;  %v991_v59 = vpack.c.bf16 %v984_v57, %v983_v56 }
  0x4f   : > { %1580 = vmatprep.subr.bf16.mxu1 %v1646_v1 }
  0x54   : > { %1517 = vmatmul.mubr.msk.bf16.vlgmr.msra.gmra.mrb[32].mxu0 %vm205_vm2, %v635_v62  ;;  %v985_v62 = vld [vmem:[%s1697_s21 + $0x45] sm:$0xff] }
  0x55   : > { %1499 = vmatmul.mubr.msk.bf16.gmra.mrb[32].mxu1 %vm205_vm2, %v518_v63  ;;  %1559 = vmatpush3.bf16.msra.mxu0 %v894_v0  ;;  %v986_v63 = vld [vmem:[%s1697_s21 + $0x4d] sm:$0xff]  ;;  %v1109_v0 = vpack.c.bf16 %v1102_v61, %v1101_v60 }
  0x56   : > { %1502 = vmatprep.mubr.msk.bf16.mxu1 %vm1647_vm1, %v1646_v1  ;;  %1520 = vmatprep.mubr.msk.bf16.mxu0 %vm1647_vm1, %v1646_v1  ;;  %v992_v2 = vpack.c.bf16 %v986_v63, %v985_v62 }
  0x57   : > { %1602 = vmatprep.subr.bf16.mxu0 %v1646_v1 }
  0x5c   : > { %1521 = vmatmul.mubr.msk.bf16.gmra.mrb[36].mxu0 %vm205_vm2, %v636_v4  ;;  %v1104_v4 = vld [vmem:[%s1697_s21 + $0x4e] sm:$0xff] }
  0x5d   : > { %1503 = vmatmul.mubr.msk.bf16.gmra.mrb[36].mxu1 %vm205_vm2, %v519_v5  ;;  %1524 = vmatprep.mubr.msk.bf16.mxu0 %vm1647_vm1, %v1646_v1  ;;  %v987_v5 = vld [vmem:[%s1697_s21 + $0x55] sm:$0xff]  ;;  %v1110_v7 = vpack.c.bf16 %v1104_v4, %v1103_v3 }
  0x5e   : > { %1506 = vmatprep.mubr.msk.bf16.mxu1 %vm1647_vm1, %v1646_v1 }
  0x64   : > { %1525 = vmatmul.mubr.msk.bf16.gmra.mrb[40].mxu0 %vm205_vm2, %v637_v8  ;;  %v993_v8 = vpack.c.bf16 %v988_v6, %v987_v5 }
  0x65   : > { %1507 = vmatmul.mubr.msk.bf16.gmra.mrb[40].mxu1 %vm205_vm2, %v520_v9  ;;  %1528 = vmatprep.mubr.msk.bf16.mxu0 %vm1647_vm1, %v1646_v1  ;;  %v1105_v9 = vld [vmem:[%s1697_s21 + $0x56] sm:$0xff] }
  0x66   : > { %1510 = vmatprep.mubr.msk.bf16.mxu1 %vm1647_vm1, %v1646_v1  ;;  %v1111_v11 = vpack.c.bf16 %v1106_v10, %v1105_v9 }
  0x6c   : > { %1529 = vmatmul.mubr.msk.bf16.gmra.mrb[44].mxu0 %vm205_vm2, %v638_v14 }
  0x6d   : > { %1511 = vmatmul.mubr.msk.bf16.gmra.mrb[44].mxu1 %vm205_vm2, %v521_v15  ;;  %1532 = vmatprep.mubr.msk.bf16.mxu0 %vm1647_vm1, %v1646_v1 }
  0x6e   : > { %1538 = vmatprep.mubr.msk.bf16.mxu1 %vm1647_vm1, %v1646_v1 }
  0x74   : > { %1533 = vmatmul.mubr.msk.bf16.gmra.mrb[48].mxu0 %vm205_vm2, %v639_v20 }
  0x75   : > { %1539 = vmatmul.mubr.msk.bf16.vlgmr.msra.gmra.mrb[48].mxu1 %vm205_vm2, %v753_v22  ;;  %1560 = vmatprep.mubr.msk.bf16.mxu0 %vm1647_vm1, %v1646_v1 }
  0x76   : > { %1581 = vmatpush3.bf16.msra.mxu1 %v1012_v23  ;;  %1542 = vmatprep.mubr.msk.bf16.mxu1 %vm1647_vm1, %v1646_v1 }
  0x7c   : > { %1561 = vmatmul.mubr.msk.bf16.vlgmr.msra.gmra.mrb[52].mxu0 %vm205_vm2, %v871_v27 }
  0x7d   : > { %1543 = vmatmul.mubr.msk.bf16.gmra.mrb[52].mxu1 %vm205_vm2, %v754_v28  ;;  %1603 = vmatpush3.bf16.msra.mxu0 %v1130_v29 }
  0x7e   : > { %1546 = vmatprep.mubr.msk.bf16.mxu1 %vm1647_vm1, %v1646_v1  ;;  %1564 = vmatprep.mubr.msk.bf16.mxu0 %vm1647_vm1, %v1646_v1 }
  0x84   : > { %1565 = vmatmul.mubr.msk.bf16.gmra.mrb[56].mxu0 %vm205_vm2, %v872_v32 }
  0x85   : > { %1547 = vmatmul.mubr.msk.bf16.gmra.mrb[56].mxu1 %vm205_vm2, %v755_v33  ;;  %1568 = vmatprep.mubr.msk.bf16.mxu0 %vm1647_vm1, %v1646_v1 }
  0x86   : > { %1550 = vmatprep.mubr.msk.bf16.mxu1 %vm1647_vm1, %v1646_v1 }
  0x8c   : > { %1569 = vmatmul.mubr.msk.bf16.gmra.mrb[60].mxu0 %vm205_vm2, %v873_v36 }
  0x8d   : > { %1551 = vmatmul.mubr.msk.bf16.gmra.mrb[60].mxu1 %vm205_vm2, %v756_v37  ;;  %1572 = vmatprep.mubr.msk.bf16.mxu0 %vm1647_vm1, %v1646_v1 }
  0x8e   : > { %1554 = vmatprep.mubr.msk.bf16.mxu1 %vm1647_vm1, %v1646_v1 }
  0x94   : > { %1573 = vmatmul.mubr.msk.bf16.gmra.mrb[64].mxu0 %vm205_vm2, %v874_v40 }
  0x95   : > { %1555 = vmatmul.mubr.msk.bf16.gmra.mrb[64].mxu1 %vm205_vm2, %v757_v41  ;;  %1576 = vmatprep.mubr.msk.bf16.mxu0 %vm1647_vm1, %v1646_v1 }
  0x96   : > { %1582 = vmatprep.mubr.msk.bf16.mxu1 %vm1647_vm1, %v1646_v1 }
  0x9c   : > { %1577 = vmatmul.mubr.msk.bf16.gmra.mrb[68].mxu0 %vm205_vm2, %v875_v46 }
  0x9d   : > { %1583 = vmatmul.mubr.msk.bf16.vlgmr.msra.gmra.mrb[68].mxu1 %vm205_vm2, %v989_v47  ;;  %1604 = vmatprep.mubr.msk.bf16.mxu0 %vm1647_vm1, %v1646_v1 }
  0x9e   : > { %1586 = vmatprep.mubr.msk.bf16.mxu1 %vm1647_vm1, %v1646_v1 }
  0xa4   : > { %1605 = vmatmul.mubr.msk.bf16.vlgmr.msra.gmra.mrb[72].mxu0 %vm205_vm2, %v1107_v52 }
  0xa5   : > { %1587 = vmatmul.mubr.msk.bf16.gmra.mrb[72].mxu1 %vm205_vm2, %v990_v53  ;;  %1608 = vmatprep.mubr.msk.bf16.mxu0 %vm1647_vm1, %v1646_v1 }
  0xa6   : > { %1590 = vmatprep.mubr.msk.bf16.mxu1 %vm1647_vm1, %v1646_v1 }
  0xac   : > { %1609 = vmatmul.mubr.msk.bf16.gmra.mrb[76].mxu0 %vm205_vm2, %v1108_v58 }
  0xad   : > { %1591 = vmatmul.mubr.msk.bf16.gmra.mrb[76].mxu1 %vm205_vm2, %v991_v59  ;;  %1612 = vmatprep.mubr.msk.bf16.mxu0 %vm1647_vm1, %v1646_v1 }
  0xae   : > { %1594 = vmatprep.mubr.msk.bf16.mxu1 %vm1647_vm1, %v1646_v1 }
  0xb4   : > { %1613 = vmatmul.mubr.msk.bf16.gmra.mrb[80].mxu0 %vm205_vm2, %v1109_v0 }
  0xb5   : > { %1595 = vmatmul.mubr.msk.bf16.gmra.mrb[80].mxu1 %vm205_vm2, %v992_v2  ;;  %1616 = vmatprep.mubr.msk.bf16.mxu0 %vm1647_vm1, %v1646_v1 }
  0xb6   : > { %1598 = vmatprep.mubr.msk.bf16.mxu1 %vm1647_vm1, %v1646_v1 }
  0xbc   : > { %1617 = vmatmul.mubr.msk.bf16.gmra.mrb[84].mxu0 %vm205_vm2, %v1110_v7 }
  0xbd   : > { %1599 = vmatmul.mubr.msk.bf16.gmra.mrb[84].mxu1 %vm205_vm2, %v993_v8  ;;  %1620 = vmatprep.mubr.msk.bf16.mxu0 %vm1647_vm1, %v1646_v1 }
  0xc4   : > { %1621 = vmatmul.mubr.msk.bf16.gmra.mrb[88].mxu0 %vm205_vm2, %v1111_v11 }
  0xe7   : > { %v259_v12 = vpop.f32.mrb[0].mxu0 }
  0xe8   : > { %v1430_v13 = vpop.f32.mrb[1].mxu0  ;;  %v283_v14 = vpop.f32.mrb[0].mxu1 }
  0xe9   : > { %v262_v15 = vpop.f32.mrb[2].mxu0  ;;  %v1442_v16 = vpop.f32.mrb[1].mxu1 }
  0xea   : > { %v1431_v17 = vpop.f32.mrb[3].mxu0  ;;  %v286_v18 = vpop.f32.mrb[2].mxu1 }
  0xeb   : > { %v1443_v19 = vpop.f32.mrb[3].mxu1 }
  0xef   : > { %v267_v20 = vpop.f32.mrb[4].mxu0 }
  0xf0   : > { %v1434_v21 = vpop.f32.mrb[5].mxu0  ;;  %v291_v22 = vpop.f32.mrb[4].mxu1 }
  0xf1   : > { %v270_v23 = vpop.f32.mrb[6].mxu0  ;;  %v1446_v24 = vpop.f32.mrb[5].mxu1 }
  0xf2   : > { %v1435_v25 = vpop.f32.mrb[7].mxu0  ;;  %v294_v1 = vpop.f32.mrb[6].mxu1 }
  0xf3   : > { %v1447_v26 = vpop.f32.mrb[7].mxu1 }
  0xf7   : > { %v275_v27 = vpop.f32.mrb[8].mxu0 }
  0xf8   : > { %v350_v28 = vpop.f32.mrb[8].mxu1  ;;  %v1438_v29 = vpop.f32.mrb[9].mxu0 }
  0xf9   : > { %v351_v30 = vadd.f32 %v350_v28, %v259_v12  ;;  %v1452_v31 = vpop.f32.mrb[9].mxu1  ;;  %v278_v32 = vpop.f32.mrb[10].mxu0 }
  0xfa   : > { %v353_v33 = vpop.f32.mrb[10].mxu1  ;;  %v1439_v34 = vpop.f32.mrb[11].mxu0 }
  0xfb   : > { %v354_v35 = vadd.f32 %v353_v33, %v262_v15  ;;  %v1453_v36 = vpop.f32.mrb[11].mxu1 }
  0xff   : > { %v458_v37 = vpop.f32.mrb[12].mxu0 }
 0x100   : > { %v358_v38 = vpop.f32.mrb[12].mxu1  ;;  %v497_v39 = vadd.f32 %v458_v37, %v351_v30  ;;  %v1474_v40 = vpop.f32.mrb[13].mxu0 }
 0x101   : > { %v359_v41 = vadd.f32 %v358_v38, %v267_v20  ;;  %v1456_v42 = vpop.f32.mrb[13].mxu1  ;;  %v461_v43 = vpop.f32.mrb[14].mxu0 }
 0x102   : > { %v361_v44 = vpop.f32.mrb[14].mxu1  ;;  %v498_v45 = vadd.f32 %v461_v43, %v354_v35  ;;  %v1475_v46 = vpop.f32.mrb[15].mxu0 }
 0x103   : > { %v362_v47 = vadd.f32 %v361_v44, %v270_v23  ;;  %v1457_v48 = vpop.f32.mrb[15].mxu1 }
 0x107   : > { %v466_v49 = vpop.f32.mrb[16].mxu0 }
 0x108   : > { %v366_v50 = vpop.f32.mrb[16].mxu1  ;;  %v499_v51 = vadd.f32 %v466_v49, %v359_v41  ;;  %v1478_v52 = vpop.f32.mrb[17].mxu0 }
 0x109   : > { %v367_v53 = vadd.f32 %v366_v50, %v275_v27  ;;  %v1460_v54 = vpop.f32.mrb[17].mxu1  ;;  %v469_v55 = vpop.f32.mrb[18].mxu0 }
 0x10a   : > { %v369_v56 = vpop.f32.mrb[18].mxu1  ;;  %v500_v57 = vadd.f32 %v469_v55, %v362_v47  ;;  %v1479_v58 = vpop.f32.mrb[19].mxu0 }
 0x10b   : > { %v370_v59 = vadd.f32 %v369_v56, %v278_v32  ;;  %v1461_v60 = vpop.f32.mrb[19].mxu1 }
 0x10f   : > { %v474_v61 = vpop.f32.mrb[20].mxu0 }
 0x110   : > { %v374_v62 = vpop.f32.mrb[20].mxu1  ;;  %v501_v63 = vadd.f32 %v474_v61, %v367_v53  ;;  %v1482_v0 = vpop.f32.mrb[21].mxu0 }
 0x111   : > { %v375_v2 = vadd.f32 %v374_v62, %v283_v14  ;;  %v1464_v3 = vpop.f32.mrb[21].mxu1  ;;  %v477_v4 = vpop.f32.mrb[22].mxu0 }
 0x112   : > { %v377_v5 = vpop.f32.mrb[22].mxu1  ;;  %v502_v6 = vadd.f32 %v477_v4, %v370_v59  ;;  %v1483_v7 = vpop.f32.mrb[23].mxu0 }
 0x113   : > { %v378_v8 = vadd.f32 %v377_v5, %v286_v18  ;;  %v1465_v9 = vpop.f32.mrb[23].mxu1 }
 0x117   : > { %v482_v10 = vpop.f32.mrb[24].mxu0 }
 0x118   : > { %v382_v11 = vpop.f32.mrb[24].mxu1  ;;  %v503_v12 = vadd.f32 %v482_v10, %v375_v2  ;;  %v1486_v13 = vpop.f32.mrb[25].mxu0 }
 0x119   : > { %v383_v15 = vadd.f32 %v382_v11, %v291_v22  ;;  %v1468_v16 = vpop.f32.mrb[25].mxu1  ;;  %v485_v17 = vpop.f32.mrb[26].mxu0 }
 0x11a   : > { %v385_v19 = vpop.f32.mrb[26].mxu1  ;;  %v504_v20 = vadd.f32 %v485_v17, %v378_v8  ;;  %v1487_v21 = vpop.f32.mrb[27].mxu0 }
 0x11b   : > { %v386_v23 = vadd.f32 %v385_v19, %v294_v1  ;;  %v1469_v24 = vpop.f32.mrb[27].mxu1 }
 0x11f   : > { %v490_v14 = vpop.f32.mrb[28].mxu0 }
 0x120   : > { %v505_v25 = vadd.f32 %v490_v14, %v383_v15  ;;  %v576_v26 = vpop.f32.mrb[28].mxu1  ;;  %v1490_v27 = vpop.f32.mrb[29].mxu0 }
 0x121   : > { %v615_v28 = vadd.f32 %v576_v26, %v497_v39  ;;  %v1496_v29 = vpop.f32.mrb[29].mxu1  ;;  %v493_v18 = vpop.f32.mrb[30].mxu0 }
 0x122   : > { %v506_v30 = vadd.f32 %v493_v18, %v386_v23  ;;  %v579_v31 = vpop.f32.mrb[30].mxu1  ;;  %v1491_v32 = vpop.f32.mrb[31].mxu0 }
 0x123   : > { %v616_v33 = vadd.f32 %v579_v31, %v498_v45  ;;  %v1497_v34 = vpop.f32.mrb[31].mxu1 }
 0x127   : > { %v694_v22 = vpop.f32.mrb[32].mxu0 }
 0x128   : > { %v584_v35 = vpop.f32.mrb[32].mxu1  ;;  %v733_v36 = vadd.f32 %v694_v22, %v615_v28  ;;  %v1518_v37 = vpop.f32.mrb[33].mxu0 }
 0x129   : > { %v617_v38 = vadd.f32 %v584_v35, %v499_v51  ;;  %v1500_v40 = vpop.f32.mrb[33].mxu1  ;;  %v697_v1 = vpop.f32.mrb[34].mxu0 }
 0x12a   : > { %v587_v41 = vpop.f32.mrb[34].mxu1  ;;  %v734_v42 = vadd.f32 %v697_v1, %v616_v33  ;;  %v1519_v43 = vpop.f32.mrb[35].mxu0 }
 0x12b   : > { %v618_v44 = vadd.f32 %v587_v41, %v500_v57  ;;  %v1501_v46 = vpop.f32.mrb[35].mxu1 }
 0x12f   : > { %v702_v39 = vpop.f32.mrb[36].mxu0 }
 0x130   : > { %v592_v47 = vpop.f32.mrb[36].mxu1  ;;  %v735_v48 = vadd.f32 %v702_v39, %v617_v38  ;;  %v1522_v49 = vpop.f32.mrb[37].mxu0 }
 0x131   : > { %v619_v50 = vadd.f32 %v592_v47, %v501_v63  ;;  %v1504_v52 = vpop.f32.mrb[37].mxu1  ;;  %v705_v45 = vpop.f32.mrb[38].mxu0 }
 0x132   : > { %v595_v53 = vpop.f32.mrb[38].mxu1  ;;  %v736_v54 = vadd.f32 %v705_v45, %v618_v44  ;;  %v1523_v55 = vpop.f32.mrb[39].mxu0 }
 0x133   : > { %v620_v56 = vadd.f32 %v595_v53, %v502_v6  ;;  %v1505_v58 = vpop.f32.mrb[39].mxu1 }
 0x137   : > { %v710_v51 = vpop.f32.mrb[40].mxu0 }
 0x138   : > { %v600_v59 = vpop.f32.mrb[40].mxu1  ;;  %v737_v60 = vadd.f32 %v710_v51, %v619_v50  ;;  %v1526_v61 = vpop.f32.mrb[41].mxu0 }
 0x139   : > { %v621_v62 = vadd.f32 %v600_v59, %v503_v12  ;;  %v1508_v0 = vpop.f32.mrb[41].mxu1  ;;  %v713_v57 = vpop.f32.mrb[42].mxu0 }
 0x13a   : > { %v603_v2 = vpop.f32.mrb[42].mxu1  ;;  %v738_v3 = vadd.f32 %v713_v57, %v620_v56  ;;  %v1527_v4 = vpop.f32.mrb[43].mxu0 }
 0x13b   : > { %v622_v5 = vadd.f32 %v603_v2, %v504_v20  ;;  %v1509_v7 = vpop.f32.mrb[43].mxu1 }
 0x13f   : > { %v718_v63 = vpop.f32.mrb[44].mxu0 }
 0x140   : > { %v608_v8 = vpop.f32.mrb[44].mxu1  ;;  %v739_v9 = vadd.f32 %v718_v63, %v621_v62  ;;  %v1530_v10 = vpop.f32.mrb[45].mxu0 }
 0x141   : > { %v623_v11 = vadd.f32 %v608_v8, %v505_v25  ;;  %v1512_v13 = vpop.f32.mrb[45].mxu1  ;;  %v721_v6 = vpop.f32.mrb[46].mxu0 }
 0x142   : > { %v611_v15 = vpop.f32.mrb[46].mxu1  ;;  %v740_v16 = vadd.f32 %v721_v6, %v622_v5  ;;  %v1531_v17 = vpop.f32.mrb[47].mxu0 }
 0x143   : > { %v624_v19 = vadd.f32 %v611_v15, %v506_v30  ;;  %v1513_v21 = vpop.f32.mrb[47].mxu1 }
 0x147   : > { %v726_v12 = vpop.f32.mrb[48].mxu0 }
 0x148   : > { %v741_v23 = vadd.f32 %v726_v12, %v623_v11  ;;  %v812_v24 = vpop.f32.mrb[48].mxu1  ;;  %v1534_v14 = vpop.f32.mrb[49].mxu0 }
 0x149   : > { %v851_v26 = vadd.f32 %v812_v24, %v733_v36  ;;  %v1540_v27 = vpop.f32.mrb[49].mxu1  ;;  %v729_v20 = vpop.f32.mrb[50].mxu0 }
 0x14a   : > { %v742_v28 = vadd.f32 %v729_v20, %v624_v19  ;;  %v815_v29 = vpop.f32.mrb[50].mxu1  ;;  %v1535_v18 = vpop.f32.mrb[51].mxu0 }
 0x14b   : > { %v852_v31 = vadd.f32 %v815_v29, %v734_v42  ;;  %v1541_v32 = vpop.f32.mrb[51].mxu1 }
 0x14f   : > { %v930_v25 = vpop.f32.mrb[52].mxu0 }
 0x150   : > { %v820_v33 = vpop.f32.mrb[52].mxu1  ;;  %v969_v34 = vadd.f32 %v930_v25, %v851_v26  ;;  %v1562_v22 = vpop.f32.mrb[53].mxu0 }
 0x151   : > { %v853_v35 = vadd.f32 %v820_v33, %v735_v48  ;;  %v1544_v37 = vpop.f32.mrb[53].mxu1  ;;  %v933_v30 = vpop.f32.mrb[54].mxu0 }
 0x152   : > { %v823_v38 = vpop.f32.mrb[54].mxu1  ;;  %v970_v40 = vadd.f32 %v933_v30, %v852_v31  ;;  %v1563_v1 = vpop.f32.mrb[55].mxu0 }
 0x153   : > { %v854_v41 = vadd.f32 %v823_v38, %v736_v54  ;;  %v1545_v43 = vpop.f32.mrb[55].mxu1 }
 0x157   : > { %v938_v36 = vpop.f32.mrb[56].mxu0 }
 0x158   : > { %v828_v44 = vpop.f32.mrb[56].mxu1  ;;  %v971_v46 = vadd.f32 %v938_v36, %v853_v35  ;;  %v1566_v39 = vpop.f32.mrb[57].mxu0 }
 0x159   : > { %v855_v47 = vadd.f32 %v828_v44, %v737_v60  ;;  %v1548_v49 = vpop.f32.mrb[57].mxu1  ;;  %v941_v42 = vpop.f32.mrb[58].mxu0 }
 0x15a   : > { %v831_v50 = vpop.f32.mrb[58].mxu1  ;;  %v972_v52 = vadd.f32 %v941_v42, %v854_v41  ;;  %v1567_v45 = vpop.f32.mrb[59].mxu0 }
 0x15b   : > { %v856_v53 = vadd.f32 %v831_v50, %v738_v3  ;;  %v1549_v55 = vpop.f32.mrb[59].mxu1 }
 0x15f   : > { %v946_v48 = vpop.f32.mrb[60].mxu0 }
 0x160   : > { %v836_v56 = vpop.f32.mrb[60].mxu1  ;;  %v973_v58 = vadd.f32 %v946_v48, %v855_v47  ;;  %v1570_v51 = vpop.f32.mrb[61].mxu0 }
 0x161   : > { %v857_v59 = vadd.f32 %v836_v56, %v739_v9  ;;  %v1552_v61 = vpop.f32.mrb[61].mxu1  ;;  %v949_v54 = vpop.f32.mrb[62].mxu0 }
 0x162   : > { %v839_v62 = vpop.f32.mrb[62].mxu1  ;;  %v974_v0 = vadd.f32 %v949_v54, %v856_v53  ;;  %v1571_v57 = vpop.f32.mrb[63].mxu0 }
 0x163   : > { %v858_v2 = vadd.f32 %v839_v62, %v740_v16  ;;  %v1553_v4 = vpop.f32.mrb[63].mxu1 }
 0x167   : > { %v954_v60 = vpop.f32.mrb[64].mxu0 }
 0x168   : > { %v844_v5 = vpop.f32.mrb[64].mxu1  ;;  %v1939_v7 = vadd.f32 %v954_v60, %v857_v59  ;;  %v1574_v63 = vpop.f32.mrb[65].mxu0 }
 0x169   : > { %v859_v8 = vadd.f32 %v844_v5, %v741_v23  ;;  %v1556_v3 = vpop.f32.mrb[65].mxu1  ;;  %v957_v10 = vpop.f32.mrb[66].mxu0 }
 0x16a   : > { %v847_v11 = vpop.f32.mrb[66].mxu1  ;;  %v1941_v13 = vadd.f32 %v957_v10, %v858_v2  ;;  %v1575_v9 = vpop.f32.mrb[67].mxu0 }
 0x16b   : > { %v860_v6 = vadd.f32 %v847_v11, %v742_v28  ;;  %v1557_v15 = vpop.f32.mrb[67].mxu1  ;;  %v1951_v28 = vld [vmem:[%s1996_s2] ss:$0 sm:$0xff] }
 0x16f   : > { %v962_v17 = vpop.f32.mrb[68].mxu0 }
 0x170   : > { %v1943_v19 = vadd.f32 %v962_v17, %v859_v8  ;;  %v1048_v16 = vpop.f32.mrb[68].mxu1  ;;  %v1578_v21 = vpop.f32.mrb[69].mxu0 }
 0x171   : > { %v1087_v12 = vadd.f32 %v1048_v16, %v969_v34  ;;  %v1584_v24 = vpop.f32.mrb[69].mxu1  ;;  %v965_v14 = vpop.f32.mrb[70].mxu0 }
 0x172   : > { %v1945_v26 = vadd.f32 %v965_v14, %v860_v6  ;;  %v1051_v23 = vpop.f32.mrb[70].mxu1  ;;  %v1579_v27 = vpop.f32.mrb[71].mxu0 }
 0x173   : > { %v1088_v20 = vadd.f32 %v1051_v23, %v970_v40  ;;  %v1585_v29 = vpop.f32.mrb[71].mxu1 }
 0x177   : > { %v1166_v18 = vpop.f32.mrb[72].mxu0 }
 0x178   : > { %v1056_v31 = vpop.f32.mrb[72].mxu1  ;;  %v1205_v32 = vadd.f32 %v1166_v18, %v1087_v12  ;;  %v1606_v25 = vpop.f32.mrb[73].mxu0 }
 0x179   : > { %v1089_v33 = vadd.f32 %v1056_v31, %v971_v46  ;;  %v1588_v34 = vpop.f32.mrb[73].mxu1  ;;  %v1169_v22 = vpop.f32.mrb[74].mxu0 }
 0x17a   : > { %v1222_v35 = vadd.f32 %v1951_v28, %v1205_v32  ;;  %v1059_v37 = vpop.f32.mrb[74].mxu1  ;;  %v1206_v30 = vadd.f32 %v1169_v22, %v1088_v20  ;;  %v1607_v38 = vpop.f32.mrb[75].mxu0 }
 0x17b   : > { %v1090_v40 = vadd.f32 %v1059_v37, %v972_v52  ;;  %v1589_v1 = vpop.f32.mrb[75].mxu1 }
 0x17c   : > { %v1232_v41 = vmax.f32 %v1222_v35, 0.0  ;;  %v1223_v43 = vadd.f32 %v1951_v28, %v1206_v30 }
 0x17e   : > { %1243 = vst.msk [vmem:[%s1957_s13] sm:$0xff] %vm1242_vm3, %v1232_v41  ;;  %v1233_v36 = vmax.f32 %v1223_v43, 0.0 }
 0x17f   : > { %v1174_v44 = vpop.f32.mrb[76].mxu0 }
 0x180   : > { %1244 = vst.msk [vmem:[%s1957_s13 + $0x8] sm:$0xff] %vm1242_vm3, %v1233_v36  ;;  %v1064_v46 = vpop.f32.mrb[76].mxu1  ;;  %v1207_v39 = vadd.f32 %v1174_v44, %v1089_v33  ;;  %v1610_v47 = vpop.f32.mrb[77].mxu0 }
 0x181   : > { %v1091_v49 = vadd.f32 %v1064_v46, %v973_v58  ;;  %v1592_v42 = vpop.f32.mrb[77].mxu1  ;;  %v1177_v50 = vpop.f32.mrb[78].mxu0 }
 0x182   : > { %v1224_v52 = vadd.f32 %v1951_v28, %v1207_v39  ;;  %v1067_v45 = vpop.f32.mrb[78].mxu1  ;;  %v1208_v53 = vadd.f32 %v1177_v50, %v1090_v40  ;;  %v1611_v55 = vpop.f32.mrb[79].mxu0 }
 0x183   : > { %v1092_v48 = vadd.f32 %v1067_v45, %v974_v0  ;;  %v1593_v56 = vpop.f32.mrb[79].mxu1 }
 0x184   : > { %v1234_v51 = vmax.f32 %v1224_v52, 0.0  ;;  %v1225_v59 = vadd.f32 %v1951_v28, %v1208_v53 }
 0x186   : > { %1245 = vst.msk [vmem:[%s1957_s13 + $0x10] sm:$0xff] %vm1242_vm3, %v1234_v51  ;;  %v1235_v61 = vmax.f32 %v1225_v59, 0.0 }
 0x187   : > { %v1182_v54 = vpop.f32.mrb[80].mxu0 }
 0x188   : > { %1246 = vst.msk [vmem:[%s1957_s13 + $0x18] sm:$0xff] %vm1242_vm3, %v1235_v61  ;;  %v1072_v58 = vpop.f32.mrb[80].mxu1  ;;  %v1209_v62 = vadd.f32 %v1182_v54, %v1091_v49  ;;  %v1614_v57 = vpop.f32.mrb[81].mxu0 }
 0x189   : > { %v1093_v2 = vadd.f32 %v1072_v58, %v1939_v7  ;;  %v1596_v4 = vpop.f32.mrb[81].mxu1  ;;  %v1185_v60 = vpop.f32.mrb[82].mxu0 }
 0x18a   : > { %v1226_v0 = vadd.f32 %v1951_v28, %v1209_v62  ;;  %v1075_v5 = vpop.f32.mrb[82].mxu1  ;;  %v1210_v63 = vadd.f32 %v1185_v60, %v1092_v48  ;;  %v1615_v8 = vpop.f32.mrb[83].mxu0 }
 0x18b   : > { %v1094_v3 = vadd.f32 %v1075_v5, %v1941_v13  ;;  %v1597_v10 = vpop.f32.mrb[83].mxu1 }
 0x18c   : > { %v1236_v11 = vmax.f32 %v1226_v0, 0.0  ;;  %v1227_v9 = vadd.f32 %v1951_v28, %v1210_v63 }
 0x18e   : > { %1247 = vst.msk [vmem:[%s1957_s13 + $0x20] sm:$0xff] %vm1242_vm3, %v1236_v11  ;;  %v1237_v6 = vmax.f32 %v1227_v9, 0.0 }
 0x18f   : > { %v1190_v15 = vpop.f32.mrb[84].mxu0 }
 0x190   : > { %1248 = vst.msk [vmem:[%s1957_s13 + $0x28] sm:$0xff] %vm1242_vm3, %v1237_v6  ;;  %v1080_v7 = vpop.f32.mrb[84].mxu1  ;;  %v1211_v17 = vadd.f32 %v1190_v15, %v1093_v2  ;;  %v1618_v16 = vpop.f32.mrb[85].mxu0 }
 0x191   : > { %v1095_v21 = vadd.f32 %v1080_v7, %v1943_v19  ;;  %v1600_v12 = vpop.f32.mrb[85].mxu1  ;;  %v1193_v24 = vpop.f32.mrb[86].mxu0 }
 0x192   : > { %v1228_v13 = vadd.f32 %v1951_v28, %v1211_v17  ;;  %v1083_v14 = vpop.f32.mrb[86].mxu1  ;;  %v1212_v23 = vadd.f32 %v1193_v24, %v1094_v3  ;;  %v1619_v27 = vpop.f32.mrb[87].mxu0 }
 0x193   : > { %v1096_v20 = vadd.f32 %v1083_v14, %v1945_v26  ;;  %v1601_v29 = vpop.f32.mrb[87].mxu1 }
 0x194   : > { %v1238_v18 = vmax.f32 %v1228_v13, 0.0  ;;  %v1229_v31 = vadd.f32 %v1951_v28, %v1212_v23 }
 0x196   : > { %1249 = vst.msk [vmem:[%s1957_s13 + $0x30] sm:$0xff] %vm1242_vm3, %v1238_v18  ;;  %v1239_v32 = vmax.f32 %v1229_v31, 0.0 }
 0x197   : > { %v1198_v25 = vpop.f32.mrb[88].mxu0 }
 0x198   : > { %1250 = vst.msk [vmem:[%s1957_s13 + $0x38] sm:$0xff] %vm1242_vm3, %v1239_v32  ;;  %v1213_v19 = vadd.f32 %v1198_v25, %v1095_v21  ;;  %v1622_v33 = vpop.f32.mrb[89].mxu0 }
 0x199   : > { %v1201_v34 = vpop.f32.mrb[90].mxu0 }
 0x19a   : > { %v1230_v22 = vadd.f32 %v1951_v28, %v1213_v19  ;;  %v1214_v35 = vadd.f32 %v1201_v34, %v1096_v20  ;;  %v1623_v37 = vpop.f32.mrb[91].mxu0 }
 0x19c   : > { %v1240_v26 = vmax.f32 %v1230_v22, 0.0  ;;  %v1231_v30 = vadd.f32 %v1951_v28, %v1214_v35 }
 0x19e   : > { %1251 = vst.msk [vmem:[%s1957_s13 + $0x40] sm:$0xff] %vm1242_vm3, %v1240_v26  ;;  %v1241_v38 = vmax.f32 %v1231_v30, 0.0 }
 0x1a0   : > { %1253 = vst.msk [vmem:[%s1957_s13 + $0x48] sm:$0x3f] %vm1252_vm4, %v1241_v38 }
 0x1a1 PF: > { %s13_s12 = sadd.s32 1, %s1644_s12  }
 0x1a2   : > { %p10_p4 = scmp.ge.s32.totalorder %s13_s12, 8  }
 0x1a4   :  { %12 = sbr.rel (!%p10_p4) target bundleno = 1 (0x1), region = 70 }

// kernel: total_loss.12
= control target key start
LH: loop header
LB: loop body
LE: loop exit
PB: predicated region body
PF: predicated region fallthrough
CT: control target
= control target key end

     0   :  { %6 = vsyncpa [#allocation3], 0  ;;  %s625_s6 = smov 0   ;;  %s687_s0 = inlined_call_operand.vmem [shape: f32[6,16,16], index: 0, kind: input, shape index: {}]   ;;  %s688_s1 = inlined_call_operand.vmem [shape: f32[2,2], index: 1, kind: output, shape index: {}]  }
   0x1 LB: > { %s631_s7 = sadd.s32 4294967295, %s612_s6   ;;  %p488_p0 = scmp.ge.s32.totalorder %s612_s6, 1  ;;  %s612_s6 = sphi %s625_s6, %s12_s6  }
   0x2   : > { %p85_p1 = scmp.lt.s32.totalorder %s612_s6, 3 }
   0x4   : > { %p86_p2 = pnand %p488_p0, %p85_p1 }
   0x5   : > { %s101_s8 = smul.u32 (!%p86_p2), 3, %s631_s7  ;;  %vm120_vm0 = vcmask (!%p86_p2), 130048   ;;  %s507_s13 = sshll.u32 (!%p86_p2), %s631_s7, 7 }
   0x6   : > { %89 = sbr.rel (%p86_p2) target bundleno = 474 (0x1da), region = 24  ;;  %vm641_vm1 = vmpackc.low (!%p86_p2), %vm120_vm0, %vm120_vm0  ;;  %s428_s17 = scalar_lea.smem (!%p86_p2), [#allocation2], %s507_s13 }
   0x7   : > { %p102_p3 = scmp.lt.s32.totalorder (!%p86_p2), %s101_s8, 5  ;;  %s440_s21 = sshll.u32 (!%p86_p2), %s688_s1, 4  ;;  %s441_s21 = int_to_ptr.vmem [resolvable:$true] %s440_s21 }
   0x8   : > { %s467_s24 = scalar_lea.smem (!%p86_p2), %s428_s17, 1 [#allocation2]  ;;  %p577_p4 = scmp.eq.s32.totalorder (!%p86_p2), %s631_s7, 1 }
   0x9   : > { %s588_s26 = scalar_lea.vmem (!%p86_p2), %s441_s21, 32  ;;  %p595_p8 = scmp.lt.s32.totalorder (!%p86_p2), %s441_s21, %s441_s21 }
   0xa   : > { %p589_p5 = scmp.ne.s32.totalorder (!%p86_p2), %s441_s21, %s588_s26  ;;  %p596_p9 = scmp.lt.s32.totalorder (!%p86_p2), %s588_s26, %s588_s26 }
   0xc   : > { %p590_p6 = pnand (!%p86_p2), %p589_p5, %p577_p4  ;;  %p597_p10 = por (!%p86_p2), %p596_p9, %p595_p8 }
   0xd   : > { %s692_s8 = smov (!%p102_p3, %s101_s8), 5 }
   0xe   : > { %s513_s9 = sshll.u32 %s692_s8, 4  ;;  %p591_p7 = pneg %p590_p6 }
   0xf   : > { %s106_s12 = scalar_lea.vmem %s687_s0, %s513_s9 }
  0x10   : > { %v108_v1 = vld [vmem:[%s106_s12] sm:$0xff]  ;;  %v109_v2 = vld [vmem:[%s106_s12 + $0x8] sm:$0xff]  ;;  %v491_v3 = vld [vmem:[%s106_s12 + $0x10] sm:$0xff]  ;;  %p598_p11 = pnand %p597_p10, %p591_p7 }
  0x11   : > { %v547_v4 = vpack.c.bf16 %v109_v2, %v108_v1  ;;  %530 = vmatprep.mubr.msk.f32.mxu0 %vm120_vm0, %v108_v1  ;;  %v492_v5 = vld [vmem:[%s106_s12 + $0x18] sm:$0xff]  ;;  %v493_v6 = vld [vmem:[%s106_s12 + $0x20] sm:$0xff]  ;;  %v494_v7 = vld [vmem:[%s106_s12 + $0x28] sm:$0xff]  ;;  %537 = vmatprep.mubr.msk.f32.mxu1 %vm120_vm0, %v491_v3 }
  0x12   : > { %v553_v8 = vpack.c.bf16 %v492_v5, %v491_v3  ;;  %v559_v9 = vpack.c.bf16 %v494_v7, %v493_v6  ;;  %v116_v10 = vsub.f32 %v491_v3, %v493_v6  ;;  %v117_v11 = vsub.f32 %v492_v5, %v494_v7 }
  0x13   : > { %549 = vmatprep.subr.msk.bf16.mxu0 %vm641_vm1, %v547_v4  ;;  %v133_v16 = vsub.f32 %v108_v1, %v493_v6  ;;  %v134_v17 = vsub.f32 %v109_v2, %v494_v7 }
  0x14   : > { %552 = vmatpush3.bf16.xpose.msk.msra.mxu0 %vm641_vm1, %v547_v4  ;;  %555 = vmatprep.subr.msk.bf16.mxu1 %vm641_vm1, %v553_v8  ;;  %v118_v12 = vand.u32 2147483647, %v116_v10  ;;  %v119_v13 = vand.u32 2147483647, %v117_v11 }
  0x15   : > { %558 = vmatpush3.bf16.xpose.msk.msra.mxu1 %vm641_vm1, %v553_v8  ;;  %561 = vmatprep.subr.msk.bf16.mxu0 %vm641_vm1, %v559_v9  ;;  %v135_v19 = vand.u32 2147483647, %v133_v16  ;;  %v136_v20 = vand.u32 2147483647, %v134_v17 }
  0x16   : > { %v121_v14 = vsel %vm120_vm0, %v118_v12, 0.0  ;;  %v122_v15 = vsel %vm120_vm0, %v119_v13, 0.0 }
  0x17   : > { %v123_v18 = vadd.f32 %v122_v15, %v121_v14  ;;  %v137_v21 = vsel %vm120_vm0, %v135_v19, 0.0  ;;  %v138_v22 = vsel %vm120_vm0, %v136_v20, 0.0 }
  0x18   : > { %v139_v23 = vadd.f32 %v138_v22, %v137_v21 }
  0x19   : > { %124 = vadd.xlane.f32.xlu0 %v123_v18 }
  0x1b   : > { %531 = vmatmul.mubr.msk.f32.vlgmr.msra.gmra.mrb[0].mxu0 %vm120_vm0, %v109_v2 }
  0x1c   : > { %564 = vmatpush3.bf16.xpose.msk.msra.mxu0 %vm641_vm1, %v559_v9  ;;  %538 = vmatmul.mubr.msk.f32.vlgmr.msra.gmra.mrb[0].mxu1 %vm120_vm0, %v492_v5 }
  0x1d   : > { %544 = vmatprep.mubr.msk.f32.mxu0 %vm120_vm0, %v493_v6  ;;  %140 = vadd.xlane.f32.xlu0 %v139_v23 }
  0x23   : > { %545 = vmatmul.mubr.msk.f32.vlgmr.msra.gmra.mrb[2].mxu0 %vm120_vm0, %v494_v7 }
  0xa6   : > { %v125_v44 = vpop.xlane.xlu0 %124 }
  0xa7   : > { %v126_v45 = vrot.slane %v125_v44, 4 }
  0xa9   : > { %v127_v46 = vadd.f32 %v126_v45, %v125_v44 }
  0xaa   : > { %v141_v47 = vpop.xlane.xlu0 %140 }
  0xab   : > { %v142_v48 = vrot.slane %v141_v47, 4  ;;  %v128_v49 = vrot.slane %v127_v46, 2 }
  0xad   : > { %v143_v50 = vadd.f32 %v142_v48, %v141_v47  ;;  %v129_v53 = vadd.f32 %v128_v49, %v127_v46 }
  0xaf   : > { %v144_v51 = vrot.slane %v143_v50, 2  ;;  %v130_v54 = vrot.slane %v129_v53, 1 }
  0xb1   : > { %v145_v52 = vadd.f32 %v144_v51, %v143_v50  ;;  %v131_v56 = vadd.f32 %v130_v54, %v129_v53 }
  0xb3   : > { %v146_v55 = vrot.slane %v145_v52, 1  ;;  %565 = vpush %v131_v56 }
  0xb5   : > { %v147_v57 = vadd.f32 %v146_v55, %v145_v52 }
  0xb7   : > { %567 = vpush %v147_v57 }
  0xe4   : > { %s566_s14 = spop %565 }
  0xe8   : > { %s568_s15 = spop %567 }
  0xe9   : > { %s149_s16 = sadd.f32 %s568_s15, %s566_s14 }
  0xeb   : > { %429 = sst [smem:[%s428_s17]] %s149_s16 }
  0xee   : > { %v532_v24 = vpop.f32.mrb[0].mxu0 }
  0xef   : > { %v222_v25 = vpop.f32.mrb[1].mxu0  ;;  %v539_v26 = vpop.f32.mrb[0].mxu1 }
  0xf0   : > { %v303_v27 = vpop.f32.mrb[1].mxu1 }
  0xf6   : > { %v546_v28 = vpop.f32.mrb[2].mxu0 }
  0xf7   : > { %v394_v29 = vsub.f32 %v539_v26, %v546_v28  ;;  %v410_v30 = vsub.f32 %v532_v24, %v546_v28  ;;  %v384_v31 = vpop.f32.mrb[3].mxu0 }
  0xf8   : > { %v393_v32 = vsub.f32 %v303_v27, %v384_v31  ;;  %v409_v33 = vsub.f32 %v222_v25, %v384_v31 }
  0xf9   : > { %v396_v34 = vand.u32 2147483647, %v394_v29  ;;  %v412_v35 = vand.u32 2147483647, %v410_v30 }
  0xfa   : > { %v395_v36 = vand.u32 2147483647, %v393_v32  ;;  %v411_v37 = vand.u32 2147483647, %v409_v33 }
  0xfb   : > { %v398_v38 = vsel %vm120_vm0, %v396_v34, 0.0  ;;  %v414_v39 = vsel %vm120_vm0, %v412_v35, 0.0 }
  0xfc   : > { %v397_v40 = vsel %vm120_vm0, %v395_v36, 0.0  ;;  %v413_v41 = vsel %vm120_vm0, %v411_v37, 0.0 }
  0xfd   : > { %v399_v42 = vadd.f32 %v398_v38, %v397_v40  ;;  %v415_v43 = vadd.f32 %v414_v39, %v413_v41 }
  0xff   : > { %400 = vadd.xlane.f32.xlu1 %v399_v42 }
 0x103   : > { %416 = vadd.xlane.f32.xlu1 %v415_v43 }
 0x18c   : > { %v401_v58 = vpop.xlane.xlu1 %400 }
 0x18d   : > { %v402_v59 = vrot.slane %v401_v58, 4 }
 0x18f   : > { %v403_v60 = vadd.f32 %v402_v59, %v401_v58 }
 0x190   : > { %v417_v61 = vpop.xlane.xlu1 %416 }
 0x191   : > { %v404_v62 = vrot.slane %v403_v60, 2  ;;  %v418_v63 = vrot.slane %v417_v61, 4 }
 0x193   : > { %v419_v0 = vadd.f32 %v418_v63, %v417_v61  ;;  %v405_v1 = vadd.f32 %v404_v62, %v403_v60 }
 0x195   : > { %v420_v2 = vrot.slane %v419_v0, 2  ;;  %v406_v3 = vrot.slane %v405_v1, 1 }
 0x197   : > { %v421_v4 = vadd.f32 %v420_v2, %v419_v0  ;;  %v407_v5 = vadd.f32 %v406_v3, %v405_v1 }
 0x199   : > { %569 = vpush %v407_v5  ;;  %v422_v6 = vrot.slane %v421_v4, 1 }
 0x19b   : > { %v423_v7 = vadd.f32 %v422_v6, %v421_v4 }
 0x19d   : > { %571 = vpush %v423_v7 }
 0x1ca   : > { %s570_s18 = spop %569 }
 0x1ce   : > { %s572_s22 = spop %571 }
 0x1cf   : > { %s425_s23 = sadd.f32 %s572_s22, %s570_s18 }
 0x1d1   : > { %s426_s25 = smul.f32 0.00390625, %s425_s23 }
 0x1d3   : > { %432 = sst [smem:[%s467_s24]] %s426_s25 }
 0x1d4   : > { %601 = shalt.err (!%p598_p11)
}
 0x1d5   : > { %s614_s27 = smov [#allocation2]  }
 0x1d6   : > { %574 = dma.smem_to_vmem (%p577_p4), %s614_s27, 32, %s441_s21, [#allocation3]  }
 0x1d7   : > { %607 = dma.done.wait (%p577_p4), [#allocation3], 32  }
 0x1d8   : > { %609 = vsyncadd (%p577_p4), [#allocation3], 4294967264 }
 0x1d9   : > { %448 = sfence }
 0x1da PF: > { %s12_s6 = sadd.s32 1, %s612_s6  }
 0x1db   : > { %p9_p12 = scmp.ge.s32.totalorder %s12_s6, 4  }
 0x1dd   :  { %11 = sbr.rel (!%p9_p12) target bundleno = 1 (0x1), region = 55 }
 0x1e4   :  { %454 = vsyncpa [#allocation3], 1 }
 0x1e5   :  { %456 = vsyncpa [#allocation3 + $0x1], 1 }

// kernel: total_loss.11
= control target key start
LH: loop header
LB: loop body
LE: loop exit
PB: predicated region body
PF: predicated region fallthrough
CT: control target
= control target key end

     0   :  { %6 = vsyncpa [#allocation3], 0  ;;  %s544_s6 = smov 0   ;;  %s585_s0 = inlined_call_operand.vmem [shape: f32[6,8,64], index: 0, kind: input, shape index: {}]   ;;  %s586_s1 = inlined_call_operand.vmem [shape: f32[2,2], index: 1, kind: output, shape index: {}]  }
   0x1 LB: > { %s550_s7 = sadd.s32 4294967295, %s529_s6   ;;  %p443_p0 = scmp.ge.s32.totalorder %s529_s6, 1  ;;  %s529_s6 = sphi %s544_s6, %s12_s6  }
   0x2   : > { %p84_p1 = scmp.lt.s32.totalorder %s529_s6, 3 }
   0x4   : > { %p85_p2 = pnand %p443_p0, %p84_p1 }
   0x5   : > { %s99_s8 = smul.u32 (!%p85_p2), 3, %s550_s7  ;;  %v531_v0 = vmov (!%p85_p2), 0.0   ;;  %vm532_vm0 = vmmov (!%p85_p2), 0   ;;  %vm112_vm1 = vcmask (!%p85_p2), 523264   ;;  %vm357_vm2 = vcmask (!%p85_p2), 64512   ;;  %s453_s13 = sshll.u32 (!%p85_p2), %s550_s7, 7 }
   0x6   : > { %88 = sbr.rel (%p85_p2) target bundleno = 460 (0x1cc), region = 24  ;;  %465 = vmatprep.subr.mxu0 (!%p85_p2), %v531_v0  ;;  %467 = vmatprep.mubr.msk.f32.mxu0 (!%p85_p2), %vm532_vm0, %v531_v0  ;;  %s383_s17 = scalar_lea.smem (!%p85_p2), [#allocation2], %s453_s13 }
   0x7   : > { %p100_p3 = scmp.lt.s32.totalorder (!%p85_p2), %s99_s8, 5  ;;  %470 = vmatprep.subr.mxu1 (!%p85_p2), %v531_v0  ;;  %472 = vmatprep.mubr.msk.f32.mxu1 (!%p85_p2), %vm532_vm0, %v531_v0  ;;  %s395_s21 = sshll.u32 (!%p85_p2), %s586_s1, 4  ;;  %s396_s21 = int_to_ptr.vmem [resolvable:$true] %s395_s21 }
   0x8   : > { %s422_s24 = scalar_lea.smem (!%p85_p2), %s383_s17, 1 [#allocation2]  ;;  %p492_p4 = scmp.eq.s32.totalorder (!%p85_p2), %s550_s7, 1 }
   0x9   : > { %s505_s26 = scalar_lea.vmem (!%p85_p2), %s396_s21, 32  ;;  %p512_p8 = scmp.lt.s32.totalorder (!%p85_p2), %s396_s21, %s396_s21 }
   0xa   : > { %p506_p5 = scmp.ne.s32.totalorder (!%p85_p2), %s396_s21, %s505_s26  ;;  %p513_p9 = scmp.lt.s32.totalorder (!%p85_p2), %s505_s26, %s505_s26 }
   0xc   : > { %p507_p6 = pnand (!%p85_p2), %p506_p5, %p492_p4  ;;  %p514_p10 = por (!%p85_p2), %p513_p9, %p512_p8 }
   0xd   : > { %s588_s8 = smov (!%p100_p3, %s99_s8), 5 }
   0xe   : > { %s444_s9 = sshll.u32 %s588_s8, 3  ;;  %p508_p7 = pneg %p507_p6 }
   0xf   : > { %s103_s12 = scalar_lea.vmem %s585_s0, %s444_s9 }
  0x10   : > { %v105_v1 = vld [vmem:[%s103_s12] sm:$0xff]  ;;  %v445_v2 = vld [vmem:[%s103_s12 + $0x8] sm:$0xff]  ;;  %v446_v3 = vld [vmem:[%s103_s12 + $0x10] sm:$0xff]  ;;  %p515_p11 = pnand %p514_p10, %p508_p7 }
  0x11   : > { %466 = vmatpush3.xpose.msk.msra.mxu0 %vm112_vm1, %v105_v1  ;;  %471 = vmatpush3.xpose.msk.msra.mxu1 %vm112_vm1, %v445_v2  ;;  %v110_v4 = vsub.f32 %v445_v2, %v446_v3  ;;  %v123_v7 = vsub.f32 %v105_v1, %v446_v3 }
  0x12   : > { %475 = vmatprep.subr.mxu0 %v531_v0 }
  0x13   : > { %v111_v5 = vand.u32 2147483647, %v110_v4  ;;  %v124_v8 = vand.u32 2147483647, %v123_v7 }
  0x14   : > { %468 = vmatmul.mubr.msk.f32.vlgmr.msra.gmra.mrb[0].mxu0 %vm112_vm1, %v105_v1  ;;  %473 = vmatmul.mubr.msk.f32.vlgmr.msra.gmra.mrb[0].mxu1 %vm112_vm1, %v445_v2 }
  0x15   : > { %476 = vmatpush3.xpose.msk.msra.mxu0 %vm112_vm1, %v446_v3  ;;  %477 = vmatprep.mubr.msk.f32.mxu0 %vm532_vm0, %v531_v0  ;;  %v113_v6 = vsel %vm112_vm1, %v111_v5, 0.0  ;;  %v125_v9 = vsel %vm112_vm1, %v124_v8, 0.0 }
  0x16   : > { %114 = vadd.xlane.f32.xlu0 %v113_v6 }
  0x18   : > { %478 = vmatmul.mubr.msk.f32.vlgmr.msra.gmra.mrb[2].mxu0 %vm112_vm1, %v446_v3 }
  0x1a   : > { %126 = vadd.xlane.f32.xlu0 %v125_v9 }
  0xa3   : > { %v115_v22 = vpop.xlane.xlu0 %114 }
  0xa4   : > { %v116_v23 = vrot.slane %v115_v22, 4 }
  0xa6   : > { %v117_v24 = vadd.f32 %v116_v23, %v115_v22 }
  0xa7   : > { %v127_v25 = vpop.xlane.xlu0 %126 }
  0xa8   : > { %v128_v26 = vrot.slane %v127_v25, 4  ;;  %v118_v27 = vrot.slane %v117_v24, 2 }
  0xaa   : > { %v129_v28 = vadd.f32 %v128_v26, %v127_v25  ;;  %v119_v31 = vadd.f32 %v118_v27, %v117_v24 }
  0xac   : > { %v130_v29 = vrot.slane %v129_v28, 2  ;;  %v120_v32 = vrot.slane %v119_v31, 1 }
  0xae   : > { %v131_v30 = vadd.f32 %v130_v29, %v129_v28  ;;  %v121_v34 = vadd.f32 %v120_v32, %v119_v31 }
  0xb0   : > { %v132_v33 = vrot.slane %v131_v30, 1  ;;  %480 = vpush %v121_v34 }
  0xb2   : > { %v133_v35 = vadd.f32 %v132_v33, %v131_v30 }
  0xb4   : > { %482 = vpush %v133_v35 }
  0xe1   : > { %s481_s14 = spop %480 }
  0xe5   : > { %s483_s15 = spop %482 }
  0xe6   : > { %s135_s16 = sadd.f32 %s483_s15, %s481_s14 }
  0xe7   : > { %v205_v10 = vpop.f32.mrb[0].mxu0  ;;  %v278_v11 = vpop.f32.mrb[0].mxu1 }
  0xe8   : > { %v469_v12 = vpop.f32.mrb[1].mxu0  ;;  %v474_v13 = vpop.f32.mrb[1].mxu1  ;;  %384 = sst [smem:[%s383_s17]] %s135_s16 }
  0xeb   : > { %v351_v14 = vpop.f32.mrb[2].mxu0 }
  0xec   : > { %v355_v15 = vsub.f32 %v278_v11, %v351_v14  ;;  %v368_v16 = vsub.f32 %v205_v10, %v351_v14  ;;  %v479_v17 = vpop.f32.mrb[3].mxu0 }
  0xee   : > { %v356_v18 = vand.u32 2147483647, %v355_v15  ;;  %v369_v19 = vand.u32 2147483647, %v368_v16 }
  0xf0   : > { %v358_v20 = vsel %vm357_vm2, %v356_v18, 0.0  ;;  %v370_v21 = vsel %vm357_vm2, %v369_v19, 0.0 }
  0xf1   : > { %359 = vadd.xlane.f32.xlu1 %v358_v20 }
  0xf5   : > { %371 = vadd.xlane.f32.xlu1 %v370_v21 }
 0x17e   : > { %v360_v36 = vpop.xlane.xlu1 %359 }
 0x17f   : > { %v361_v37 = vrot.slane %v360_v36, 4 }
 0x181   : > { %v362_v38 = vadd.f32 %v361_v37, %v360_v36 }
 0x182   : > { %v372_v39 = vpop.xlane.xlu1 %371 }
 0x183   : > { %v363_v40 = vrot.slane %v362_v38, 2  ;;  %v373_v41 = vrot.slane %v372_v39, 4 }
 0x185   : > { %v374_v42 = vadd.f32 %v373_v41, %v372_v39  ;;  %v364_v43 = vadd.f32 %v363_v40, %v362_v38 }
 0x187   : > { %v375_v44 = vrot.slane %v374_v42, 2  ;;  %v365_v45 = vrot.slane %v364_v43, 1 }
 0x189   : > { %v376_v46 = vadd.f32 %v375_v44, %v374_v42  ;;  %v366_v47 = vadd.f32 %v365_v45, %v364_v43 }
 0x18b   : > { %484 = vpush %v366_v47  ;;  %v377_v48 = vrot.slane %v376_v46, 1 }
 0x18d   : > { %v378_v49 = vadd.f32 %v377_v48, %v376_v46 }
 0x18f   : > { %486 = vpush %v378_v49 }
 0x1bc   : > { %s485_s18 = spop %484 }
 0x1c0   : > { %s487_s22 = spop %486 }
 0x1c1   : > { %s380_s23 = sadd.f32 %s487_s22, %s485_s18 }
 0x1c3   : > { %s381_s25 = smul.f32 0.001953125, %s380_s23 }
 0x1c5   : > { %387 = sst [smem:[%s422_s24]] %s381_s25 }
 0x1c6   : > { %518 = shalt.err (!%p515_p11)
}
 0x1c7   : > { %s533_s27 = smov [#allocation2]  }
 0x1c8   : > { %489 = dma.smem_to_vmem (%p492_p4), %s533_s27, 32, %s396_s21, [#allocation3]  }
 0x1c9   : > { %524 = dma.done.wait (%p492_p4), [#allocation3], 32  }
 0x1ca   : > { %526 = vsyncadd (%p492_p4), [#allocation3], 4294967264 }
 0x1cb   : > { %403 = sfence }
 0x1cc PF: > { %s12_s6 = sadd.s32 1, %s529_s6  }
 0x1cd   : > { %p9_p12 = scmp.ge.s32.totalorder %s12_s6, 4  }
 0x1cf   :  { %11 = sbr.rel (!%p9_p12) target bundleno = 1 (0x1), region = 55 }
 0x1d6   :  { %409 = vsyncpa [#allocation3], 1 }
 0x1d7   :  { %411 = vsyncpa [#allocation3 + $0x1], 1 }

// kernel: total_loss.10
= control target key start
LH: loop header
LB: loop body
LE: loop exit
PB: predicated region body
PF: predicated region fallthrough
CT: control target
= control target key end

     0   :  { %s1059_s12 = smov 0   ;;  %s1155_s0 = inlined_call_operand.vmem [shape: f32[6,36,16], index: 0, kind: input, shape index: {}]   ;;  %s1156_s1 = inlined_call_operand.vmem [shape: bf16[9,16,32], index: 1, kind: input, shape index: {}]   ;;  %s1157_s2 = inlined_call_operand.vmem [shape: f32[1,32], index: 2, kind: input, shape index: {}]   ;;  %s1158_s3 = inlined_call_operand.vmem [shape: f32[6,22,32], index: 3, kind: output, shape index: {}]  }
   0x1 LB: > { %s878_s13 = sadd.s32 4294967295, %s1037_s12   ;;  %p882_p0 = scmp.ge.s32.totalorder %s1037_s12, 1  ;;  %s1037_s12 = sphi %s1059_s12, %s13_s12  }
   0x2   : > { %p137_p1 = scmp.lt.s32.totalorder %s1037_s12, 7 }
   0x4   : > { %p138_p2 = pnand %p882_p0, %p137_p1 }
   0x5   : > { %v1022_v0 = vld [vmem:[%s1156_s1 + $0x8] sm:$0xff] (!%p138_p2)   ;;  %p161_p3 = scmp.lt.s32.totalorder (!%p138_p2), %s878_s13, 5  ;;  %v1023_v1 = vld [vmem:[%s1156_s1] sm:$0xff] (!%p138_p2)   ;;  %v1024_v2 = vld [vmem:[%s1156_s1 + $0x10] sm:$0xff] (!%p138_p2)   ;;  %vm193_vm0 = vcmask (!%p138_p2), 130048   ;;  %vm821_vm1 = vcmask (!%p138_p2), 259072  }
   0x6   : > { %141 = sbr.rel (%p138_p2) target bundleno = 275 (0x113), region = 32  ;;  %958 = vmatprep.subr.bf16.mxu0 (!%p138_p2), %v1022_v0  ;;  %964 = vmatprep.subr.bf16.mxu1 (!%p138_p2), %v1023_v1  ;;  %v1025_v3 = vld [vmem:[%s1156_s1 + $0x18] sm:$0xff] (!%p138_p2)   ;;  %v1026_v17 = vld [vmem:[%s1156_s1 + $0x20] sm:$0xff] (!%p138_p2)   ;;  %v1027_v21 = vld [vmem:[%s1156_s1 + $0x28] sm:$0xff] (!%p138_p2)   ;;  %vm818_vm2 = vcmask (!%p138_p2), 261120  }
   0x7   : > { %959 = vmatpush3.bf16.msra.mxu0 (!%p138_p2), %v1022_v0  ;;  %965 = vmatpush3.bf16.msra.mxu1 (!%p138_p2), %v1023_v1  ;;  %v1028_v30 = vld [vmem:[%s1156_s1 + $0x30] sm:$0xff] (!%p138_p2)   ;;  %v1029_v32 = vld [vmem:[%s1156_s1 + $0x38] sm:$0xff] (!%p138_p2)   ;;  %v1030_v42 = vld [vmem:[%s1156_s1 + $0x40] sm:$0xff] (!%p138_p2)  }
   0x8   : > { %970 = vmatprep.subr.bf16.mxu0 (!%p138_p2), %v1024_v2  ;;  %976 = vmatprep.subr.bf16.mxu1 (!%p138_p2), %v1025_v3 }
   0xd   : > { %s1160_s13 = smov (!%p161_p3, %s878_s13), 5 }
   0xe   : > { %s1012_s22 = smul.u32 40, %s1160_s13 }
   0xf   : > { %s1013_s9 = smul.u32 24, %s1160_s13 }
  0x10   : > { %s1085_s25 = scalar_lea.vmem %s1155_s0, %s1012_s22 }
  0x11   : > { %v179_v4 = vld [vmem:[%s1085_s25 + $0x1] sm:$0xff]  ;;  %v180_v5 = vld [vmem:[%s1085_s25 + $0x9] sm:$0xff]  ;;  %v181_v9 = vld [vmem:[%s1085_s25 + $0x11] sm:$0x3f]  ;;  %s170_s16 = scalar_lea.vmem %s1158_s3, %s1013_s9 }
  0x12   : > { %v172_v6 = vld [vmem:[%s1085_s25] sm:$0xff]  ;;  %v182_v7 = vpack.c.bf16 %v180_v5, %v179_v4  ;;  %v173_v8 = vld [vmem:[%s1085_s25 + $0x8] sm:$0xff]  ;;  %v174_v10 = vld [vmem:[%s1085_s25 + $0x10] sm:$0x3f]  ;;  %v183_v12 = vpack.c.bf16 %v181_v9, %v181_v9 }
  0x13   : > { %v175_v11 = vpack.c.bf16 %v173_v8, %v172_v6  ;;  %v176_v13 = vpack.c.bf16 %v174_v10, %v174_v10  ;;  %v308_v14 = vld [vmem:[%s1085_s25 + $0x2] sm:$0xff]  ;;  %v309_v15 = vld [vmem:[%s1085_s25 + $0xa] sm:$0xff]  ;;  %v310_v22 = vld [vmem:[%s1085_s25 + $0x12] sm:$0x3f] }
  0x14   : > { %960 = vmatprep.mubr.msk.bf16.mxu0 %vm193_vm0, %v182_v7  ;;  %v311_v16 = vpack.c.bf16 %v309_v15, %v308_v14  ;;  %v379_v18 = vld [vmem:[%s1085_s25 + $0x6] sm:$0xff]  ;;  %v380_v19 = vld [vmem:[%s1085_s25 + $0xe] sm:$0xff]  ;;  %v381_v23 = vld [vmem:[%s1085_s25 + $0x16] sm:$0x3f]  ;;  %v312_v26 = vpack.c.bf16 %v310_v22, %v310_v22 }
  0x15   : > { %966 = vmatprep.mubr.msk.bf16.mxu1 %vm193_vm0, %v175_v11  ;;  %961 = vmatmul.mubr.msk.bf16.vlgmr.msra.gmra.mrb[0].mxu0 %vm193_vm0, %v183_v12  ;;  %v382_v20 = vpack.c.bf16 %v380_v19, %v379_v18  ;;  %v450_v24 = vld [vmem:[%s1085_s25 + $0x7] sm:$0xff]  ;;  %v451_v25 = vld [vmem:[%s1085_s25 + $0xf] sm:$0xff]  ;;  %v383_v28 = vpack.c.bf16 %v381_v23, %v381_v23  ;;  %v452_v33 = vld [vmem:[%s1085_s25 + $0x17] sm:$0x3f] }
  0x16   : > { %967 = vmatmul.mubr.msk.bf16.vlgmr.msra.gmra.mrb[0].mxu1 %vm193_vm0, %v176_v13  ;;  %971 = vmatpush3.bf16.msra.mxu0 %v1024_v2  ;;  %v522_v27 = vld [vmem:[%s1085_s25 + $0x10] sm:$0xff]  ;;  %v453_v29 = vpack.c.bf16 %v451_v25, %v450_v24  ;;  %v523_v34 = vld [vmem:[%s1085_s25 + $0x18] sm:$0x3f]  ;;  %v454_v37 = vpack.c.bf16 %v452_v33, %v452_v33  ;;  %v736_v50 = vld [vmem:[%s1085_s25 + $0x1e] sm:$0x3f] }
  0x17   : > { %977 = vmatpush3.bf16.msra.mxu1 %v1025_v3  ;;  %972 = vmatprep.mubr.msk.bf16.mxu0 %vm193_vm0, %v311_v16  ;;  %v524_v31 = vpack.c.bf16 %v522_v27, %v173_v8  ;;  %v592_v35 = vld [vmem:[%s1085_s25 + $0xc] sm:$0xff]  ;;  %v593_v36 = vld [vmem:[%s1085_s25 + $0x14] sm:$0xff]  ;;  %v525_v40 = vpack.c.bf16 %v523_v34, %v523_v34  ;;  %v594_v44 = vld [vmem:[%s1085_s25 + $0x1c] sm:$0x3f]  ;;  %v738_v51 = vpack.c.bf16 %v736_v50, %v736_v50 }
  0x18   : > { %982 = vmatprep.subr.bf16.mxu0 %v1026_v17  ;;  %978 = vmatprep.mubr.msk.bf16.mxu1 %vm193_vm0, %v382_v20  ;;  %v663_v38 = vld [vmem:[%s1085_s25 + $0xd] sm:$0xff]  ;;  %v664_v39 = vld [vmem:[%s1085_s25 + $0x15] sm:$0xff]  ;;  %v595_v41 = vpack.c.bf16 %v593_v36, %v592_v35  ;;  %v665_v45 = vld [vmem:[%s1085_s25 + $0x1d] sm:$0x3f]  ;;  %v596_v47 = vpack.c.bf16 %v594_v44, %v594_v44 }
  0x19   : > { %988 = vmatprep.subr.bf16.mxu1 %v1027_v21  ;;  %v666_v43 = vpack.c.bf16 %v664_v39, %v663_v38  ;;  %v735_v46 = vld [vmem:[%s1085_s25 + $0x16] sm:$0xff]  ;;  %v667_v48 = vpack.c.bf16 %v665_v45, %v665_v45 }
  0x1a   : > { %v737_v49 = vpack.c.bf16 %v735_v46, %v380_v19 }
  0x1d   : > { %973 = vmatmul.mubr.msk.bf16.vlgmr.msra.gmra.mrb[4].mxu0 %vm193_vm0, %v312_v26 }
  0x1e   : > { %983 = vmatpush3.bf16.msra.mxu0 %v1026_v17  ;;  %979 = vmatmul.mubr.msk.bf16.vlgmr.msra.gmra.mrb[4].mxu1 %vm193_vm0, %v383_v28 }
  0x1f   : > { %989 = vmatpush3.bf16.msra.mxu1 %v1027_v21  ;;  %984 = vmatprep.mubr.msk.bf16.mxu0 %vm193_vm0, %v453_v29 }
  0x20   : > { %994 = vmatprep.subr.bf16.mxu0 %v1028_v30  ;;  %990 = vmatprep.mubr.msk.bf16.mxu1 %vm193_vm0, %v524_v31 }
  0x21   : > { %1000 = vmatprep.subr.bf16.mxu1 %v1029_v32 }
  0x25   : > { %985 = vmatmul.mubr.msk.bf16.vlgmr.msra.gmra.mrb[8].mxu0 %vm193_vm0, %v454_v37 }
  0x26   : > { %995 = vmatpush3.bf16.msra.mxu0 %v1028_v30  ;;  %991 = vmatmul.mubr.msk.bf16.vlgmr.msra.gmra.mrb[8].mxu1 %vm193_vm0, %v525_v40 }
  0x27   : > { %1001 = vmatpush3.bf16.msra.mxu1 %v1029_v32  ;;  %996 = vmatprep.mubr.msk.bf16.mxu0 %vm193_vm0, %v595_v41 }
  0x28   : > { %1006 = vmatprep.subr.bf16.mxu0 %v1030_v42  ;;  %1002 = vmatprep.mubr.msk.bf16.mxu1 %vm193_vm0, %v666_v43 }
  0x2d   : > { %997 = vmatmul.mubr.msk.bf16.vlgmr.msra.gmra.mrb[12].mxu0 %vm193_vm0, %v596_v47 }
  0x2e   : > { %1007 = vmatpush3.bf16.msra.mxu0 %v1030_v42  ;;  %1003 = vmatmul.mubr.msk.bf16.vlgmr.msra.gmra.mrb[12].mxu1 %vm193_vm0, %v667_v48  ;;  %v928_v42 = vld [vmem:[%s1157_s2] ss:$0 sm:$0xff] }
  0x2f   : > { %1008 = vmatprep.mubr.msk.bf16.mxu0 %vm193_vm0, %v737_v49 }
  0x35   : > { %1009 = vmatmul.mubr.msk.bf16.vlgmr.msra.gmra.mrb[16].mxu0 %vm193_vm0, %v738_v51 }
  0xe8   : > { %v962_v52 = vpop.f32.mrb[0].mxu0 }
  0xe9   : > { %v968_v53 = vpop.f32.mrb[0].mxu1  ;;  %v234_v54 = vpop.f32.mrb[1].mxu0 }
  0xea   : > { %v303_v55 = vadd.f32 %v968_v53, %v962_v52  ;;  %v294_v56 = vpop.f32.mrb[1].mxu1  ;;  %v963_v57 = vpop.f32.mrb[2].mxu0 }
  0xeb   : > { %v295_v58 = vadd.f32 %v294_v56, %v234_v54  ;;  %v969_v59 = vpop.f32.mrb[2].mxu1  ;;  %v237_v60 = vpop.f32.mrb[3].mxu0 }
  0xec   : > { %v297_v61 = vpop.f32.mrb[3].mxu1 }
  0xed   : > { %v298_v62 = vadd.f32 %v297_v61, %v237_v60 }
  0xf0   : > { %v974_v63 = vpop.f32.mrb[4].mxu0 }
  0xf1   : > { %v378_v0 = vadd.f32 %v974_v63, %v303_v55  ;;  %v362_v1 = vpop.f32.mrb[5].mxu0  ;;  %v980_v2 = vpop.f32.mrb[4].mxu1 }
  0xf2   : > { %v376_v3 = vadd.f32 %v362_v1, %v295_v58  ;;  %v975_v4 = vpop.f32.mrb[6].mxu0  ;;  %v433_v5 = vpop.f32.mrb[5].mxu1 }
  0xf3   : > { %v449_v6 = vadd.f32 %v980_v2, %v378_v0  ;;  %v365_v7 = vpop.f32.mrb[7].mxu0  ;;  %v981_v8 = vpop.f32.mrb[6].mxu1 }
  0xf4   : > { %v377_v9 = vadd.f32 %v365_v7, %v298_v62  ;;  %v447_v10 = vadd.f32 %v433_v5, %v376_v3  ;;  %v436_v11 = vpop.f32.mrb[7].mxu1 }
  0xf6   : > { %v448_v12 = vadd.f32 %v436_v11, %v377_v9 }
  0xf8   : > { %v986_v13 = vpop.f32.mrb[8].mxu0 }
  0xf9   : > { %v520_v14 = vadd.f32 %v986_v13, %v449_v6  ;;  %v504_v15 = vpop.f32.mrb[9].mxu0  ;;  %v992_v16 = vpop.f32.mrb[8].mxu1 }
  0xfa   : > { %v518_v17 = vadd.f32 %v504_v15, %v447_v10  ;;  %v987_v18 = vpop.f32.mrb[10].mxu0  ;;  %v575_v19 = vpop.f32.mrb[9].mxu1 }
  0xfb   : > { %v591_v20 = vadd.f32 %v992_v16, %v520_v14  ;;  %v507_v21 = vpop.f32.mrb[11].mxu0  ;;  %v993_v22 = vpop.f32.mrb[10].mxu1 }
  0xfc   : > { %v519_v23 = vadd.f32 %v507_v21, %v448_v12  ;;  %v589_v24 = vadd.f32 %v575_v19, %v518_v17  ;;  %v578_v25 = vpop.f32.mrb[11].mxu1 }
  0xfe   : > { %v590_v26 = vadd.f32 %v578_v25, %v519_v23 }
 0x100   : > { %v998_v27 = vpop.f32.mrb[12].mxu0 }
 0x101   : > { %v662_v28 = vadd.f32 %v998_v27, %v591_v20  ;;  %v646_v29 = vpop.f32.mrb[13].mxu0  ;;  %v1004_v30 = vpop.f32.mrb[12].mxu1 }
 0x102   : > { %v660_v31 = vadd.f32 %v646_v29, %v589_v24  ;;  %v999_v32 = vpop.f32.mrb[14].mxu0  ;;  %v717_v33 = vpop.f32.mrb[13].mxu1 }
 0x103   : > { %v733_v34 = vadd.f32 %v1004_v30, %v662_v28  ;;  %v649_v35 = vpop.f32.mrb[15].mxu0  ;;  %v1005_v36 = vpop.f32.mrb[14].mxu1 }
 0x104   : > { %v661_v37 = vadd.f32 %v649_v35, %v590_v26  ;;  %v731_v38 = vadd.f32 %v717_v33, %v660_v31  ;;  %v720_v39 = vpop.f32.mrb[15].mxu1 }
 0x106   : > { %v732_v40 = vadd.f32 %v720_v39, %v661_v37 }
 0x108   : > { %v1010_v41 = vpop.f32.mrb[16].mxu0 }
 0x109   : > { %v804_v43 = vadd.f32 %v1010_v41, %v733_v34  ;;  %v788_v44 = vpop.f32.mrb[17].mxu0 }
 0x10a   : > { %v802_v45 = vadd.f32 %v788_v44, %v731_v38  ;;  %v1011_v46 = vpop.f32.mrb[18].mxu0 }
 0x10b   : > { %v814_v47 = vadd.f32 %v928_v42, %v804_v43  ;;  %v791_v48 = vpop.f32.mrb[19].mxu0 }
 0x10c   : > { %v812_v49 = vadd.f32 %v928_v42, %v802_v45  ;;  %v803_v50 = vadd.f32 %v791_v48, %v732_v40 }
 0x10d   : > { %v817_v51 = vmax.f32 %v814_v47, 0.0 }
 0x10e   : > { %v815_v52 = vmax.f32 %v812_v49, 0.0  ;;  %v813_v53 = vadd.f32 %v928_v42, %v803_v50 }
 0x10f   : > { %822 = vst.msk [vmem:[%s170_s16 + $0x10] sm:$0x3f] %vm821_vm1, %v817_v51 }
 0x110   : > { %819 = vst.msk [vmem:[%s170_s16] sm:$0xff] %vm818_vm2, %v815_v52  ;;  %v816_v54 = vmax.f32 %v813_v53, 0.0 }
 0x112   : > { %820 = vst.msk [vmem:[%s170_s16 + $0x8] sm:$0xff] %vm818_vm2, %v816_v54 }
 0x113 PF: > { %s13_s12 = sadd.s32 1, %s1037_s12  }
 0x114   : > { %p10_p4 = scmp.ge.s32.totalorder %s13_s12, 8  }
 0x116   :  { %12 = sbr.rel (!%p10_p4) target bundleno = 1 (0x1), region = 70 }

// kernel: total_loss.13
= control target key start
LH: loop header
LB: loop body
LE: loop exit
PB: predicated region body
PF: predicated region fallthrough
CT: control target
= control target key end

     0   :  { %6 = vsyncpa [#allocation3], 0  ;;  %s783_s6 = smov 0   ;;  %s893_s0 = inlined_call_operand.vmem [shape: f32[6,32,4], index: 0, kind: input, shape index: {}]   ;;  %s894_s1 = inlined_call_operand.vmem [shape: f32[2,2], index: 1, kind: output, shape index: {}]  }
   0x1 LB: > { %s789_s7 = sadd.s32 4294967295, %s770_s6   ;;  %p575_p0 = scmp.ge.s32.totalorder %s770_s6, 1  ;;  %s770_s6 = sphi %s783_s6, %s12_s6  }
   0x2   : > { %p85_p1 = scmp.lt.s32.totalorder %s770_s6, 3 }
   0x4   : > { %p86_p2 = pnand %p575_p0, %p85_p1 }
   0x5   : > { %s101_s8 = smul.u32 (!%p86_p2), 3, %s789_s7  ;;  %vm130_vm0 = vcmask (!%p86_p2), 31744   ;;  %vm471_vm2 = vcmask (!%p86_p2), 261120   ;;  %s610_s13 = sshll.u32 (!%p86_p2), %s789_s7, 7 }
   0x6   : > { %89 = sbr.rel (%p86_p2) target bundleno = 494 (0x1ee), region = 24  ;;  %vm801_vm1 = vmpackc.low (!%p86_p2), %vm130_vm0, %vm130_vm0  ;;  %s515_s17 = scalar_lea.smem (!%p86_p2), [#allocation2], %s610_s13 }
   0x7   : > { %p102_p3 = scmp.lt.s32.totalorder (!%p86_p2), %s101_s8, 5  ;;  %s527_s21 = sshll.u32 (!%p86_p2), %s894_s1, 4  ;;  %s528_s21 = int_to_ptr.vmem [resolvable:$true] %s527_s21 }
   0x8   : > { %s554_s24 = scalar_lea.smem (!%p86_p2), %s515_s17, 1 [#allocation2]  ;;  %p735_p4 = scmp.eq.s32.totalorder (!%p86_p2), %s789_s7, 1 }
   0x9   : > { %s746_s26 = scalar_lea.vmem (!%p86_p2), %s528_s21, 32  ;;  %p753_p8 = scmp.lt.s32.totalorder (!%p86_p2), %s528_s21, %s528_s21 }
   0xa   : > { %p747_p5 = scmp.ne.s32.totalorder (!%p86_p2), %s528_s21, %s746_s26  ;;  %p754_p9 = scmp.lt.s32.totalorder (!%p86_p2), %s746_s26, %s746_s26 }
   0xc   : > { %p748_p6 = pnand (!%p86_p2), %p747_p5, %p735_p4  ;;  %p755_p10 = por (!%p86_p2), %p754_p9, %p753_p8 }
   0xd   : > { %s898_s8 = smov (!%p102_p3, %s101_s8), 5 }
   0xe   : > { %s616_s9 = sshll.u32 %s898_s8, 5  ;;  %p749_p7 = pneg %p748_p6 }
   0xf   : > { %s797_s12 = scalar_lea.vmem %s893_s0, %s616_s9 }
  0x10   : > { %v108_v1 = vld [vmem:[%s797_s12] sm:$0xff]  ;;  %v109_v2 = vld [vmem:[%s797_s12 + $0x8] sm:$0xff]  ;;  %v110_v13 = vld [vmem:[%s797_s12 + $0x10] sm:$0xff]  ;;  %p756_p11 = pnand %p755_p10, %p749_p7 }
  0x11   : > { %v582_v3 = vld [vmem:[%s797_s12 + $0x40] sm:$0xff]  ;;  %v583_v4 = vld [vmem:[%s797_s12 + $0x48] sm:$0xff]  ;;  %v683_v6 = vpack.c.bf16 %v109_v2, %v108_v1  ;;  %649 = vmatprep.mubr.msk.f32.mxu0 %vm130_vm0, %v108_v1  ;;  %v111_v14 = vld [vmem:[%s797_s12 + $0x18] sm:$0xff] }
  0x12   : > { %v147_v5 = vsub.f32 %v108_v1, %v582_v3  ;;  %v578_v7 = vld [vmem:[%s797_s12 + $0x20] sm:$0xff]  ;;  %v579_v8 = vld [vmem:[%s797_s12 + $0x28] sm:$0xff]  ;;  %v148_v9 = vsub.f32 %v109_v2, %v583_v4  ;;  %v580_v15 = vld [vmem:[%s797_s12 + $0x30] sm:$0xff]  ;;  %v689_v16 = vpack.c.bf16 %v111_v14, %v110_v13  ;;  %v707_v19 = vpack.c.bf16 %v583_v4, %v582_v3 }
  0x13   : > { %v122_v10 = vsub.f32 %v578_v7, %v582_v3  ;;  %v123_v11 = vsub.f32 %v579_v8, %v583_v4  ;;  %v695_v12 = vpack.c.bf16 %v579_v8, %v578_v7  ;;  %663 = vmatprep.mubr.msk.f32.mxu1 %vm130_vm0, %v578_v7  ;;  %685 = vmatprep.subr.msk.bf16.mxu0 %vm801_vm1, %v683_v6  ;;  %v581_v17 = vld [vmem:[%s797_s12 + $0x38] sm:$0xff]  ;;  %v584_v20 = vld [vmem:[%s797_s12 + $0x50] sm:$0xff] }
  0x14   : > { %688 = vmatpush3.bf16.xpose.msk.msra.mxu0 %vm801_vm1, %v683_v6  ;;  %v701_v18 = vpack.c.bf16 %v581_v17, %v580_v15  ;;  %v585_v21 = vld [vmem:[%s797_s12 + $0x58] sm:$0xff]  ;;  %v124_v25 = vsub.f32 %v580_v15, %v584_v20  ;;  %v151_v26 = vand.u32 2147483647, %v147_v5  ;;  %v152_v31 = vand.u32 2147483647, %v148_v9 }
  0x15   : > { %697 = vmatprep.subr.msk.bf16.mxu1 %vm801_vm1, %v695_v12  ;;  %691 = vmatprep.subr.msk.bf16.mxu0 %vm801_vm1, %v689_v16  ;;  %v713_v22 = vpack.c.bf16 %v585_v21, %v584_v20  ;;  %v126_v23 = vand.u32 2147483647, %v122_v10  ;;  %v127_v24 = vand.u32 2147483647, %v123_v11  ;;  %v125_v27 = vsub.f32 %v581_v17, %v585_v21 }
  0x16   : > { %700 = vmatpush3.bf16.xpose.msk.msra.mxu1 %vm801_vm1, %v695_v12  ;;  %v128_v28 = vand.u32 2147483647, %v124_v25  ;;  %v149_v35 = vsub.f32 %v110_v13, %v584_v20  ;;  %v150_v38 = vsub.f32 %v111_v14, %v585_v21  ;;  %v155_v40 = vsel %vm130_vm0, %v151_v26, 0.0 }
  0x17   : > { %703 = vmatprep.subr.msk.bf16.mxu1 %vm801_vm1, %v701_v18  ;;  %v131_v29 = vsel %vm130_vm0, %v126_v23, 0.0  ;;  %v132_v30 = vsel %vm130_vm0, %v127_v24, 0.0  ;;  %v129_v33 = vand.u32 2147483647, %v125_v27  ;;  %v156_v42 = vsel %vm130_vm0, %v152_v31, 0.0 }
  0x18   : > { %v133_v32 = vadd.f32 %v132_v30, %v131_v29  ;;  %v134_v34 = vsel %vm130_vm0, %v128_v28, 0.0  ;;  %v153_v39 = vand.u32 2147483647, %v149_v35  ;;  %v154_v43 = vand.u32 2147483647, %v150_v38 }
  0x19   : > { %v136_v37 = vsel %vm130_vm0, %v129_v33, 0.0  ;;  %v157_v44 = vadd.f32 %v156_v42, %v155_v40 }
  0x1a   : > { %v135_v36 = vadd.f32 %v134_v34, %v133_v32  ;;  %v158_v45 = vsel %vm130_vm0, %v153_v39, 0.0  ;;  %v160_v47 = vsel %vm130_vm0, %v154_v43, 0.0 }
  0x1b   : > { %v159_v46 = vadd.f32 %v158_v45, %v157_v44 }
  0x1c   : > { %694 = vmatpush3.bf16.xpose.msk.msra.mxu0 %vm801_vm1, %v689_v16  ;;  %v137_v41 = vadd.f32 %v136_v37, %v135_v36 }
  0x1d   : > { %709 = vmatprep.subr.msk.bf16.mxu0 %vm801_vm1, %v707_v19  ;;  %v161_v48 = vadd.f32 %v160_v47, %v159_v46 }
  0x1e   : > { %706 = vmatpush3.bf16.xpose.msk.msra.mxu1 %vm801_vm1, %v701_v18  ;;  %138 = vadd.xlane.f32.xlu0 %v137_v41 }
  0x1f   : > { %719 = vmatprep.subr.msk.bf16.mxu1 %vm801_vm1, %v707_v19 }
  0x22   : > { %162 = vadd.xlane.f32.xlu0 %v161_v48 }
  0x23   : > { %650 = vmatmul.mubr.msk.f32.vlgmr.msra.gmra.mrb[0].mxu0 %vm130_vm0, %v109_v2 }
  0x24   : > { %712 = vmatpush3.bf16.xpose.msk.msra.mxu0 %vm801_vm1, %v707_v19  ;;  %652 = vmatprep.mubr.msk.f32.mxu0 %vm130_vm0, %v110_v13 }
  0x25   : > { %664 = vmatmul.mubr.msk.f32.vlgmr.msra.gmra.mrb[0].mxu1 %vm130_vm0, %v579_v8  ;;  %715 = vmatprep.subr.msk.bf16.mxu0 %vm801_vm1, %v713_v22 }
  0x26   : > { %721 = vmatpush3.bf16.xpose.msk.msra.mxu1 %vm801_vm1, %v707_v19  ;;  %666 = vmatprep.mubr.msk.f32.mxu1 %vm130_vm0, %v580_v15 }
  0x27   : > { %720 = vmatprep.subr.msk.bf16.mxu1 %vm801_vm1, %v713_v22  ;;  %653 = vmatmul.mubr.msk.f32.gmra.mrb[2].mxu0 %vm130_vm0, %v111_v14 }
  0x28   : > { %677 = vmatprep.mubr.msk.f32.mxu0 %vm130_vm0, %v582_v3 }
  0x29   : > { %667 = vmatmul.mubr.msk.f32.gmra.mrb[2].mxu1 %vm130_vm0, %v581_v17 }
  0x2a   : > { %680 = vmatprep.mubr.msk.f32.mxu1 %vm130_vm0, %v584_v20 }
  0x2c   : > { %718 = vmatpush3.bf16.xpose.msk.msra.mxu0 %vm801_vm1, %v713_v22 }
  0x2e   : > { %722 = vmatpush3.bf16.xpose.msk.msra.mxu1 %vm801_vm1, %v713_v22 }
  0x33   : > { %678 = vmatmul.mubr.msk.f32.vlgmr.msra.gmra.mrb[4].mxu0 %vm130_vm0, %v583_v4 }
  0x35   : > { %681 = vmatmul.mubr.msk.f32.vlgmr.msra.gmra.mrb[4].mxu1 %vm130_vm0, %v585_v21 }
  0xab   : > { %v139_v27 = vpop.xlane.xlu0 %138 }
  0xac   : > { %v140_v28 = vrot.slane %v139_v27, 4 }
  0xae   : > { %v141_v29 = vadd.f32 %v140_v28, %v139_v27 }
  0xaf   : > { %v163_v30 = vpop.xlane.xlu0 %162 }
  0xb0   : > { %v164_v31 = vrot.slane %v163_v30, 4  ;;  %v142_v32 = vrot.slane %v141_v29, 2 }
  0xb2   : > { %v165_v33 = vadd.f32 %v164_v31, %v163_v30  ;;  %v143_v35 = vadd.f32 %v142_v32, %v141_v29 }
  0xb4   : > { %v166_v34 = vrot.slane %v165_v33, 2  ;;  %v144_v37 = vrot.slane %v143_v35, 1 }
  0xb6   : > { %v167_v36 = vadd.f32 %v166_v34, %v165_v33  ;;  %v145_v39 = vadd.f32 %v144_v37, %v143_v35 }
  0xb8   : > { %v168_v38 = vrot.slane %v167_v36, 1  ;;  %723 = vpush %v145_v39 }
  0xba   : > { %v169_v40 = vadd.f32 %v168_v38, %v167_v36 }
  0xbc   : > { %725 = vpush %v169_v40 }
  0xe9   : > { %s724_s14 = spop %723 }
  0xed   : > { %s726_s15 = spop %725 }
  0xee   : > { %s171_s16 = sadd.f32 %s726_s15, %s724_s14 }
  0xf0   : > { %516 = sst [smem:[%s515_s17]] %s171_s16 }
  0xf6   : > { %v651_v49 = vpop.f32.mrb[0].mxu0 }
  0xf7   : > { %v250_v50 = vpop.f32.mrb[1].mxu0 }
  0xf8   : > { %v665_v51 = vpop.f32.mrb[0].mxu1 }
  0xf9   : > { %v347_v52 = vpop.f32.mrb[1].mxu1 }
  0xfa   : > { %v654_v53 = vpop.f32.mrb[2].mxu0 }
  0xfb   : > { %v260_v54 = vpop.f32.mrb[3].mxu0 }
  0xfc   : > { %v668_v55 = vpop.f32.mrb[2].mxu1 }
  0xfd   : > { %v357_v56 = vpop.f32.mrb[3].mxu1 }
 0x106   : > { %v679_v57 = vpop.f32.mrb[4].mxu0 }
 0x107   : > { %v464_v58 = vsub.f32 %v665_v51, %v679_v57  ;;  %v489_v59 = vsub.f32 %v651_v49, %v679_v57  ;;  %v444_v61 = vpop.f32.mrb[5].mxu0 }
 0x108   : > { %v682_v60 = vpop.f32.mrb[4].mxu1  ;;  %v463_v0 = vsub.f32 %v347_v52, %v444_v61  ;;  %v488_v1 = vsub.f32 %v250_v50, %v444_v61 }
 0x109   : > { %v466_v62 = vsub.f32 %v668_v55, %v682_v60  ;;  %v491_v63 = vsub.f32 %v654_v53, %v682_v60  ;;  %v454_v2 = vpop.f32.mrb[5].mxu1  ;;  %v468_v3 = vand.u32 2147483647, %v464_v58  ;;  %v493_v4 = vand.u32 2147483647, %v489_v59 }
 0x10a   : > { %v465_v5 = vsub.f32 %v357_v56, %v454_v2  ;;  %v490_v6 = vsub.f32 %v260_v54, %v454_v2  ;;  %v467_v7 = vand.u32 2147483647, %v463_v0  ;;  %v492_v10 = vand.u32 2147483647, %v488_v1 }
 0x10b   : > { %v473_v8 = vsel %vm471_vm2, %v468_v3, 0.0  ;;  %v497_v9 = vsel %vm471_vm2, %v493_v4, 0.0  ;;  %v470_v12 = vand.u32 2147483647, %v466_v62  ;;  %v495_v15 = vand.u32 2147483647, %v491_v63 }
 0x10c   : > { %v469_v11 = vand.u32 2147483647, %v465_v5  ;;  %v472_v13 = vsel %vm471_vm2, %v467_v7, 0.0  ;;  %v494_v14 = vand.u32 2147483647, %v490_v6  ;;  %v496_v16 = vsel %vm471_vm2, %v492_v10, 0.0 }
 0x10d   : > { %v474_v17 = vadd.f32 %v473_v8, %v472_v13  ;;  %v498_v18 = vadd.f32 %v497_v9, %v496_v16  ;;  %v477_v22 = vsel %vm471_vm2, %v470_v12, 0.0  ;;  %v501_v25 = vsel %vm471_vm2, %v495_v15, 0.0 }
 0x10e   : > { %v475_v19 = vsel %vm471_vm2, %v469_v11, 0.0  ;;  %v499_v20 = vsel %vm471_vm2, %v494_v14, 0.0 }
 0x10f   : > { %v476_v21 = vadd.f32 %v475_v19, %v474_v17  ;;  %v500_v23 = vadd.f32 %v499_v20, %v498_v18 }
 0x111   : > { %v478_v24 = vadd.f32 %v477_v22, %v476_v21  ;;  %v502_v26 = vadd.f32 %v501_v25, %v500_v23 }
 0x113   : > { %479 = vadd.xlane.f32.xlu1 %v478_v24 }
 0x117   : > { %503 = vadd.xlane.f32.xlu1 %v502_v26 }
 0x1a0   : > { %v480_v41 = vpop.xlane.xlu1 %479 }
 0x1a1   : > { %v481_v42 = vrot.slane %v480_v41, 4 }
 0x1a3   : > { %v482_v43 = vadd.f32 %v481_v42, %v480_v41 }
 0x1a4   : > { %v504_v44 = vpop.xlane.xlu1 %503 }
 0x1a5   : > { %v483_v45 = vrot.slane %v482_v43, 2  ;;  %v505_v46 = vrot.slane %v504_v44, 4 }
 0x1a7   : > { %v506_v47 = vadd.f32 %v505_v46, %v504_v44  ;;  %v484_v48 = vadd.f32 %v483_v45, %v482_v43 }
 0x1a9   : > { %v507_v49 = vrot.slane %v506_v47, 2  ;;  %v485_v50 = vrot.slane %v484_v48, 1 }
 0x1ab   : > { %v508_v51 = vadd.f32 %v507_v49, %v506_v47  ;;  %v486_v52 = vadd.f32 %v485_v50, %v484_v48 }
 0x1ad   : > { %727 = vpush %v486_v52  ;;  %v509_v53 = vrot.slane %v508_v51, 1 }
 0x1af   : > { %v510_v54 = vadd.f32 %v509_v53, %v508_v51 }
 0x1b1   : > { %729 = vpush %v510_v54 }
 0x1de   : > { %s728_s18 = spop %727 }
 0x1e2   : > { %s730_s22 = spop %729 }
 0x1e3   : > { %s512_s23 = sadd.f32 %s730_s22, %s728_s18 }
 0x1e5   : > { %s513_s25 = smul.f32 0.0078125, %s512_s23 }
 0x1e7   : > { %519 = sst [smem:[%s554_s24]] %s513_s25 }
 0x1e8   : > { %759 = shalt.err (!%p756_p11)
}
 0x1e9   : > { %s772_s27 = smov [#allocation2]  }
 0x1ea   : > { %732 = dma.smem_to_vmem (%p735_p4), %s772_s27, 32, %s528_s21, [#allocation3]  }
 0x1eb   : > { %765 = dma.done.wait (%p735_p4), [#allocation3], 32  }
 0x1ec   : > { %767 = vsyncadd (%p735_p4), [#allocation3], 4294967264 }
 0x1ed   : > { %535 = sfence }
 0x1ee PF: > { %s12_s6 = sadd.s32 1, %s770_s6  }
 0x1ef   : > { %p9_p12 = scmp.ge.s32.totalorder %s12_s6, 4  }
 0x1f1   :  { %11 = sbr.rel (!%p9_p12) target bundleno = 1 (0x1), region = 55 }
 0x1f8   :  { %541 = vsyncpa [#allocation3], 1 }
 0x1f9   :  { %543 = vsyncpa [#allocation3 + $0x1], 1 }

</bundles_post_ra>
